<compile_context>
chip_gen: v7x
topology: tpu7x:2x2x1
jax: 0.10.0
libtpu: 0.0.40
codegen_flags: <defaults>
</compile_context>

<pallas_src>
import functools

import jax
import jax.numpy as jnp
import numpy as np
from jax.experimental import pallas as pl
from jax.experimental.pallas import tpu as pltpu

EPS = 1e-5
_VMEM_LIMIT = 32 * 1024 * 1024   # conservative: safe on v5e/v6e and v7x (64 MiB)
_PADL = 8                        # interior columns start on an 8-sublane boundary


def _conv3x3(xpad, w, H, W, C, Cout, use_im2col):
    """3x3 conv (padding=1) from a zero-haloed padded activation value.

    xpad : (H+2, W+_PADL+1, C) activation in the MXU dtype. Rows 0 / H+1 and
           columns _PADL-1 / _PADL+W are zero; interior at [1:H+1, _PADL:_PADL+W].
    w    : (9*C, Cout) weights, row order (ky, kx, cin).
    Returns (H*W, Cout) float32 (MXU accumulation dtype).
    """
    if use_im2col:
        # single big-K matmul (K = 9*Cin)
        cols = [xpad[dy:dy + H, _PADL - 1 + dx:_PADL - 1 + dx + W, :]
                for dy in range(3) for dx in range(3)]
        patches = jnp.concatenate(cols, axis=-1).reshape(H * W, 9 * C)
        return jnp.dot(patches, w, preferred_element_type=jnp.float32)

    # accumulate form: 9 dots with K = Cin, no (HW, 9C) patch materialization
    acc = jnp.zeros((H * W, Cout), jnp.float32)
    for dy in range(3):
        for dx in range(3):
            k = dy * 3 + dx
            tile = xpad[dy:dy + H, _PADL - 1 + dx:_PADL - 1 + dx + W, :]
            acc = acc + jnp.dot(tile.reshape(H * W, C),
                                w[k * C:(k + 1) * C, :],
                                preferred_element_type=jnp.float32)
    return acc


def _bn_partial_stats(y):
    """Per-block (sum, sum-of-squares) per channel; y: (HW, C) f32 -> (2, C)."""
    s = jnp.sum(y, axis=0, keepdims=True)
    ss = jnp.sum(y * y, axis=0, keepdims=True)
    return jnp.concatenate([s, ss], axis=0)


def _make_conv1_kernel(H, W, C, Cout, use_im2col):
    def kernel(x_ref, w_ref, y_ref, stats_ref, xpad_ref):
        # Zero the whole padded scratch exactly once. The interior is fully
        # overwritten every step; the halo strips are never touched again
        # (requires the sequential "arbitrary" grid axis).
        @pl.when(pl.program_id(0) == 0)
        def _():
            xpad_ref[...] = jnp.zeros(xpad_ref.shape, xpad_ref.dtype)

        # Cast to the MXU dtype BEFORE the shifted-slice / patch build.
        # Aligned interior store: outer-axis offset 1, sublane offset _PADL=8.
        xpad_ref[1:H + 1, _PADL:_PADL + W, :] = x_ref[0].astype(xpad_ref.dtype)

        y = _conv3x3(xpad_ref[...], w_ref[...], H, W, C, Cout, use_im2col)
        stats_ref[...] = _bn_partial_stats(y)[None]          # f32 stats
        y_ref[...] = y.astype(y_ref.dtype)[None]              # (1, HW, Cout), no transpose
    return kernel


def _make_conv2_kernel(H, W, C, Cout, use_im2col):
    def kernel(y1_ref, a1_ref, c1_ref, w_ref, y_ref, stats_ref, xpad_ref):
        @pl.when(pl.program_id(0) == 0)
        def _():
            xpad_ref[...] = jnp.zeros(xpad_ref.shape, xpad_ref.dtype)

        # BN1 folded affine + ReLU in f32 on the VPU, then cast to the MXU
        # dtype before it goes anywhere near the conv scratch.
        y1 = jnp.maximum(y1_ref[0].astype(jnp.float32) * a1_ref[...] + c1_ref[...], 0.0)
        xpad_ref[1:H + 1, _PADL:_PADL + W, :] = \
            y1.reshape(H, W, C).astype(xpad_ref.dtype)

        y = _conv3x3(xpad_ref[...], w_ref[...], H, W, C, Cout, use_im2col)
        stats_ref[...] = _bn_partial_stats(y)[None]
        y_ref[...] = y.astype(y_ref.dtype)[None]
    return kernel


@functools.partial(jax.jit, static_argnames=("use_bf16", "use_im2col"))
def basic_block_forward(x_nchw, w1_hwio, w2_hwio, g1, b1, g2, b2,
                        use_bf16=False, use_im2col=False):
    """x_nchw: (N, C, H, W) f32; w: (3,3,C,C) HWIO; gamma/beta: (C,)."""
    N, C, H, W = x_nchw.shape
    Cout = w1_hwio.shape[-1]
    assert Cout == C, "no-downsample BasicBlock requires Cin == Cout"
    HW = H * W
    cnt = float(N * HW)
    mxu_dtype = jnp.bfloat16 if use_bf16 else jnp.float32
    slab_dtype = mxu_dtype   # inter-pass slabs in bf16 when use_bf16

    # single layout transpose (no padded HBM copy); also the residual operand
    x_nhwc = jnp.transpose(x_nchw, (0, 2, 3, 1))
    w1_2d = w1_hwio.reshape(9 * C, Cout).astype(mxu_dtype)
    w2_2d = w2_hwio.reshape(9 * Cout, Cout).astype(mxu_dtype)

    cparams = pltpu.CompilerParams(
        dimension_semantics=("arbitrary",),      # sequential: zeroed halo persists
        vmem_limit_bytes=_VMEM_LIMIT)

    pad_shape = (H + 2, W + _PADL + 1, C)

    # ---- pass 1: conv1 + per-image BN1 partial stats ----
    y1_slab, stats1 = pl.pallas_call(
        _make_conv1_kernel(H, W, C, Cout, use_im2col),
        grid=(N,),
        in_specs=[
            pl.BlockSpec((1, H, W, C), lambda n: (n, 0, 0, 0)),
            pl.BlockSpec((9 * C, Cout), lambda n: (0, 0)),
        ],
        out_specs=[
            pl.BlockSpec((1, HW, Cout), lambda n: (n, 0, 0)),
            pl.BlockSpec((1, 2, Cout), lambda n: (n, 0, 0)),
        ],
        out_shape=[
            jax.ShapeDtypeStruct((N, HW, Cout), slab_dtype),
            jax.ShapeDtypeStruct((N, 2, Cout), jnp.float32),
        ],
        scratch_shapes=[pltpu.VMEM(pad_shape, mxu_dtype)],
        compiler_params=cparams,
    )(x_nhwc, w1_2d)

    # tiny per-channel reduction on host: global mean/var -> folded affine
    s1 = jnp.sum(stats1, axis=0)                             # (2, C)
    mean1 = s1[0] / cnt
    var1 = jnp.maximum(s1[1] / cnt - mean1 * mean1, 0.0)     # guard E[x^2]-E[x]^2
    inv1 = jax.lax.rsqrt(var1 + EPS)
    a1 = (g1 * inv1).reshape(1, Cout)
    c1 = (b1 - mean1 * g1 * inv1).reshape(1, Cout)

    # ---- pass 2: BN1 affine + ReLU + conv2 + per-image BN2 partial stats ----
    y2_slab, stats2 = pl.pallas_call(
        _make_conv2_kernel(H, W, Cout, Cout, use_im2col),
        grid=(N,),
        in_specs=[
            pl.BlockSpec((1, HW, Cout), lambda n: (n, 0, 0)),
            pl.BlockSpec((1, Cout), lambda n: (0, 0)),
            pl.BlockSpec((1, Cout), lambda n: (0, 0)),
            pl.BlockSpec((9 * Cout, Cout), lambda n: (0, 0)),
        ],
        out_specs=[
            pl.BlockSpec((1, HW, Cout), lambda n: (n, 0, 0)),
            pl.BlockSpec((1, 2, Cout), lambda n: (n, 0, 0)),
        ],
        out_shape=[
            jax.ShapeDtypeStruct((N, HW, Cout), slab_dtype),
            jax.ShapeDtypeStruct((N, 2, Cout), jnp.float32),
        ],
        scratch_shapes=[pltpu.VMEM((H + 2, W + _PADL + 1, Cout), mxu_dtype)],
        compiler_params=cparams,
    )(y1_slab, a1, c1, w2_2d)

    s2 = jnp.sum(stats2, axis=0)
    mean2 = s2[0] / cnt
    var2 = jnp.maximum(s2[1] / cnt - mean2 * mean2, 0.0)
    inv2 = jax.lax.rsqrt(var2 + EPS)
    a2 = (g2 * inv2).reshape(1, 1, Cout)
    c2 = (b2 - mean2 * g2 * inv2).reshape(1, 1, Cout)

    # ---- pass 3 in plain jnp (XLA fuses): BN2 affine + residual + ReLU + layout ----
    out_hwc = jnp.maximum(
        y2_slab.astype(jnp.float32) * a2 + c2 + x_nhwc.reshape(N, HW, C), 0.0)
    return jnp.transpose(out_hwc.reshape(N, H, W, C), (0, 3, 1, 2))


def reference_forward(x_nchw, w1_hwio, w2_hwio, g1, b1, g2, b2):
    """Pure-JAX reference (mirrors PyTorch BasicBlock in training mode)."""
    def conv(x, w_hwio):
        w_oihw = jnp.transpose(w_hwio, (3, 2, 0, 1))
        return jax.lax.conv_general_dilated(
            x, w_oihw, window_strides=(1, 1), padding=((1, 1), (1, 1)),
            dimension_numbers=("NCHW", "OIHW", "NCHW"))

    def bn(x, gamma, beta):
        mean = jnp.mean(x, axis=(0, 2, 3), keepdims=True)
        var = jnp.mean((x - mean) ** 2, axis=(0, 2, 3), keepdims=True)
        return (x - mean) * jax.lax.rsqrt(var + EPS) * gamma.reshape(1, -1, 1, 1) \
            + beta.reshape(1, -1, 1, 1)

    out = jnp.maximum(bn(conv(x_nchw, w1_hwio), g1, b1), 0.0)
    out = bn(conv(out, w2_hwio), g2, b2)
    return jnp.maximum(out + x_nchw, 0.0)


if __name__ == "__main__":
    # Small shapes consistent with the module: inplanes == planes (no downsample).
    N, C, H, W = 2, 4, 16, 16

    key = jax.random.PRNGKey(0)
    kx, kw1, kw2, kg1, kb1, kg2, kb2 = jax.random.split(key, 7)

    x = jax.random.normal(kx, (N, C, H, W), jnp.float32)

    # conv3x3 weights, HWIO layout: (3, 3, Cin, Cout); PyTorch-style init.
    n_fan = 3 * 3 * C
    w1 = jax.random.normal(kw1, (3, 3, C, C), jnp.float32) * np.sqrt(2.0 / n_fan)
    w2 = jax.random.normal(kw2, (3, 3, C, C), jnp.float32) * np.sqrt(2.0 / n_fan)

    g1 = 1.0 + 0.1 * jax.random.normal(kg1, (C,), jnp.float32)
    b1 = 0.1 * jax.random.normal(kb1, (C,), jnp.float32)
    g2 = 1.0 + 0.1 * jax.random.normal(kg2, (C,), jnp.float32)
    b2 = 0.1 * jax.random.normal(kb2, (C,), jnp.float32)

    ref = reference_forward(x, w1, w2, g1, b1, g2, b2)

    # f32 MXU path, accumulate-dots conv (default): tight tolerance.
    out_f32 = jax.block_until_ready(
        basic_block_forward(x, w1, w2, g1, b1, g2, b2,
                            use_bf16=False, use_im2col=False))
    np.testing.assert_allclose(np.asarray(out_f32), np.asarray(ref),
                               rtol=1e-4, atol=1e-4)

    # bf16 MXU operands + bf16 inter-pass slabs, im2col conv path: looser tol.
    out_bf16 = jax.block_until_ready(
        basic_block_forward(x, w1, w2, g1, b1, g2, b2,
                            use_bf16=True, use_im2col=True))
    np.testing.assert_allclose(np.asarray(out_bf16), np.asarray(ref),
                               rtol=5e-2, atol=5e-2)

    print("KERNEL_OK")
</pallas_src>

<mosaic_0001>
module attributes {stable_mosaic.version = 11 : i64} {
  func.func @kernel(%arg0: i32, %arg1: memref<1x16x16x4xf32, #tpu.memory_space<vmem>>, %arg2: memref<36x4xf32, #tpu.memory_space<vmem>>, %arg3: memref<1x256x4xf32, #tpu.memory_space<vmem>>, %arg4: memref<1x2x4xf32, #tpu.memory_space<vmem>>, %arg5: memref<18x25x4xf32, #tpu.memory_space<vmem>>) attributes {dimension_semantics = [#tpu.dimension_semantics<arbitrary>], iteration_bounds = array<i64: 2>, scalar_prefetch = 0 : i64, scratch_operands = 1 : i64, tpu.core_type = #tpu.core_type<tc>, window_params = [{transform_indices = @transform_0, window_bounds = array<i64: 1, 16, 16, 4>}, {pipeline_mode = #tpu.pipeline_mode<synchronous>, transform_indices = @transform_1, window_bounds = array<i64: 36, 4>}, {transform_indices = @transform_2, window_bounds = array<i64: 1, 256, 4>}, {transform_indices = @transform_3, window_bounds = array<i64: 1, 2, 4>}]} {
    %c0_i32 = arith.constant 0 : i32
    %0 = arith.cmpi eq, %arg0, %c0_i32 : i32
    %1 = arith.extui %0 : i1 to i32
    %c0_i32_0 = arith.constant 0 : i32
    %2 = arith.cmpi ne, %1, %c0_i32_0 : i32
    scf.if %2 {
      %cst_27 = arith.constant 0.000000e+00 : f32
      %64 = vector.broadcast %cst_27 : f32 to vector<18x25x4xf32>
      %c0_28 = arith.constant 0 : index
      %c0_29 = arith.constant 0 : index
      %c0_30 = arith.constant 0 : index
      %65 = vector.load %arg5[%c0_28, %c0_29, %c0_30] : memref<18x25x4xf32, #tpu.memory_space<vmem>>, vector<18x25x4xf32>
      tpu.vector_store %arg5[%c0_28, %c0_29, %c0_30], %64 {strides = array<i32>} : memref<18x25x4xf32, #tpu.memory_space<vmem>>, vector<18x25x4xf32>,
    } else {
    }
    %c0 = arith.constant 0 : index
    %c0_1 = arith.constant 0 : index
    %c0_2 = arith.constant 0 : index
    %c0_3 = arith.constant 0 : index
    %3 = vector.load %arg1[%c0, %c0_1, %c0_2, %c0_3] : memref<1x16x16x4xf32, #tpu.memory_space<vmem>>, vector<1x16x16x4xf32>
    %4 = vector.shape_cast %3 : vector<1x16x16x4xf32> to vector<16x16x4xf32>
    %c1 = arith.constant 1 : index
    %c8 = arith.constant 8 : index
    %c0_4 = arith.constant 0 : index
    %5 = vector.load %arg5[%c1, %c8, %c0_4] : memref<18x25x4xf32, #tpu.memory_space<vmem>>, vector<16x16x4xf32>
    tpu.vector_store %arg5[%c1, %c8, %c0_4], %4 {strides = array<i32>} : memref<18x25x4xf32, #tpu.memory_space<vmem>>, vector<16x16x4xf32>,
    %c0_5 = arith.constant 0 : index
    %c0_6 = arith.constant 0 : index
    %c0_7 = arith.constant 0 : index
    %6 = vector.load %arg5[%c0_5, %c0_6, %c0_7] : memref<18x25x4xf32, #tpu.memory_space<vmem>>, vector<18x25x4xf32>
    %c0_8 = arith.constant 0 : index
    %c0_9 = arith.constant 0 : index
    %7 = vector.load %arg2[%c0_8, %c0_9] : memref<36x4xf32, #tpu.memory_space<vmem>>, vector<36x4xf32>
    %cst = arith.constant 0.000000e+00 : f32
    %8 = vector.broadcast %cst : f32 to vector<256x4xf32>
    %9 = vector.extract_strided_slice %6 {offsets = [0, 7, 0], sizes = [16, 16, 4], strides = [1, 1, 1]} : vector<18x25x4xf32> to vector<16x16x4xf32>
    %10 = vector.shape_cast %9 : vector<16x16x4xf32> to vector<256x4xf32>
    %11 = vector.extract_strided_slice %7 {offsets = [0, 0], sizes = [4, 4], strides = [1, 1]} : vector<36x4xf32> to vector<4x4xf32>
    %cst_10 = arith.constant dense<0.000000e+00> : vector<256x4xf32>
    %12 = tpu.matmul %10, %11, %cst_10 {dimension_numbers = #tpu.dot_dimension_numbers<[1], [0], [0], [1], [0, 0, 1, 1], [], []>} : vector<256x4xf32>, vector<4x4xf32>, vector<256x4xf32> -> vector<256x4xf32>
    %13 = arith.addf %8, %12 : vector<256x4xf32>
    %14 = vector.extract_strided_slice %6 {offsets = [0, 8, 0], sizes = [16, 16, 4], strides = [1, 1, 1]} : vector<18x25x4xf32> to vector<16x16x4xf32>
    %15 = vector.shape_cast %14 : vector<16x16x4xf32> to vector<256x4xf32>
    %16 = vector.extract_strided_slice %7 {offsets = [4, 0], sizes = [4, 4], strides = [1, 1]} : vector<36x4xf32> to vector<4x4xf32>
    %cst_11 = arith.constant dense<0.000000e+00> : vector<256x4xf32>
    %17 = tpu.matmul %15, %16, %cst_11 {dimension_numbers = #tpu.dot_dimension_numbers<[1], [0], [0], [1], [0, 0, 1, 1], [], []>} : vector<256x4xf32>, vector<4x4xf32>, vector<256x4xf32> -> vector<256x4xf32>
    %18 = arith.addf %13, %17 : vector<256x4xf32>
    %19 = vector.extract_strided_slice %6 {offsets = [0, 9, 0], sizes = [16, 16, 4], strides = [1, 1, 1]} : vector<18x25x4xf32> to vector<16x16x4xf32>
    %20 = vector.shape_cast %19 : vector<16x16x4xf32> to vector<256x4xf32>
    %21 = vector.extract_strided_slice %7 {offsets = [8, 0], sizes = [4, 4], strides = [1, 1]} : vector<36x4xf32> to vector<4x4xf32>
    %cst_12 = arith.constant dense<0.000000e+00> : vector<256x4xf32>
    %22 = tpu.matmul %20, %21, %cst_12 {dimension_numbers = #tpu.dot_dimension_numbers<[1], [0], [0], [1], [0, 0, 1, 1], [], []>} : vector<256x4xf32>, vector<4x4xf32>, vector<256x4xf32> -> vector<256x4xf32>
    %23 = arith.addf %18, %22 : vector<256x4xf32>
    %24 = vector.extract_strided_slice %6 {offsets = [1, 7, 0], sizes = [16, 16, 4], strides = [1, 1, 1]} : vector<18x25x4xf32> to vector<16x16x4xf32>
    %25 = vector.shape_cast %24 : vector<16x16x4xf32> to vector<256x4xf32>
    %26 = vector.extract_strided_slice %7 {offsets = [12, 0], sizes = [4, 4], strides = [1, 1]} : vector<36x4xf32> to vector<4x4xf32>
    %cst_13 = arith.constant dense<0.000000e+00> : vector<256x4xf32>
    %27 = tpu.matmul %25, %26, %cst_13 {dimension_numbers = #tpu.dot_dimension_numbers<[1], [0], [0], [1], [0, 0, 1, 1], [], []>} : vector<256x4xf32>, vector<4x4xf32>, vector<256x4xf32> -> vector<256x4xf32>
    %28 = arith.addf %23, %27 : vector<256x4xf32>
    %29 = vector.extract_strided_slice %6 {offsets = [1, 8, 0], sizes = [16, 16, 4], strides = [1, 1, 1]} : vector<18x25x4xf32> to vector<16x16x4xf32>
    %30 = vector.shape_cast %29 : vector<16x16x4xf32> to vector<256x4xf32>
    %31 = vector.extract_strided_slice %7 {offsets = [16, 0], sizes = [4, 4], strides = [1, 1]} : vector<36x4xf32> to vector<4x4xf32>
    %cst_14 = arith.constant dense<0.000000e+00> : vector<256x4xf32>
    %32 = tpu.matmul %30, %31, %cst_14 {dimension_numbers = #tpu.dot_dimension_numbers<[1], [0], [0], [1], [0, 0, 1, 1], [], []>} : vector<256x4xf32>, vector<4x4xf32>, vector<256x4xf32> -> vector<256x4xf32>
    %33 = arith.addf %28, %32 : vector<256x4xf32>
    %34 = vector.extract_strided_slice %6 {offsets = [1, 9, 0], sizes = [16, 16, 4], strides = [1, 1, 1]} : vector<18x25x4xf32> to vector<16x16x4xf32>
    %35 = vector.shape_cast %34 : vector<16x16x4xf32> to vector<256x4xf32>
    %36 = vector.extract_strided_slice %7 {offsets = [20, 0], sizes = [4, 4], strides = [1, 1]} : vector<36x4xf32> to vector<4x4xf32>
    %cst_15 = arith.constant dense<0.000000e+00> : vector<256x4xf32>
    %37 = tpu.matmul %35, %36, %cst_15 {dimension_numbers = #tpu.dot_dimension_numbers<[1], [0], [0], [1], [0, 0, 1, 1], [], []>} : vector<256x4xf32>, vector<4x4xf32>, vector<256x4xf32> -> vector<256x4xf32>
    %38 = arith.addf %33, %37 : vector<256x4xf32>
    %39 = vector.extract_strided_slice %6 {offsets = [2, 7, 0], sizes = [16, 16, 4], strides = [1, 1, 1]} : vector<18x25x4xf32> to vector<16x16x4xf32>
    %40 = vector.shape_cast %39 : vector<16x16x4xf32> to vector<256x4xf32>
    %41 = vector.extract_strided_slice %7 {offsets = [24, 0], sizes = [4, 4], strides = [1, 1]} : vector<36x4xf32> to vector<4x4xf32>
    %cst_16 = arith.constant dense<0.000000e+00> : vector<256x4xf32>
    %42 = tpu.matmul %40, %41, %cst_16 {dimension_numbers = #tpu.dot_dimension_numbers<[1], [0], [0], [1], [0, 0, 1, 1], [], []>} : vector<256x4xf32>, vector<4x4xf32>, vector<256x4xf32> -> vector<256x4xf32>
    %43 = arith.addf %38, %42 : vector<256x4xf32>
    %44 = vector.extract_strided_slice %6 {offsets = [2, 8, 0], sizes = [16, 16, 4], strides = [1, 1, 1]} : vector<18x25x4xf32> to vector<16x16x4xf32>
    %45 = vector.shape_cast %44 : vector<16x16x4xf32> to vector<256x4xf32>
    %46 = vector.extract_strided_slice %7 {offsets = [28, 0], sizes = [4, 4], strides = [1, 1]} : vector<36x4xf32> to vector<4x4xf32>
    %cst_17 = arith.constant dense<0.000000e+00> : vector<256x4xf32>
    %47 = tpu.matmul %45, %46, %cst_17 {dimension_numbers = #tpu.dot_dimension_numbers<[1], [0], [0], [1], [0, 0, 1, 1], [], []>} : vector<256x4xf32>, vector<4x4xf32>, vector<256x4xf32> -> vector<256x4xf32>
    %48 = arith.addf %43, %47 : vector<256x4xf32>
    %49 = vector.extract_strided_slice %6 {offsets = [2, 9, 0], sizes = [16, 16, 4], strides = [1, 1, 1]} : vector<18x25x4xf32> to vector<16x16x4xf32>
    %50 = vector.shape_cast %49 : vector<16x16x4xf32> to vector<256x4xf32>
    %51 = vector.extract_strided_slice %7 {offsets = [32, 0], sizes = [4, 4], strides = [1, 1]} : vector<36x4xf32> to vector<4x4xf32>
    %cst_18 = arith.constant dense<0.000000e+00> : vector<256x4xf32>
    %52 = tpu.matmul %50, %51, %cst_18 {dimension_numbers = #tpu.dot_dimension_numbers<[1], [0], [0], [1], [0, 0, 1, 1], [], []>} : vector<256x4xf32>, vector<4x4xf32>, vector<256x4xf32> -> vector<256x4xf32>
    %53 = arith.addf %48, %52 : vector<256x4xf32>
    %cst_19 = arith.constant dense<0.000000e+00> : vector<4xf32>
    %54 = vector.multi_reduction <add>, %53, %cst_19 [0] : vector<256x4xf32> to vector<4xf32>
    %55 = vector.shape_cast %54 : vector<4xf32> to vector<1x4xf32>
    %56 = arith.mulf %53, %53 : vector<256x4xf32>
    %cst_20 = arith.constant dense<0.000000e+00> : vector<4xf32>
    %57 = vector.multi_reduction <add>, %56, %cst_20 [0] : vector<256x4xf32> to vector<4xf32>
    %58 = vector.shape_cast %57 : vector<4xf32> to vector<1x4xf32>
    %59 = tpu.concatenate %55, %58 in 0 : vector<1x4xf32>, vector<1x4xf32> -> vector<2x4xf32>
    %60 = vector.shape_cast %59 : vector<2x4xf32> to vector<1x2x4xf32>
    %c0_21 = arith.constant 0 : index
    %c0_22 = arith.constant 0 : index
    %c0_23 = arith.constant 0 : index
    %61 = vector.load %arg4[%c0_21, %c0_22, %c0_23] : memref<1x2x4xf32, #tpu.memory_space<vmem>>, vector<1x2x4xf32>
    tpu.vector_store %arg4[%c0_21, %c0_22, %c0_23], %60 {strides = array<i32>} : memref<1x2x4xf32, #tpu.memory_space<vmem>>, vector<1x2x4xf32>,
    %62 = vector.shape_cast %53 : vector<256x4xf32> to vector<1x256x4xf32>
    %c0_24 = arith.constant 0 : index
    %c0_25 = arith.constant 0 : index
    %c0_26 = arith.constant 0 : index
    %63 = vector.load %arg3[%c0_24, %c0_25, %c0_26] : memref<1x256x4xf32, #tpu.memory_space<vmem>>, vector<1x256x4xf32>
    tpu.vector_store %arg3[%c0_24, %c0_25, %c0_26], %62 {strides = array<i32>} : memref<1x256x4xf32, #tpu.memory_space<vmem>>, vector<1x256x4xf32>,
    return
  }
  func.func @transform_0(%arg0: i32) -> (i32, i32, i32, i32) {
    %c0_i32 = arith.constant 0 : i32
    %c0_i32_0 = arith.constant 0 : i32
    %c0_i32_1 = arith.constant 0 : i32
    %c0_i32_2 = arith.constant 0 : i32
    return %arg0, %c0_i32, %c0_i32_0, %c0_i32_1 : i32, i32, i32, i32
  }
  func.func @transform_1(%arg0: i32) -> (i32, i32) {
    %c0_i32 = arith.constant 0 : i32
    %c0_i32_0 = arith.constant 0 : i32
    %c0_i32_1 = arith.constant 0 : i32
    return %c0_i32, %c0_i32_0 : i32, i32
  }
  func.func @transform_2(%arg0: i32) -> (i32, i32, i32) {
    %c0_i32 = arith.constant 0 : i32
    %c0_i32_0 = arith.constant 0 : i32
    %c0_i32_1 = arith.constant 0 : i32
    return %arg0, %c0_i32, %c0_i32_0 : i32, i32, i32
  }
  func.func @transform_3(%arg0: i32) -> (i32, i32, i32) {
    %c0_i32 = arith.constant 0 : i32
    %c0_i32_0 = arith.constant 0 : i32
    %c0_i32_1 = arith.constant 0 : i32
    return %arg0, %c0_i32, %c0_i32_0 : i32, i32, i32
  }
}

module attributes {stable_mosaic.version = 11 : i64} {
  func.func @kernel(%arg0: i32, %arg1: memref<1x256x4xf32, #tpu.memory_space<vmem>>, %arg2: memref<1x4xf32, #tpu.memory_space<vmem>>, %arg3: memref<1x4xf32, #tpu.memory_space<vmem>>, %arg4: memref<36x4xf32, #tpu.memory_space<vmem>>, %arg5: memref<1x256x4xf32, #tpu.memory_space<vmem>>, %arg6: memref<1x2x4xf32, #tpu.memory_space<vmem>>, %arg7: memref<18x25x4xf32, #tpu.memory_space<vmem>>) attributes {dimension_semantics = [#tpu.dimension_semantics<arbitrary>], iteration_bounds = array<i64: 2>, scalar_prefetch = 0 : i64, scratch_operands = 1 : i64, tpu.core_type = #tpu.core_type<tc>, window_params = [{transform_indices = @transform_0, window_bounds = array<i64: 1, 256, 4>}, {pipeline_mode = #tpu.pipeline_mode<synchronous>, transform_indices = @transform_1, window_bounds = array<i64: 1, 4>}, {pipeline_mode = #tpu.pipeline_mode<synchronous>, transform_indices = @transform_2, window_bounds = array<i64: 1, 4>}, {pipeline_mode = #tpu.pipeline_mode<synchronous>, transform_indices = @transform_3, window_bounds = array<i64: 36, 4>}, {transform_indices = @transform_4, window_bounds = array<i64: 1, 256, 4>}, {transform_indices = @transform_5, window_bounds = array<i64: 1, 2, 4>}]} {
    %c0_i32 = arith.constant 0 : i32
    %0 = arith.cmpi eq, %arg0, %c0_i32 : i32
    %1 = arith.extui %0 : i1 to i32
    %c0_i32_0 = arith.constant 0 : i32
    %2 = arith.cmpi ne, %1, %c0_i32_0 : i32
    scf.if %2 {
      %cst_31 = arith.constant 0.000000e+00 : f32
      %73 = vector.broadcast %cst_31 : f32 to vector<18x25x4xf32>
      %c0_32 = arith.constant 0 : index
      %c0_33 = arith.constant 0 : index
      %c0_34 = arith.constant 0 : index
      %74 = vector.load %arg7[%c0_32, %c0_33, %c0_34] : memref<18x25x4xf32, #tpu.memory_space<vmem>>, vector<18x25x4xf32>
      tpu.vector_store %arg7[%c0_32, %c0_33, %c0_34], %73 {strides = array<i32>} : memref<18x25x4xf32, #tpu.memory_space<vmem>>, vector<18x25x4xf32>,
    } else {
    }
    %c0 = arith.constant 0 : index
    %c0_1 = arith.constant 0 : index
    %c0_2 = arith.constant 0 : index
    %3 = vector.load %arg1[%c0, %c0_1, %c0_2] : memref<1x256x4xf32, #tpu.memory_space<vmem>>, vector<1x256x4xf32>
    %4 = vector.shape_cast %3 : vector<1x256x4xf32> to vector<256x4xf32>
    %c0_3 = arith.constant 0 : index
    %c0_4 = arith.constant 0 : index
    %5 = vector.load %arg2[%c0_3, %c0_4] : memref<1x4xf32, #tpu.memory_space<vmem>>, vector<1x4xf32>
    %6 = vector.broadcast %5 : vector<1x4xf32> to vector<256x4xf32>
    %7 = arith.mulf %4, %6 : vector<256x4xf32>
    %c0_5 = arith.constant 0 : index
    %c0_6 = arith.constant 0 : index
    %8 = vector.load %arg3[%c0_5, %c0_6] : memref<1x4xf32, #tpu.memory_space<vmem>>, vector<1x4xf32>
    %9 = vector.broadcast %8 : vector<1x4xf32> to vector<256x4xf32>
    %10 = arith.addf %7, %9 : vector<256x4xf32>
    %cst = arith.constant 0.000000e+00 : f32
    %11 = vector.broadcast %cst : f32 to vector<256x4xf32>
    %12 = arith.maximumf %10, %11 : vector<256x4xf32>
    %13 = vector.shape_cast %12 : vector<256x4xf32> to vector<16x16x4xf32>
    %c1 = arith.constant 1 : index
    %c8 = arith.constant 8 : index
    %c0_7 = arith.constant 0 : index
    %14 = vector.load %arg7[%c1, %c8, %c0_7] : memref<18x25x4xf32, #tpu.memory_space<vmem>>, vector<16x16x4xf32>
    tpu.vector_store %arg7[%c1, %c8, %c0_7], %13 {strides = array<i32>} : memref<18x25x4xf32, #tpu.memory_space<vmem>>, vector<16x16x4xf32>,
    %c0_8 = arith.constant 0 : index
    %c0_9 = arith.constant 0 : index
    %c0_10 = arith.constant 0 : index
    %15 = vector.load %arg7[%c0_8, %c0_9, %c0_10] : memref<18x25x4xf32, #tpu.memory_space<vmem>>, vector<18x25x4xf32>
    %c0_11 = arith.constant 0 : index
    %c0_12 = arith.constant 0 : index
    %16 = vector.load %arg4[%c0_11, %c0_12] : memref<36x4xf32, #tpu.memory_space<vmem>>, vector<36x4xf32>
    %cst_13 = arith.constant 0.000000e+00 : f32
    %17 = vector.broadcast %cst_13 : f32 to vector<256x4xf32>
    %18 = vector.extract_strided_slice %15 {offsets = [0, 7, 0], sizes = [16, 16, 4], strides = [1, 1, 1]} : vector<18x25x4xf32> to vector<16x16x4xf32>
    %19 = vector.shape_cast %18 : vector<16x16x4xf32> to vector<256x4xf32>
    %20 = vector.extract_strided_slice %16 {offsets = [0, 0], sizes = [4, 4], strides = [1, 1]} : vector<36x4xf32> to vector<4x4xf32>
    %cst_14 = arith.constant dense<0.000000e+00> : vector<256x4xf32>
    %21 = tpu.matmul %19, %20, %cst_14 {dimension_numbers = #tpu.dot_dimension_numbers<[1], [0], [0], [1], [0, 0, 1, 1], [], []>} : vector<256x4xf32>, vector<4x4xf32>, vector<256x4xf32> -> vector<256x4xf32>
    %22 = arith.addf %17, %21 : vector<256x4xf32>
    %23 = vector.extract_strided_slice %15 {offsets = [0, 8, 0], sizes = [16, 16, 4], strides = [1, 1, 1]} : vector<18x25x4xf32> to vector<16x16x4xf32>
    %24 = vector.shape_cast %23 : vector<16x16x4xf32> to vector<256x4xf32>
    %25 = vector.extract_strided_slice %16 {offsets = [4, 0], sizes = [4, 4], strides = [1, 1]} : vector<36x4xf32> to vector<4x4xf32>
    %cst_15 = arith.constant dense<0.000000e+00> : vector<256x4xf32>
    %26 = tpu.matmul %24, %25, %cst_15 {dimension_numbers = #tpu.dot_dimension_numbers<[1], [0], [0], [1], [0, 0, 1, 1], [], []>} : vector<256x4xf32>, vector<4x4xf32>, vector<256x4xf32> -> vector<256x4xf32>
    %27 = arith.addf %22, %26 : vector<256x4xf32>
    %28 = vector.extract_strided_slice %15 {offsets = [0, 9, 0], sizes = [16, 16, 4], strides = [1, 1, 1]} : vector<18x25x4xf32> to vector<16x16x4xf32>
    %29 = vector.shape_cast %28 : vector<16x16x4xf32> to vector<256x4xf32>
    %30 = vector.extract_strided_slice %16 {offsets = [8, 0], sizes = [4, 4], strides = [1, 1]} : vector<36x4xf32> to vector<4x4xf32>
    %cst_16 = arith.constant dense<0.000000e+00> : vector<256x4xf32>
    %31 = tpu.matmul %29, %30, %cst_16 {dimension_numbers = #tpu.dot_dimension_numbers<[1], [0], [0], [1], [0, 0, 1, 1], [], []>} : vector<256x4xf32>, vector<4x4xf32>, vector<256x4xf32> -> vector<256x4xf32>
    %32 = arith.addf %27, %31 : vector<256x4xf32>
    %33 = vector.extract_strided_slice %15 {offsets = [1, 7, 0], sizes = [16, 16, 4], strides = [1, 1, 1]} : vector<18x25x4xf32> to vector<16x16x4xf32>
    %34 = vector.shape_cast %33 : vector<16x16x4xf32> to vector<256x4xf32>
    %35 = vector.extract_strided_slice %16 {offsets = [12, 0], sizes = [4, 4], strides = [1, 1]} : vector<36x4xf32> to vector<4x4xf32>
    %cst_17 = arith.constant dense<0.000000e+00> : vector<256x4xf32>
    %36 = tpu.matmul %34, %35, %cst_17 {dimension_numbers = #tpu.dot_dimension_numbers<[1], [0], [0], [1], [0, 0, 1, 1], [], []>} : vector<256x4xf32>, vector<4x4xf32>, vector<256x4xf32> -> vector<256x4xf32>
    %37 = arith.addf %32, %36 : vector<256x4xf32>
    %38 = vector.extract_strided_slice %15 {offsets = [1, 8, 0], sizes = [16, 16, 4], strides = [1, 1, 1]} : vector<18x25x4xf32> to vector<16x16x4xf32>
    %39 = vector.shape_cast %38 : vector<16x16x4xf32> to vector<256x4xf32>
    %40 = vector.extract_strided_slice %16 {offsets = [16, 0], sizes = [4, 4], strides = [1, 1]} : vector<36x4xf32> to vector<4x4xf32>
    %cst_18 = arith.constant dense<0.000000e+00> : vector<256x4xf32>
    %41 = tpu.matmul %39, %40, %cst_18 {dimension_numbers = #tpu.dot_dimension_numbers<[1], [0], [0], [1], [0, 0, 1, 1], [], []>} : vector<256x4xf32>, vector<4x4xf32>, vector<256x4xf32> -> vector<256x4xf32>
    %42 = arith.addf %37, %41 : vector<256x4xf32>
    %43 = vector.extract_strided_slice %15 {offsets = [1, 9, 0], sizes = [16, 16, 4], strides = [1, 1, 1]} : vector<18x25x4xf32> to vector<16x16x4xf32>
    %44 = vector.shape_cast %43 : vector<16x16x4xf32> to vector<256x4xf32>
    %45 = vector.extract_strided_slice %16 {offsets = [20, 0], sizes = [4, 4], strides = [1, 1]} : vector<36x4xf32> to vector<4x4xf32>
    %cst_19 = arith.constant dense<0.000000e+00> : vector<256x4xf32>
    %46 = tpu.matmul %44, %45, %cst_19 {dimension_numbers = #tpu.dot_dimension_numbers<[1], [0], [0], [1], [0, 0, 1, 1], [], []>} : vector<256x4xf32>, vector<4x4xf32>, vector<256x4xf32> -> vector<256x4xf32>
    %47 = arith.addf %42, %46 : vector<256x4xf32>
    %48 = vector.extract_strided_slice %15 {offsets = [2, 7, 0], sizes = [16, 16, 4], strides = [1, 1, 1]} : vector<18x25x4xf32> to vector<16x16x4xf32>
    %49 = vector.shape_cast %48 : vector<16x16x4xf32> to vector<256x4xf32>
    %50 = vector.extract_strided_slice %16 {offsets = [24, 0], sizes = [4, 4], strides = [1, 1]} : vector<36x4xf32> to vector<4x4xf32>
    %cst_20 = arith.constant dense<0.000000e+00> : vector<256x4xf32>
    %51 = tpu.matmul %49, %50, %cst_20 {dimension_numbers = #tpu.dot_dimension_numbers<[1], [0], [0], [1], [0, 0, 1, 1], [], []>} : vector<256x4xf32>, vector<4x4xf32>, vector<256x4xf32> -> vector<256x4xf32>
    %52 = arith.addf %47, %51 : vector<256x4xf32>
    %53 = vector.extract_strided_slice %15 {offsets = [2, 8, 0], sizes = [16, 16, 4], strides = [1, 1, 1]} : vector<18x25x4xf32> to vector<16x16x4xf32>
    %54 = vector.shape_cast %53 : vector<16x16x4xf32> to vector<256x4xf32>
    %55 = vector.extract_strided_slice %16 {offsets = [28, 0], sizes = [4, 4], strides = [1, 1]} : vector<36x4xf32> to vector<4x4xf32>
    %cst_21 = arith.constant dense<0.000000e+00> : vector<256x4xf32>
    %56 = tpu.matmul %54, %55, %cst_21 {dimension_numbers = #tpu.dot_dimension_numbers<[1], [0], [0], [1], [0, 0, 1, 1], [], []>} : vector<256x4xf32>, vector<4x4xf32>, vector<256x4xf32> -> vector<256x4xf32>
    %57 = arith.addf %52, %56 : vector<256x4xf32>
    %58 = vector.extract_strided_slice %15 {offsets = [2, 9, 0], sizes = [16, 16, 4], strides = [1, 1, 1]} : vector<18x25x4xf32> to vector<16x16x4xf32>
    %59 = vector.shape_cast %58 : vector<16x16x4xf32> to vector<256x4xf32>
    %60 = vector.extract_strided_slice %16 {offsets = [32, 0], sizes = [4, 4], strides = [1, 1]} : vector<36x4xf32> to vector<4x4xf32>
    %cst_22 = arith.constant dense<0.000000e+00> : vector<256x4xf32>
    %61 = tpu.matmul %59, %60, %cst_22 {dimension_numbers = #tpu.dot_dimension_numbers<[1], [0], [0], [1], [0, 0, 1, 1], [], []>} : vector<256x4xf32>, vector<4x4xf32>, vector<256x4xf32> -> vector<256x4xf32>
    %62 = arith.addf %57, %61 : vector<256x4xf32>
    %cst_23 = arith.constant dense<0.000000e+00> : vector<4xf32>
    %63 = vector.multi_reduction <add>, %62, %cst_23 [0] : vector<256x4xf32> to vector<4xf32>
    %64 = vector.shape_cast %63 : vector<4xf32> to vector<1x4xf32>
    %65 = arith.mulf %62, %62 : vector<256x4xf32>
    %cst_24 = arith.constant dense<0.000000e+00> : vector<4xf32>
    %66 = vector.multi_reduction <add>, %65, %cst_24 [0] : vector<256x4xf32> to vector<4xf32>
    %67 = vector.shape_cast %66 : vector<4xf32> to vector<1x4xf32>
    %68 = tpu.concatenate %64, %67 in 0 : vector<1x4xf32>, vector<1x4xf32> -> vector<2x4xf32>
    %69 = vector.shape_cast %68 : vector<2x4xf32> to vector<1x2x4xf32>
    %c0_25 = arith.constant 0 : index
    %c0_26 = arith.constant 0 : index
    %c0_27 = arith.constant 0 : index
    %70 = vector.load %arg6[%c0_25, %c0_26, %c0_27] : memref<1x2x4xf32, #tpu.memory_space<vmem>>, vector<1x2x4xf32>
    tpu.vector_store %arg6[%c0_25, %c0_26, %c0_27], %69 {strides = array<i32>} : memref<1x2x4xf32, #tpu.memory_space<vmem>>, vector<1x2x4xf32>,
    %71 = vector.shape_cast %62 : vector<256x4xf32> to vector<1x256x4xf32>
    %c0_28 = arith.constant 0 : index
    %c0_29 = arith.constant 0 : index
    %c0_30 = arith.constant 0 : index
    %72 = vector.load %arg5[%c0_28, %c0_29, %c0_30] : memref<1x256x4xf32, #tpu.memory_space<vmem>>, vector<1x256x4xf32>
    tpu.vector_store %arg5[%c0_28, %c0_29, %c0_30], %71 {strides = array<i32>} : memref<1x256x4xf32, #tpu.memory_space<vmem>>, vector<1x256x4xf32>,
    return
  }
  func.func @transform_0(%arg0: i32) -> (i32, i32, i32) {
    %c0_i32 = arith.constant 0 : i32
    %c0_i32_0 = arith.constant 0 : i32
    %c0_i32_1 = arith.constant 0 : i32
    return %arg0, %c0_i32, %c0_i32_0 : i32, i32, i32
  }
  func.func @transform_1(%arg0: i32) -> (i32, i32) {
    %c0_i32 = arith.constant 0 : i32
    %c0_i32_0 = arith.constant 0 : i32
    %c0_i32_1 = arith.constant 0 : i32
    return %c0_i32, %c0_i32_0 : i32, i32
  }
  func.func @transform_2(%arg0: i32) -> (i32, i32) {
    %c0_i32 = arith.constant 0 : i32
    %c0_i32_0 = arith.constant 0 : i32
    %c0_i32_1 = arith.constant 0 : i32
    return %c0_i32, %c0_i32_0 : i32, i32
  }
  func.func @transform_3(%arg0: i32) -> (i32, i32) {
    %c0_i32 = arith.constant 0 : i32
    %c0_i32_0 = arith.constant 0 : i32
    %c0_i32_1 = arith.constant 0 : i32
    return %c0_i32, %c0_i32_0 : i32, i32
  }
  func.func @transform_4(%arg0: i32) -> (i32, i32, i32) {
    %c0_i32 = arith.constant 0 : i32
    %c0_i32_0 = arith.constant 0 : i32
    %c0_i32_1 = arith.constant 0 : i32
    return %arg0, %c0_i32, %c0_i32_0 : i32, i32, i32
  }
  func.func @transform_5(%arg0: i32) -> (i32, i32, i32) {
    %c0_i32 = arith.constant 0 : i32
    %c0_i32_0 = arith.constant 0 : i32
    %c0_i32_1 = arith.constant 0 : i32
    return %arg0, %c0_i32, %c0_i32_0 : i32, i32, i32
  }
}

</mosaic_0001>

<bundles_post_ra>
// kernel: basic_block_forward.2
= control target key start
LH: loop header
LB: loop body
LE: loop exit
PB: predicated region body
PF: predicated region fallthrough
CT: control target
= control target key end

     0   :  { %s4797_s12 = smov 0   ;;  %s6170_s0 = inlined_call_operand.vmem [shape: f32[2,16,16,4], index: 0, kind: input, shape index: {}]   ;;  %s6171_s1 = inlined_call_operand.vmem [shape: f32[36,4], index: 1, kind: input, shape index: {}]   ;;  %s6172_s2 = inlined_call_operand.vmem [shape: f32[2,256,4], index: 2, kind: output, shape index: {0}]   ;;  %s6173_s3 = inlined_call_operand.vmem [shape: f32[2,2,4], index: 3, kind: output, shape index: {1}]  }
   0x1 LB: > { %s3441_s13 = sadd.s32 4294967295, %s4774_s12   ;;  %p3445_p0 = scmp.ge.s32.totalorder %s4774_s12, 1  ;;  %s4774_s12 = sphi %s4797_s12, %s14_s12  }
   0x2   : > { %p140_p1 = scmp.lt.s32.totalorder %s4774_s12, 3 }
   0x4   : > { %p141_p2 = pnand %p3445_p0, %p140_p1 }
   0x6   : > { %144 = sbr.rel (%p141_p2) target bundleno = 585 (0x249), region = 28 }
   0xd   : > { %p168_p3 = scmp.lt.s32.totalorder %s3441_s13, 1  ;;  %p3451_p4 = scmp.ne.s32.totalorder %s3441_s13, 0 }
   0xe   : > { %vm186_vm0 = vcmask (!%p3451_p4), 31744   ;;  %vm190_vm1 = vcmask (!%p3451_p4), 24576   ;;  %v4776_v0 = vmov (!%p3451_p4), 0.0  }
   0xf   : > { %s169_s14 = scalar_select %p168_p3, %s3441_s13, 1 }
  0x10   : > { %185 = sbr.rel (%p3451_p4) target bundleno = 52 (0x34), region = 32  ;;  %187 = vst.msk [vmem:[#allocation2] sm:$0xff] (!%p3451_p4), %vm186_vm0, %v4776_v0  ;;  %188 = vst.msk [vmem:[#allocation2 + $0x8] sm:$0xff] (!%p3451_p4), %vm186_vm0, %v4776_v0 }
  0x11   : > { %s3751_s15 = sshll.u32 %s169_s14, 8  ;;  %s3450_s16 = sshll.u32 %s169_s14, 1  ;;  %189 = vst.msk [vmem:[#allocation2 + $0x10] sm:$0xff] (!%p3451_p4), %vm186_vm0, %v4776_v0  ;;  %192 = vst.msk [vmem:[#allocation2 + $0x20] sm:$0xff] (!%p3451_p4), %vm186_vm0, %v4776_v0 }
  0x12   : > { %s4808_s19 = scalar_lea.vmem %s6170_s0, %s3751_s15  ;;  %s4813_s22 = scalar_lea.vmem %s6172_s2, %s3751_s15  ;;  %193 = vst.msk [vmem:[#allocation2 + $0x28] sm:$0xff] (!%p3451_p4), %vm186_vm0, %v4776_v0  ;;  %194 = vst.msk [vmem:[#allocation2 + $0x30] sm:$0xff] (!%p3451_p4), %vm186_vm0, %v4776_v0 }
  0x13   : > { %s4818_s25 = scalar_lea.vmem %s6173_s3, %s3450_s16  ;;  %196 = vst.msk [vmem:[#allocation2 + $0x40] sm:$0xff] (!%p3451_p4), %vm186_vm0, %v4776_v0  ;;  %197 = vst.msk [vmem:[#allocation2 + $0x48] sm:$0xff] (!%p3451_p4), %vm186_vm0, %v4776_v0 }
  0x14   : > { %198 = vst.msk [vmem:[#allocation2 + $0x50] sm:$0xff] (!%p3451_p4), %vm186_vm0, %v4776_v0  ;;  %200 = vst.msk [vmem:[#allocation2 + $0x60] sm:$0xff] (!%p3451_p4), %vm186_vm0, %v4776_v0 }
  0x15   : > { %201 = vst.msk [vmem:[#allocation2 + $0x68] sm:$0xff] (!%p3451_p4), %vm186_vm0, %v4776_v0  ;;  %202 = vst.msk [vmem:[#allocation2 + $0x70] sm:$0xff] (!%p3451_p4), %vm186_vm0, %v4776_v0 }
  0x16   : > { %204 = vst.msk [vmem:[#allocation2 + $0x80] sm:$0xff] (!%p3451_p4), %vm186_vm0, %v4776_v0  ;;  %205 = vst.msk [vmem:[#allocation2 + $0x88] sm:$0xff] (!%p3451_p4), %vm186_vm0, %v4776_v0 }
  0x17   : > { %206 = vst.msk [vmem:[#allocation2 + $0x90] sm:$0xff] %vm186_vm0, %v4776_v0  ;;  %208 = vst.msk [vmem:[#allocation2 + $0xa0] sm:$0xff] %vm186_vm0, %v4776_v0 }
  0x18   : > { %209 = vst.msk [vmem:[#allocation2 + $0xa8] sm:$0xff] %vm186_vm0, %v4776_v0  ;;  %210 = vst.msk [vmem:[#allocation2 + $0xb0] sm:$0xff] %vm186_vm0, %v4776_v0 }
  0x19   : > { %212 = vst.msk [vmem:[#allocation2 + $0xc0] sm:$0xff] %vm186_vm0, %v4776_v0  ;;  %213 = vst.msk [vmem:[#allocation2 + $0xc8] sm:$0xff] %vm186_vm0, %v4776_v0 }
  0x1a   : > { %214 = vst.msk [vmem:[#allocation2 + $0xd0] sm:$0xff] %vm186_vm0, %v4776_v0  ;;  %216 = vst.msk [vmem:[#allocation2 + $0xe0] sm:$0xff] %vm186_vm0, %v4776_v0 }
  0x1b   : > { %217 = vst.msk [vmem:[#allocation2 + $0xe8] sm:$0xff] %vm186_vm0, %v4776_v0  ;;  %218 = vst.msk [vmem:[#allocation2 + $0xf0] sm:$0xff] %vm186_vm0, %v4776_v0 }
  0x1c   : > { %220 = vst.msk [vmem:[#allocation2 + $0x100] sm:$0xff] %vm186_vm0, %v4776_v0  ;;  %221 = vst.msk [vmem:[#allocation2 + $0x108] sm:$0xff] %vm186_vm0, %v4776_v0 }
  0x1d   : > { %222 = vst.msk [vmem:[#allocation2 + $0x110] sm:$0xff] %vm186_vm0, %v4776_v0  ;;  %224 = vst.msk [vmem:[#allocation2 + $0x120] sm:$0xff] %vm186_vm0, %v4776_v0 }
  0x1e   : > { %225 = vst.msk [vmem:[#allocation2 + $0x128] sm:$0xff] %vm186_vm0, %v4776_v0  ;;  %226 = vst.msk [vmem:[#allocation2 + $0x130] sm:$0xff] %vm186_vm0, %v4776_v0 }
  0x1f   : > { %228 = vst.msk [vmem:[#allocation2 + $0x140] sm:$0xff] %vm186_vm0, %v4776_v0  ;;  %229 = vst.msk [vmem:[#allocation2 + $0x148] sm:$0xff] %vm186_vm0, %v4776_v0 }
  0x20   : > { %230 = vst.msk [vmem:[#allocation2 + $0x150] sm:$0xff] %vm186_vm0, %v4776_v0  ;;  %232 = vst.msk [vmem:[#allocation2 + $0x160] sm:$0xff] %vm186_vm0, %v4776_v0 }
  0x21   : > { %233 = vst.msk [vmem:[#allocation2 + $0x168] sm:$0xff] %vm186_vm0, %v4776_v0  ;;  %234 = vst.msk [vmem:[#allocation2 + $0x170] sm:$0xff] %vm186_vm0, %v4776_v0 }
  0x22   : > { %236 = vst.msk [vmem:[#allocation2 + $0x180] sm:$0xff] %vm186_vm0, %v4776_v0  ;;  %237 = vst.msk [vmem:[#allocation2 + $0x188] sm:$0xff] %vm186_vm0, %v4776_v0 }
  0x23   : > { %238 = vst.msk [vmem:[#allocation2 + $0x190] sm:$0xff] %vm186_vm0, %v4776_v0  ;;  %240 = vst.msk [vmem:[#allocation2 + $0x1a0] sm:$0xff] %vm186_vm0, %v4776_v0 }
  0x24   : > { %241 = vst.msk [vmem:[#allocation2 + $0x1a8] sm:$0xff] %vm186_vm0, %v4776_v0  ;;  %242 = vst.msk [vmem:[#allocation2 + $0x1b0] sm:$0xff] %vm186_vm0, %v4776_v0 }
  0x25   : > { %244 = vst.msk [vmem:[#allocation2 + $0x1c0] sm:$0xff] %vm186_vm0, %v4776_v0  ;;  %245 = vst.msk [vmem:[#allocation2 + $0x1c8] sm:$0xff] %vm186_vm0, %v4776_v0 }
  0x26   : > { %246 = vst.msk [vmem:[#allocation2 + $0x1d0] sm:$0xff] %vm186_vm0, %v4776_v0  ;;  %248 = vst.msk [vmem:[#allocation2 + $0x1e0] sm:$0xff] %vm186_vm0, %v4776_v0 }
  0x27   : > { %249 = vst.msk [vmem:[#allocation2 + $0x1e8] sm:$0xff] %vm186_vm0, %v4776_v0  ;;  %250 = vst.msk [vmem:[#allocation2 + $0x1f0] sm:$0xff] %vm186_vm0, %v4776_v0 }
  0x28   : > { %252 = vst.msk [vmem:[#allocation2 + $0x200] sm:$0xff] %vm186_vm0, %v4776_v0  ;;  %253 = vst.msk [vmem:[#allocation2 + $0x208] sm:$0xff] %vm186_vm0, %v4776_v0 }
  0x29   : > { %254 = vst.msk [vmem:[#allocation2 + $0x210] sm:$0xff] %vm186_vm0, %v4776_v0  ;;  %256 = vst.msk [vmem:[#allocation2 + $0x220] sm:$0xff] %vm186_vm0, %v4776_v0 }
  0x2a   : > { %257 = vst.msk [vmem:[#allocation2 + $0x228] sm:$0xff] %vm186_vm0, %v4776_v0  ;;  %258 = vst.msk [vmem:[#allocation2 + $0x230] sm:$0xff] %vm186_vm0, %v4776_v0 }
  0x2b   : > { %191 = vst.msk [vmem:[#allocation2 + $0x18] sm:$0x1] %vm190_vm1, %v4776_v0  ;;  %195 = vst.msk [vmem:[#allocation2 + $0x38] sm:$0x1] %vm190_vm1, %v4776_v0 }
  0x2c   : > { %199 = vst.msk [vmem:[#allocation2 + $0x58] sm:$0x1] %vm190_vm1, %v4776_v0  ;;  %203 = vst.msk [vmem:[#allocation2 + $0x78] sm:$0x1] %vm190_vm1, %v4776_v0 }
  0x2d   : > { %207 = vst.msk [vmem:[#allocation2 + $0x98] sm:$0x1] %vm190_vm1, %v4776_v0  ;;  %211 = vst.msk [vmem:[#allocation2 + $0xb8] sm:$0x1] %vm190_vm1, %v4776_v0 }
  0x2e   : > { %215 = vst.msk [vmem:[#allocation2 + $0xd8] sm:$0x1] %vm190_vm1, %v4776_v0  ;;  %219 = vst.msk [vmem:[#allocation2 + $0xf8] sm:$0x1] %vm190_vm1, %v4776_v0 }
  0x2f   : > { %223 = vst.msk [vmem:[#allocation2 + $0x118] sm:$0x1] %vm190_vm1, %v4776_v0  ;;  %227 = vst.msk [vmem:[#allocation2 + $0x138] sm:$0x1] %vm190_vm1, %v4776_v0 }
  0x30   : > { %231 = vst.msk [vmem:[#allocation2 + $0x158] sm:$0x1] %vm190_vm1, %v4776_v0  ;;  %235 = vst.msk [vmem:[#allocation2 + $0x178] sm:$0x1] %vm190_vm1, %v4776_v0 }
  0x31   : > { %239 = vst.msk [vmem:[#allocation2 + $0x198] sm:$0x1] %vm190_vm1, %v4776_v0  ;;  %243 = vst.msk [vmem:[#allocation2 + $0x1b8] sm:$0x1] %vm190_vm1, %v4776_v0 }
  0x32   : > { %247 = vst.msk [vmem:[#allocation2 + $0x1d8] sm:$0x1] %vm190_vm1, %v4776_v0  ;;  %251 = vst.msk [vmem:[#allocation2 + $0x1f8] sm:$0x1] %vm190_vm1, %v4776_v0 }
  0x33   : > { %255 = vst.msk [vmem:[#allocation2 + $0x218] sm:$0x1] %vm190_vm1, %v4776_v0  ;;  %259 = vst.msk [vmem:[#allocation2 + $0x238] sm:$0x1] %vm190_vm1, %v4776_v0 }
  0x34 PF: > { %v398_v1 = vld [vmem:[%s6171_s1] sm:$0xff]  ;;  %vm598_vm2 = vcmask 1043456   ;;  %vm293_vm3 = vcmask 31744   ;;  %v4967_v2 = vld [vmem:[#allocation2 + $0x8] sm:$0xff]  ;;  %v4977_v6 = vld [vmem:[%s6171_s1 + $0x10] sm:$0xff]  ;;  %vm1133_vm4 = vcmask 1046528  }
  0x35   : > { %v533_v3 = vrot.slane %v398_v1, 4  ;;  %4052 = vmatprep.mubr.msk.f32.mxu1 %vm293_vm3, %v4967_v2  ;;  %v1134_v4 = vrot.slane %v4967_v2, 1  ;;  %v4972_v5 = vld [vmem:[#allocation2 + $0x10] sm:$0xff]  ;;  %v260_v7 = vld [vmem:[%s4808_s19] sm:$0xff]  ;;  %4250 = vmatprep.subr.msk.mxu0 %vm598_vm2, %v4977_v6  ;;  %v2080_v9 = vrot.slane %v4977_v6, 4  ;;  %v261_v10 = vld [vmem:[%s4808_s19 + $0x8] sm:$0xff] }
  0x36   : > { %v6174_v8 = vrot.slane %v4972_v5, 1  ;;  %294 = vst.msk [vmem:[#allocation2 + $0x28] sm:$0xff] %vm293_vm3, %v260_v7  ;;  %v262_v11 = vld [vmem:[%s4808_s19 + $0x10] sm:$0xff]  ;;  %v263_v12 = vld [vmem:[%s4808_s19 + $0x18] sm:$0xff]  ;;  %4251 = vmatpush3.msk.msra.mxu0 %vm598_vm2, %v4977_v6  ;;  %295 = vst.msk [vmem:[#allocation2 + $0x30] sm:$0xff] %vm293_vm3, %v261_v10  ;;  %vm451_vm5 = vcmask 1040384  }
  0x37   : > { %4050 = vmatprep.subr.msk.mxu1 %vm598_vm2, %v533_v3  ;;  %296 = vst.msk [vmem:[#allocation2 + $0x48] sm:$0xff] %vm293_vm3, %v262_v11  ;;  %297 = vst.msk [vmem:[#allocation2 + $0x50] sm:$0xff] %vm293_vm3, %v263_v12  ;;  %v264_v13 = vld [vmem:[%s4808_s19 + $0x20] sm:$0xff]  ;;  %v265_v14 = vld [vmem:[%s4808_s19 + $0x28] sm:$0xff]  ;;  %4300 = vmatprep.subr.msk.mxu0 %vm598_vm2, %v2080_v9  ;;  %vm3321_vm6 = vcmask 25600  }
  0x38   : > { %v266_v15 = vld [vmem:[%s4808_s19 + $0x30] sm:$0xff]  ;;  %4051 = vmatpush3.msk.msra.mxu1 %vm598_vm2, %v533_v3  ;;  %298 = vst.msk [vmem:[#allocation2 + $0x68] sm:$0xff] %vm293_vm3, %v264_v13  ;;  %299 = vst.msk [vmem:[#allocation2 + $0x70] sm:$0xff] %vm293_vm3, %v265_v14  ;;  %v267_v16 = vld [vmem:[%s4808_s19 + $0x38] sm:$0xff]  ;;  %v5008_v19 = vsel %vm1133_vm4, %v1134_v4, %v6174_v8 }
  0x39   : > { %300 = vst.msk [vmem:[#allocation2 + $0x88] sm:$0xff] %vm293_vm3, %v266_v15  ;;  %v268_v17 = vld [vmem:[%s4808_s19 + $0x40] sm:$0xff]  ;;  %v269_v18 = vld [vmem:[%s4808_s19 + $0x48] sm:$0xff]  ;;  %4053 = vmatmul.mubr.msk.f32.vlgmr.msra.gmra.mrb[0].mxu1 %vm293_vm3, %v4972_v5  ;;  %4100 = vmatprep.subr.msk.mxu1 %vm598_vm2, %v398_v1  ;;  %301 = vst.msk [vmem:[#allocation2 + $0x90] sm:$0xff] %vm293_vm3, %v267_v16 }
  0x3a   : > { %302 = vst.msk [vmem:[#allocation2 + $0xa8] sm:$0xff] %vm293_vm3, %v268_v17  ;;  %303 = vst.msk [vmem:[#allocation2 + $0xb0] sm:$0xff] %vm293_vm3, %v269_v18  ;;  %v270_v20 = vld [vmem:[%s4808_s19 + $0x50] sm:$0xff]  ;;  %v271_v21 = vld [vmem:[%s4808_s19 + $0x58] sm:$0xff]  ;;  %4101 = vmatpush3.msk.msra.mxu1 %vm598_vm2, %v398_v1 }
  0x3b   : > { %v272_v22 = vld [vmem:[%s4808_s19 + $0x60] sm:$0xff]  ;;  %304 = vst.msk [vmem:[#allocation2 + $0xc8] sm:$0xff] %vm293_vm3, %v270_v20  ;;  %305 = vst.msk [vmem:[#allocation2 + $0xd0] sm:$0xff] %vm293_vm3, %v271_v21  ;;  %v273_v23 = vld [vmem:[%s4808_s19 + $0x68] sm:$0xff] }
  0x3c   : > { %306 = vst.msk [vmem:[#allocation2 + $0xe8] sm:$0xff] %vm293_vm3, %v272_v22  ;;  %v274_v24 = vld [vmem:[%s4808_s19 + $0x70] sm:$0xff]  ;;  %v275_v25 = vld [vmem:[%s4808_s19 + $0x78] sm:$0xff]  ;;  %307 = vst.msk [vmem:[#allocation2 + $0xf0] sm:$0xff] %vm293_vm3, %v273_v23 }
  0x3d   : > { %308 = vst.msk [vmem:[#allocation2 + $0x108] sm:$0xff] %vm293_vm3, %v274_v24  ;;  %309 = vst.msk [vmem:[#allocation2 + $0x110] sm:$0xff] %vm293_vm3, %v275_v25  ;;  %v276_v26 = vld [vmem:[%s4808_s19 + $0x80] sm:$0xff]  ;;  %v277_v27 = vld [vmem:[%s4808_s19 + $0x88] sm:$0xff] }
  0x3e   : > { %310 = vst.msk [vmem:[#allocation2 + $0x128] sm:$0xff] %vm293_vm3, %v276_v26  ;;  %311 = vst.msk [vmem:[#allocation2 + $0x130] sm:$0xff] %vm293_vm3, %v277_v27  ;;  %v278_v28 = vld [vmem:[%s4808_s19 + $0x90] sm:$0xff]  ;;  %v279_v29 = vld [vmem:[%s4808_s19 + $0x98] sm:$0xff] }
  0x3f   : > { %v5035_v30 = vld [vmem:[#allocation2 + $0x28] sm:$0xff]  ;;  %312 = vst.msk [vmem:[#allocation2 + $0x148] sm:$0xff] %vm293_vm3, %v278_v28  ;;  %313 = vst.msk [vmem:[#allocation2 + $0x150] sm:$0xff] %vm293_vm3, %v279_v29  ;;  %v280_v31 = vld [vmem:[%s4808_s19 + $0xa0] sm:$0xff] }
  0x40   : > { %4055 = vmatprep.mubr.msk.f32.mxu1 %vm293_vm3, %v5035_v30  ;;  %4252 = vmatprep.mubr.msk.f32.mxu0 %vm293_vm3, %v5035_v30  ;;  %v5044_v32 = vld [vmem:[#allocation2 + $0x30] sm:$0xff]  ;;  %v5046_v33 = vld [vmem:[#allocation2 + $0x48] sm:$0xff]  ;;  %v5051_v34 = vld [vmem:[%s6171_s1 + $0x18] sm:$0xff]  ;;  %314 = vst.msk [vmem:[#allocation2 + $0x168] sm:$0xff] %vm293_vm3, %v280_v31  ;;  %v1139_v58 = vrot.slane %v5035_v30, 1  ;;  %v458_v8 = vrot.slane %v5035_v30, 7 }
  0x41   : > { %6242 = vst [vmem:[#allocation3_spill] sm:$0xff] %v5046_v33  ;;  %4056 = vmatmul.mubr.msk.f32.gmra.mrb[2].mxu1 %vm293_vm3, %v5044_v32  ;;  %4253 = vmatmul.mubr.msk.f32.vlgmr.msra.gmra.mrb[0].mxu0 %vm293_vm3, %v5044_v32  ;;  %v5061_v35 = vld [vmem:[#allocation2 + $0x50] sm:$0xff]  ;;  %v5065_v36 = vld [vmem:[#allocation2 + $0x68] sm:$0xff]  ;;  %v283_v41 = vld [vmem:[%s4808_s19 + $0xb8] sm:$0xff]  ;;  %v1140_v59 = vrot.slane %v5044_v32, 1  ;;  %v1144_v4 = vrot.slane %v5046_v33, 1 }
  0x42   : > { %4301 = vmatpush3.msk.msra.mxu0 %vm598_vm2, %v2080_v9  ;;  %4058 = vmatprep.mubr.msk.f32.mxu1 %vm293_vm3, %v5046_v33  ;;  %6243 = vst [vmem:[#allocation4_spill] sm:$0xff] %v5061_v35  ;;  %6244 = vst [vmem:[#allocation5_spill] sm:$0xff] %v5065_v36  ;;  %v281_v37 = vld [vmem:[%s4808_s19 + $0xa8] sm:$0xff]  ;;  %v5078_v38 = vld [vmem:[#allocation2 + $0x70] sm:$0xff]  ;;  %v1145_v7 = vrot.slane %v5061_v35, 1  ;;  %v6175_v12 = vrot.slane %v5051_v34, 4 }
  0x43   : > { %4255 = vmatprep.mubr.msk.f32.mxu0 %vm293_vm3, %v5046_v33  ;;  %4350 = vmatprep.subr.msk.mxu0 %vm598_vm2, %v5051_v34  ;;  %6245 = vst [vmem:[#allocation6_spill] sm:$0xff] %v5078_v38  ;;  %315 = vst.msk [vmem:[#allocation2 + $0x170] sm:$0xff] %vm293_vm3, %v281_v37  ;;  %v5081_v39 = vld [vmem:[#allocation2 + $0x88] sm:$0xff]  ;;  %v282_v40 = vld [vmem:[%s4808_s19 + $0xb0] sm:$0xff]  ;;  %v5173_v1 = vsel %vm1133_vm4, %v1139_v58, %v1140_v59  ;;  %v1149_v14 = vrot.slane %v5065_v36, 1  ;;  %v1150_v15 = vrot.slane %v5078_v38, 1 }
  0x44   : > { %6246 = vst [vmem:[#allocation7_spill] sm:$0xff] %v5081_v39  ;;  %316 = vst.msk [vmem:[#allocation2 + $0x188] sm:$0xff] %vm293_vm3, %v282_v40  ;;  %v284_v42 = vld [vmem:[%s4808_s19 + $0xc0] sm:$0xff]  ;;  %v285_v43 = vld [vmem:[%s4808_s19 + $0xc8] sm:$0xff]  ;;  %v5196_v17 = vsel %vm1133_vm4, %v1144_v4, %v1145_v7  ;;  %v1154_v24 = vrot.slane %v5081_v39, 1 }
  0x45   : > { %4059 = vmatmul.mubr.msk.f32.gmra.mrb[4].mxu1 %vm293_vm3, %v5061_v35  ;;  %4256 = vmatmul.mubr.msk.f32.gmra.mrb[2].mxu0 %vm293_vm3, %v5061_v35  ;;  %317 = vst.msk [vmem:[#allocation2 + $0x190] sm:$0xff] %vm293_vm3, %v283_v41  ;;  %318 = vst.msk [vmem:[#allocation2 + $0x1a8] sm:$0xff] %vm293_vm3, %v284_v42  ;;  %v286_v44 = vld [vmem:[%s4808_s19 + $0xd0] sm:$0xff]  ;;  %v287_v45 = vld [vmem:[%s4808_s19 + $0xd8] sm:$0xff]  ;;  %v5216_v23 = vsel %vm1133_vm4, %v1149_v14, %v1150_v15 }
  0x46   : > { %4061 = vmatprep.mubr.msk.f32.mxu1 %vm293_vm3, %v5065_v36  ;;  %4258 = vmatprep.mubr.msk.f32.mxu0 %vm293_vm3, %v5065_v36  ;;  %319 = vst.msk [vmem:[#allocation2 + $0x1b0] sm:$0xff] %vm293_vm3, %v285_v43  ;;  %v5101_v46 = vld [vmem:[#allocation2 + $0x90] sm:$0xff]  ;;  %320 = vst.msk [vmem:[#allocation2 + $0x1c8] sm:$0xff] %vm293_vm3, %v286_v44  ;;  %v288_v47 = vld [vmem:[%s4808_s19 + $0xe0] sm:$0xff] }
  0x47   : > { %6247 = vst [vmem:[#allocation8_spill] sm:$0xff] %v5101_v46  ;;  %321 = vst.msk [vmem:[#allocation2 + $0x1d0] sm:$0xff] %vm293_vm3, %v287_v45  ;;  %v289_v48 = vld [vmem:[%s4808_s19 + $0xe8] sm:$0xff]  ;;  %v5124_v51 = vld [vmem:[#allocation2 + $0xb0] sm:$0xff]  ;;  %v1155_v25 = vrot.slane %v5101_v46, 1 }
  0x48   : > { %v5107_v49 = vld [vmem:[#allocation2 + $0xa8] sm:$0xff]  ;;  %322 = vst.msk [vmem:[#allocation2 + $0x1e8] sm:$0xff] %vm293_vm3, %v288_v47  ;;  %323 = vst.msk [vmem:[#allocation2 + $0x1f0] sm:$0xff] %vm293_vm3, %v289_v48  ;;  %v5138_v53 = vld [vmem:[#allocation2 + $0xd0] sm:$0xff]  ;;  %v1160_v41 = vrot.slane %v5124_v51, 1 }
  0x49   : > { %4062 = vmatmul.mubr.msk.f32.gmra.mrb[6].mxu1 %vm293_vm3, %v5078_v38  ;;  %4259 = vmatmul.mubr.msk.f32.gmra.mrb[4].mxu0 %vm293_vm3, %v5078_v38  ;;  %6248 = vst [vmem:[#allocation9_spill] sm:$0xff] %v5107_v49  ;;  %v5114_v50 = vld [vmem:[%s6171_s1 + $0x8] sm:$0xff]  ;;  %6249 = vst [vmem:[#allocation10_spill] sm:$0xff] %v5124_v51  ;;  %v290_v55 = vld [vmem:[%s4808_s19 + $0xf0] sm:$0xff]  ;;  %v5239_v37 = vsel %vm1133_vm4, %v1154_v24, %v1155_v25  ;;  %v1159_v40 = vrot.slane %v5107_v49, 1 }
  0x4a   : > { %4064 = vmatprep.mubr.msk.f32.mxu1 %vm293_vm3, %v5081_v39  ;;  %4261 = vmatprep.mubr.msk.f32.mxu0 %vm293_vm3, %v5081_v39  ;;  %v5126_v52 = vld [vmem:[#allocation2 + $0xc8] sm:$0xff]  ;;  %6251 = vst [vmem:[#allocation12_spill] sm:$0xff] %v5138_v53  ;;  %v291_v56 = vld [vmem:[%s4808_s19 + $0xf8] sm:$0xff]  ;;  %v5152_v57 = vld [vmem:[#allocation2 + $0xf0] sm:$0xff] }
  0x4b   : > { %6250 = vst [vmem:[#allocation11_spill] sm:$0xff] %v5126_v52  ;;  %4150 = vmatprep.subr.msk.mxu1 %vm598_vm2, %v5114_v50  ;;  %v5140_v54 = vld [vmem:[#allocation2 + $0xe8] sm:$0xff]  ;;  %6253 = vst [vmem:[#allocation14_spill] sm:$0xff] %v5152_v57  ;;  %v333_v61 = vld [vmem:[#allocation2 + $0x38] sm:$0x1]  ;;  %v5259_v48 = vsel %vm1133_vm4, %v1159_v40, %v1160_v41 }
  0x4c   : > { %6252 = vst [vmem:[#allocation13_spill] sm:$0xff] %v5140_v54  ;;  %324 = vst.msk [vmem:[#allocation2 + $0x208] sm:$0xff] %vm293_vm3, %v290_v55  ;;  %v5158_v60 = vld [vmem:[#allocation2 + $0x108] sm:$0xff]  ;;  %v5168_v62 = vld [vmem:[#allocation2 + $0x110] sm:$0xff]  ;;  %v1142_v63 = vrot.slane %v333_v61, 1  ;;  %v1164_v55 = vrot.slane %v5126_v52, 1 }
  0x4d   : > { %4065 = vmatmul.mubr.msk.f32.gmra.mrb[8].mxu1 %vm293_vm3, %v5101_v46  ;;  %4262 = vmatmul.mubr.msk.f32.gmra.mrb[6].mxu0 %vm293_vm3, %v5101_v46  ;;  %325 = vst.msk [vmem:[#allocation2 + $0x210] sm:$0xff] %vm293_vm3, %v291_v56  ;;  %6254 = vst [vmem:[#allocation15_spill] sm:$0xff] %v5158_v60  ;;  %v5170_v0 = vld [vmem:[#allocation2 + $0x128] sm:$0xff]  ;;  %v337_v3 = vld [vmem:[#allocation2 + $0x58] sm:$0x1]  ;;  %v1165_v56 = vrot.slane %v5138_v53, 1 }
  0x4e   : > { %4067 = vmatprep.mubr.msk.f32.mxu1 %vm293_vm3, %v5107_v49  ;;  %4264 = vmatprep.mubr.msk.f32.mxu0 %vm293_vm3, %v5107_v49  ;;  %v5185_v9 = vld [vmem:[#allocation2 + $0x130] sm:$0xff]  ;;  %v5188_v10 = vsel %vm1133_vm4, %v1140_v59, %v1142_v63  ;;  %v1147_v11 = vrot.slane %v337_v3, 1  ;;  %v5191_v13 = vld [vmem:[#allocation2 + $0x148] sm:$0xff]  ;;  %v341_v16 = vld [vmem:[#allocation2 + $0x78] sm:$0x1] }
  0x4f   : > { %v5206_v18 = vld [vmem:[#allocation2 + $0x150] sm:$0xff]  ;;  %v1152_v21 = vrot.slane %v341_v16, 1  ;;  %v5213_v22 = vld [vmem:[#allocation2 + $0x168] sm:$0xff]  ;;  %v345_v26 = vld [vmem:[#allocation2 + $0x98] sm:$0x1]  ;;  %v5279_v4 = vsel %vm1133_vm4, %v1164_v55, %v1165_v56  ;;  %v453_v16 = vrot.slane %v4967_v2, 7 }
  0x50   : > { %v5209_v20 = vsel %vm1133_vm4, %v1145_v7, %v1147_v11  ;;  %v5231_v27 = vld [vmem:[#allocation2 + $0x170] sm:$0xff]  ;;  %v1157_v29 = vrot.slane %v345_v26, 1  ;;  %v5236_v31 = vld [vmem:[#allocation2 + $0x188] sm:$0xff]  ;;  %v349_v42 = vld [vmem:[#allocation2 + $0xb8] sm:$0x1]  ;;  %6260 = vst [vmem:[#allocation21_spill] sm:$0xff] %v5279_v4 }
  0x51   : > { %4068 = vmatmul.mubr.msk.f32.gmra.mrb[10].mxu1 %vm293_vm3, %v5124_v51  ;;  %4265 = vmatmul.mubr.msk.f32.gmra.mrb[8].mxu0 %vm293_vm3, %v5124_v51  ;;  %v5234_v28 = vsel %vm1133_vm4, %v1150_v15, %v1152_v21  ;;  %6255 = vst [vmem:[#allocation16_spill] sm:$0xff] %v5236_v31  ;;  %v5251_v43 = vld [vmem:[#allocation2 + $0x190] sm:$0xff]  ;;  %v1162_v45 = vrot.slane %v349_v42, 1  ;;  %v5256_v47 = vld [vmem:[#allocation2 + $0x1a8] sm:$0xff]  ;;  %v353_v58 = vld [vmem:[#allocation2 + $0xd8] sm:$0x1] }
  0x52   : > { %4070 = vmatprep.mubr.msk.f32.mxu1 %vm293_vm3, %v5126_v52  ;;  %4267 = vmatprep.mubr.msk.f32.mxu0 %vm293_vm3, %v5126_v52  ;;  %6256 = vst [vmem:[#allocation17_spill] sm:$0xff] %v5251_v43  ;;  %v5254_v44 = vsel %vm1133_vm4, %v1155_v25, %v1157_v29  ;;  %6257 = vst [vmem:[#allocation18_spill] sm:$0xff] %v5256_v47  ;;  %v5271_v59 = vld [vmem:[#allocation2 + $0x1b0] sm:$0xff]  ;;  %v1167_v63 = vrot.slane %v353_v58, 1  ;;  %v5276_v3 = vld [vmem:[#allocation2 + $0x1c8] sm:$0xff]  ;;  %v1169_v7 = vrot.slane %v5140_v54, 1 }
  0x53   : > { %v5274_v61 = vsel %vm1133_vm4, %v1160_v41, %v1162_v45  ;;  %6259 = vst [vmem:[#allocation20_spill] sm:$0xff] %v5276_v3  ;;  %v1170_v11 = vrot.slane %v5152_v57, 1  ;;  %v357_v14 = vld [vmem:[#allocation2 + $0xf8] sm:$0x1]  ;;  %v326_v15 = vld [vmem:[#allocation2] sm:$0xff]  ;;  %v5292_v21 = vld [vmem:[#allocation2 + $0x1d0] sm:$0xff] }
  0x54   : > { %6258 = vst [vmem:[#allocation19_spill] sm:$0xff] %v5274_v61  ;;  %v5295_v24 = vsel %vm1133_vm4, %v1165_v56, %v1167_v63  ;;  %v1172_v25 = vrot.slane %v357_v14, 1  ;;  %v5297_v26 = vld [vmem:[#allocation2 + $0x1e8] sm:$0xff]  ;;  %v452_v40 = vrot.slane %v326_v15, 7  ;;  %v1174_v2 = vrot.slane %v5158_v60, 1  ;;  %v330_v45 = vld [vmem:[#allocation2 + $0x20] sm:$0xff] }
  0x55   : > { %4071 = vmatmul.mubr.msk.f32.gmra.mrb[12].mxu1 %vm293_vm3, %v5138_v53  ;;  %4268 = vmatmul.mubr.msk.f32.gmra.mrb[10].mxu0 %vm293_vm3, %v5138_v53  ;;  %6261 = vst [vmem:[#allocation22_spill] sm:$0xff] %v5295_v24  ;;  %v5300_v29 = vsel %vm1133_vm4, %v1169_v7, %v1170_v11  ;;  %v1175_v41 = vrot.slane %v5168_v62, 1  ;;  %v361_v42 = vld [vmem:[#allocation2 + $0x118] sm:$0x1]  ;;  %v455_v55 = vrot.slane %v4972_v5, 7  ;;  %v5313_v56 = vld [vmem:[#allocation2 + $0x1f0] sm:$0xff] }
  0x56   : > { %4073 = vmatprep.mubr.msk.f32.mxu1 %vm293_vm3, %v5140_v54  ;;  %4270 = vmatprep.mubr.msk.f32.mxu0 %vm293_vm3, %v5140_v54  ;;  %6262 = vst [vmem:[#allocation23_spill] sm:$0xff] %v5300_v29  ;;  %v5316_v58 = vsel %vm1133_vm4, %v1170_v11, %v1172_v25  ;;  %v1177_v63 = vrot.slane %v361_v42, 1  ;;  %v1179_v7 = vrot.slane %v5170_v0, 1  ;;  %v1180_v14 = vrot.slane %v5185_v9, 1  ;;  %v365_v15 = vld [vmem:[#allocation2 + $0x138] sm:$0x1] }
  0x57   : > { %v1182_v11 = vrot.slane %v365_v15, 1  ;;  %v456_v30 = vsel %vm451_vm5, %v453_v16, %v455_v55  ;;  %v1185_v15 = vrot.slane %v5206_v18, 1 }
  0x58   : > { %v5335_v25 = vsel %vm1133_vm4, %v1175_v41, %v1177_v63 }
  0x59   : > { %4074 = vmatmul.mubr.msk.f32.gmra.mrb[14].mxu1 %vm293_vm3, %v5152_v57  ;;  %4271 = vmatmul.mubr.msk.f32.gmra.mrb[12].mxu0 %vm293_vm3, %v5152_v57  ;;  %v5354_v55 = vsel %vm1133_vm4, %v1180_v14, %v1182_v11 }
  0x5a   : > { %4076 = vmatprep.mubr.msk.f32.mxu1 %vm293_vm3, %v5158_v60  ;;  %4273 = vmatprep.mubr.msk.f32.mxu0 %vm293_vm3, %v5158_v60  ;;  %6267 = vst [vmem:[#allocation28_spill] sm:$0xff] %v5354_v55 }
  0x5d   : > { %4077 = vmatmul.mubr.msk.f32.gmra.mrb[16].mxu1 %vm293_vm3, %v5168_v62  ;;  %4274 = vmatmul.mubr.msk.f32.gmra.mrb[14].mxu0 %vm293_vm3, %v5168_v62 }
  0x5e   : > { %4079 = vmatprep.mubr.msk.f32.mxu1 %vm293_vm3, %v5170_v0  ;;  %4302 = vmatprep.mubr.msk.f32.mxu0 %vm293_vm3, %v5173_v1 }
  0x61   : > { %4080 = vmatmul.mubr.msk.f32.gmra.mrb[18].mxu1 %vm293_vm3, %v5185_v9  ;;  %4303 = vmatmul.mubr.msk.f32.vlgmr.msra.gmra.mrb[0].mxu0 %vm293_vm3, %v5188_v10 }
  0x62   : > { %4351 = vmatpush3.msk.msra.mxu0 %vm598_vm2, %v5051_v34  ;;  %4082 = vmatprep.mubr.msk.f32.mxu1 %vm293_vm3, %v5191_v13 }
  0x63   : > { %4305 = vmatprep.mubr.msk.f32.mxu0 %vm293_vm3, %v5196_v17  ;;  %4400 = vmatprep.subr.msk.mxu0 %vm598_vm2, %v6175_v12  ;;  %v454_v12 = vsel %vm451_vm5, %v452_v40, %v453_v16  ;;  %v5338_v40 = vsel %vm1133_vm4, %v1179_v7, %v1180_v14  ;;  %v6187_v16 = vrot.slane %v5114_v50, 4  ;;  %v468_v7 = vrot.slane %v5065_v36, 7 }
  0x64   : > { %6264 = vst [vmem:[#allocation25_spill] sm:$0xff] %v5338_v40  ;;  %v1195_v36 = vrot.slane %v5251_v43, 1 }
  0x65   : > { %4083 = vmatmul.mubr.msk.f32.gmra.mrb[20].mxu1 %vm293_vm3, %v5206_v18  ;;  %4306 = vmatmul.mubr.msk.f32.gmra.mrb[2].mxu0 %vm293_vm3, %v5209_v20 }
  0x66   : > { %4085 = vmatprep.mubr.msk.f32.mxu1 %vm293_vm3, %v5213_v22  ;;  %4308 = vmatprep.mubr.msk.f32.mxu0 %vm293_vm3, %v5216_v23 }
  0x69   : > { %4086 = vmatmul.mubr.msk.f32.gmra.mrb[22].mxu1 %vm293_vm3, %v5231_v27  ;;  %4309 = vmatmul.mubr.msk.f32.gmra.mrb[4].mxu0 %vm293_vm3, %v5234_v28 }
  0x6a   : > { %4088 = vmatprep.mubr.msk.f32.mxu1 %vm293_vm3, %v5236_v31  ;;  %4311 = vmatprep.mubr.msk.f32.mxu0 %vm293_vm3, %v5239_v37 }
  0x6d   : > { %4089 = vmatmul.mubr.msk.f32.gmra.mrb[24].mxu1 %vm293_vm3, %v5251_v43  ;;  %4312 = vmatmul.mubr.msk.f32.gmra.mrb[6].mxu0 %vm293_vm3, %v5254_v44 }
  0x6e   : > { %4091 = vmatprep.mubr.msk.f32.mxu1 %vm293_vm3, %v5256_v47  ;;  %4314 = vmatprep.mubr.msk.f32.mxu0 %vm293_vm3, %v5259_v48 }
  0x71   : > { %4092 = vmatmul.mubr.msk.f32.gmra.mrb[26].mxu1 %vm293_vm3, %v5271_v59  ;;  %4315 = vmatmul.mubr.msk.f32.gmra.mrb[8].mxu0 %vm293_vm3, %v5274_v61  ;;  %v460_v61 = vrot.slane %v5044_v32, 7  ;;  %v463_v32 = vrot.slane %v5046_v33, 7  ;;  %v362_v33 = vld [vmem:[#allocation2 + $0x120] sm:$0xff] }
  0x72   : > { %4094 = vmatprep.mubr.msk.f32.mxu1 %vm293_vm3, %v5276_v3  ;;  %4317 = vmatprep.mubr.msk.f32.mxu0 %vm293_vm3, %v5279_v4  ;;  %v457_v4 = vrot.slane %v330_v45, 7 }
  0x74   : > { %v5342_v42 = vsel %vm451_vm5, %v457_v4, %v458_v8  ;;  %v465_v4 = vrot.slane %v5061_v35, 7  ;;  %v346_v35 = vld [vmem:[#allocation2 + $0xa0] sm:$0xff] }
  0x75   : > { %4095 = vmatmul.mubr.msk.f32.gmra.mrb[28].mxu1 %vm293_vm3, %v5292_v21  ;;  %4318 = vmatmul.mubr.msk.f32.gmra.mrb[10].mxu0 %vm293_vm3, %v5295_v24  ;;  %v5323_v24 = vsel %vm1133_vm4, %v1174_v2, %v1175_v41  ;;  %v369_v2 = vld [vmem:[#allocation2 + $0x158] sm:$0x1]  ;;  %6265 = vst [vmem:[#allocation26_spill] sm:$0xff] %v5342_v42  ;;  %v5351_v41 = vsel %vm451_vm5, %v458_v8, %v460_v61  ;;  %v1190_v8 = vrot.slane %v5231_v27, 1 }
  0x76   : > { %4097 = vmatprep.mubr.msk.f32.mxu1 %vm293_vm3, %v5297_v26  ;;  %4320 = vmatprep.mubr.msk.f32.mxu0 %vm293_vm3, %v5300_v29  ;;  %6263 = vst [vmem:[#allocation24_spill] sm:$0xff] %v5323_v24  ;;  %v334_v29 = vld [vmem:[#allocation2 + $0x40] sm:$0xff]  ;;  %6266 = vst [vmem:[#allocation27_spill] sm:$0xff] %v5351_v41  ;;  %v373_v61 = vld [vmem:[#allocation2 + $0x178] sm:$0x1] }
  0x77   : > { %v462_v45 = vrot.slane %v334_v29, 7  ;;  %v1187_v29 = vrot.slane %v369_v2, 1  ;;  %v342_v2 = vld [vmem:[#allocation2 + $0x80] sm:$0xff] }
  0x79   : > { %4098 = vmatmul.mubr.msk.f32.gmra.mrb[30].mxu1 %vm293_vm3, %v5313_v56  ;;  %4321 = vmatmul.mubr.msk.f32.gmra.mrb[12].mxu0 %vm293_vm3, %v5316_v58  ;;  %v5367_v14 = vsel %vm451_vm5, %v462_v45, %v463_v32  ;;  %v470_v45 = vrot.slane %v5078_v38, 7  ;;  %v473_v38 = vrot.slane %v5081_v39, 7  ;;  %v478_v39 = vrot.slane %v5107_v49, 7 }
  0x7a   : > { %4102 = vmatprep.mubr.msk.f32.mxu1 %vm293_vm3, %v454_v12  ;;  %4323 = vmatprep.mubr.msk.f32.mxu0 %vm293_vm3, %v5323_v24  ;;  %v1184_v12 = vrot.slane %v5191_v13, 1  ;;  %v338_v24 = vld [vmem:[#allocation2 + $0x60] sm:$0xff]  ;;  %v480_v49 = vrot.slane %v5124_v51, 7  ;;  %v483_v51 = vrot.slane %v5126_v52, 7  ;;  %v488_v52 = vrot.slane %v5140_v54, 7 }
  0x7b   : > { %v467_v63 = vrot.slane %v338_v24, 7  ;;  %v5380_v24 = vsel %vm451_vm5, %v463_v32, %v465_v4  ;;  %v377_v32 = vld [vmem:[#allocation2 + $0x198] sm:$0x1]  ;;  %v472_v4 = vrot.slane %v342_v2, 7  ;;  %v477_v2 = vrot.slane %v346_v35, 7 }
  0x7c   : > { %v5370_v11 = vsel %vm1133_vm4, %v1184_v12, %v1185_v15  ;;  %v5388_v12 = vsel %vm1133_vm4, %v1185_v15, %v1187_v29  ;;  %v5404_v15 = vsel %vm451_vm5, %v468_v7, %v470_v45  ;;  %v381_v45 = vld [vmem:[#allocation2 + $0x1b8] sm:$0x1] }
  0x7d   : > { %4103 = vmatmul.mubr.msk.f32.vlgmr.msra.gmra.mrb[0].mxu1 %vm293_vm3, %v456_v30  ;;  %4324 = vmatmul.mubr.msk.f32.gmra.mrb[14].mxu0 %vm293_vm3, %v5335_v25  ;;  %v1189_v30 = vrot.slane %v5213_v22, 1  ;;  %6268 = vst [vmem:[#allocation29_spill] sm:$0xff] %v5370_v11  ;;  %6269 = vst [vmem:[#allocation30_spill] sm:$0xff] %v5388_v12 }
  0x7e   : > { %4105 = vmatprep.mubr.msk.f32.mxu1 %vm293_vm3, %v5342_v42  ;;  %4326 = vmatprep.mubr.msk.f32.mxu0 %vm293_vm3, %v5338_v40  ;;  %v1192_v42 = vrot.slane %v373_v61, 1  ;;  %v1194_v61 = vrot.slane %v5236_v31, 1  ;;  %v366_v40 = vld [vmem:[#allocation2 + $0x140] sm:$0xff] }
  0x7f   : > { %4151 = vmatpush3.msk.msra.mxu1 %vm598_vm2, %v5114_v50 }
  0x80   : > { %4200 = vmatprep.subr.msk.mxu1 %vm598_vm2, %v6187_v16  ;;  %v5391_v16 = vsel %vm451_vm5, %v467_v63, %v468_v7  ;;  %v5407_v29 = vsel %vm1133_vm4, %v1190_v8, %v1192_v42  ;;  %v475_v63 = vrot.slane %v5101_v46, 7  ;;  %v1200_v7 = vrot.slane %v5271_v59, 1 }
  0x81   : > { %4106 = vmatmul.mubr.msk.f32.gmra.mrb[2].mxu1 %vm293_vm3, %v5351_v41  ;;  %4327 = vmatmul.mubr.msk.f32.gmra.mrb[16].mxu0 %vm293_vm3, %v5354_v55  ;;  %v5394_v41 = vsel %vm1133_vm4, %v1189_v30, %v1190_v8  ;;  %6271 = vst [vmem:[#allocation32_spill] sm:$0xff] %v5407_v29  ;;  %v1197_v30 = vrot.slane %v377_v32, 1  ;;  %v5418_v42 = vsel %vm451_vm5, %v472_v4, %v473_v38  ;;  %v350_v32 = vld [vmem:[#allocation2 + $0xc0] sm:$0xff]  ;;  %v1202_v46 = vrot.slane %v381_v45, 1  ;;  %v393_v55 = vld [vmem:[#allocation2 + $0x218] sm:$0x1] }
  0x82   : > { %4108 = vmatprep.mubr.msk.f32.mxu1 %vm293_vm3, %v5367_v14  ;;  %4329 = vmatprep.mubr.msk.f32.mxu0 %vm293_vm3, %v5370_v11  ;;  %6270 = vst [vmem:[#allocation31_spill] sm:$0xff] %v5394_v41  ;;  %v5421_v8 = vsel %vm1133_vm4, %v1194_v61, %v1195_v36  ;;  %v5428_v35 = vsel %vm451_vm5, %v473_v38, %v475_v63  ;;  %v385_v38 = vld [vmem:[#allocation2 + $0x1d8] sm:$0x1]  ;;  %v482_v63 = vrot.slane %v350_v32, 7  ;;  %v1204_v45 = vrot.slane %v5276_v3, 1  ;;  %v354_v11 = vld [vmem:[#allocation2 + $0xe0] sm:$0xff] }
  0x83   : > { %6272 = vst [vmem:[#allocation33_spill] sm:$0xff] %v5421_v8  ;;  %v5436_v4 = vsel %vm1133_vm4, %v1195_v36, %v1197_v30  ;;  %v5439_v61 = vsel %vm451_vm5, %v477_v2, %v478_v39  ;;  %v5452_v36 = vsel %vm451_vm5, %v478_v39, %v480_v49  ;;  %v485_v30 = vrot.slane %v5138_v53, 7  ;;  %v5471_v53 = vld [vmem:[#allocation2 + $0x208] sm:$0xff] }
  0x84   : > { %6273 = vst [vmem:[#allocation34_spill] sm:$0xff] %v5436_v4  ;;  %v1207_v2 = vrot.slane %v385_v38, 1  ;;  %v487_v32 = vrot.slane %v354_v11, 7  ;;  %v1210_v39 = vrot.slane %v5313_v56, 1  ;;  %v5466_v49 = vsel %vm451_vm5, %v482_v63, %v483_v51  ;;  %v358_v38 = vld [vmem:[#allocation2 + $0x100] sm:$0xff] }
  0x85   : > { %4109 = vmatmul.mubr.msk.f32.gmra.mrb[4].mxu1 %vm293_vm3, %v5380_v24  ;;  %4330 = vmatmul.mubr.msk.f32.gmra.mrb[18].mxu0 %vm293_vm3, %v5388_v12  ;;  %v1199_v12 = vrot.slane %v5256_v47, 1  ;;  %v5480_v11 = vsel %vm451_vm5, %v483_v51, %v485_v30  ;;  %v492_v51 = vrot.slane %v358_v38, 7  ;;  %v493_v30 = vrot.slane %v5158_v60, 7 }
  0x86   : > { %4111 = vmatprep.mubr.msk.f32.mxu1 %vm293_vm3, %v5391_v16  ;;  %4332 = vmatprep.mubr.msk.f32.mxu0 %vm293_vm3, %v5394_v41  ;;  %v1205_v41 = vrot.slane %v5292_v21, 1  ;;  %v2078_v38 = vrot.slane %v393_v55, 1  ;;  %v500_v55 = vrot.slane %v5185_v9, 7 }
  0x87   : > { %v5515_v60 = vsel %vm451_vm5, %v492_v51, %v493_v30  ;;  %v370_v51 = vld [vmem:[#allocation2 + $0x160] sm:$0xff] }
  0x88   : > { %v5483_v63 = vsel %vm1133_vm4, %v1205_v41, %v1207_v2  ;;  %6278 = vst [vmem:[#allocation39_spill] sm:$0xff] %v5515_v60 }
  0x89   : > { %4112 = vmatmul.mubr.msk.f32.gmra.mrb[6].mxu1 %vm293_vm3, %v5404_v15  ;;  %4333 = vmatmul.mubr.msk.f32.gmra.mrb[20].mxu0 %vm293_vm3, %v5407_v29  ;;  %v5442_v29 = vsel %vm1133_vm4, %v1199_v12, %v1200_v7  ;;  %v5455_v12 = vsel %vm1133_vm4, %v1200_v7, %v1202_v46  ;;  %v5469_v46 = vsel %vm1133_vm4, %v1204_v45, %v1205_v41  ;;  %v389_v7 = vld [vmem:[#allocation2 + $0x1f8] sm:$0x1]  ;;  %v2075_v41 = vrot.slane %v5471_v53, 1 }
  0x8a   : > { %4114 = vmatprep.mubr.msk.f32.mxu1 %vm293_vm3, %v5418_v42  ;;  %4335 = vmatprep.mubr.msk.f32.mxu0 %vm293_vm3, %v5421_v8  ;;  %6274 = vst [vmem:[#allocation35_spill] sm:$0xff] %v5442_v29  ;;  %6275 = vst [vmem:[#allocation36_spill] sm:$0xff] %v5455_v12  ;;  %v5473_v8 = vld [vmem:[#allocation2 + $0x210] sm:$0xff]  ;;  %v5490_v45 = vsel %vm451_vm5, %v487_v32, %v488_v52 }
  0x8b   : > { %6276 = vst [vmem:[#allocation37_spill] sm:$0xff] %v5469_v46  ;;  %6277 = vst [vmem:[#allocation38_spill] sm:$0xff] %v5483_v63  ;;  %v2076_v2 = vrot.slane %v5473_v8, 1 }
  0x8d   : > { %4115 = vmatmul.mubr.msk.f32.gmra.mrb[8].mxu1 %vm293_vm3, %v5428_v35  ;;  %4336 = vmatmul.mubr.msk.f32.gmra.mrb[22].mxu0 %vm293_vm3, %v5436_v4  ;;  %v1209_v4 = vrot.slane %v5297_v26, 1 }
  0x8e   : > { %4117 = vmatprep.mubr.msk.f32.mxu1 %vm293_vm3, %v5439_v61  ;;  %4338 = vmatprep.mubr.msk.f32.mxu0 %vm293_vm3, %v5442_v29  ;;  %v1212_v29 = vrot.slane %v389_v7, 1  ;;  %v495_v7 = vrot.slane %v5168_v62, 7 }
  0x8f   : > { %v5493_v54 = vsel %vm1133_vm4, %v1209_v4, %v1210_v39 }
  0x90   : > { %v5511_v32 = vsel %vm1133_vm4, %v1210_v39, %v1212_v29  ;;  %v503_v39 = vrot.slane %v5191_v13, 7 }
  0x91   : > { %4118 = vmatmul.mubr.msk.f32.gmra.mrb[10].mxu1 %vm293_vm3, %v5452_v36  ;;  %4339 = vmatmul.mubr.msk.f32.gmra.mrb[24].mxu0 %vm293_vm3, %v5455_v12  ;;  %v490_v12 = vrot.slane %v5152_v57, 7  ;;  %v5518_v57 = vsel %vm1133_vm4, %v2075_v41, %v2076_v2  ;;  %v507_v41 = vrot.slane %v370_v51, 7 }
  0x92   : > { %4120 = vmatprep.mubr.msk.f32.mxu1 %vm293_vm3, %v5466_v49  ;;  %4341 = vmatprep.mubr.msk.f32.mxu0 %vm293_vm3, %v5469_v46  ;;  %6279 = vst [vmem:[#allocation40_spill] sm:$0xff] %v5518_v57  ;;  %v498_v46 = vrot.slane %v5170_v0, 7 }
  0x93   : > { %v5508_v4 = vsel %vm451_vm5, %v488_v52, %v490_v12  ;;  %v5530_v52 = vsel %vm451_vm5, %v493_v30, %v495_v7  ;;  %v502_v12 = vrot.slane %v366_v40, 7  ;;  %v505_v40 = vrot.slane %v5206_v18, 7  ;;  %v374_v7 = vld [vmem:[#allocation2 + $0x180] sm:$0xff] }
  0x94   : > { %v5549_v30 = vsel %vm451_vm5, %v498_v46, %v500_v55 }
  0x95   : > { %4121 = vmatmul.mubr.msk.f32.gmra.mrb[12].mxu1 %vm293_vm3, %v5480_v11  ;;  %4342 = vmatmul.mubr.msk.f32.gmra.mrb[26].mxu0 %vm293_vm3, %v5483_v63  ;;  %v497_v63 = vrot.slane %v362_v33, 7  ;;  %v5533_v33 = vsel %vm1133_vm4, %v2076_v2, %v2078_v38  ;;  %v508_v2 = vrot.slane %v5213_v22, 7  ;;  %v5559_v38 = vld [vmem:[%s6171_s1 + $0x20] sm:$0xf]  ;;  %v5571_v55 = vsel %vm451_vm5, %v503_v39, %v505_v40 }
  0x96   : > { %4123 = vmatprep.mubr.msk.f32.mxu1 %vm293_vm3, %v5490_v45  ;;  %4344 = vmatprep.mubr.msk.f32.mxu0 %vm293_vm3, %v5493_v54  ;;  %6280 = vst [vmem:[#allocation41_spill] sm:$0xff] %v5533_v33  ;;  %v515_v40 = vrot.slane %v5251_v43, 7  ;;  %v386_v43 = vld [vmem:[#allocation2 + $0x1e0] sm:$0xff] }
  0x97   : > { %v5537_v29 = vsel %vm451_vm5, %v497_v63, %v498_v46  ;;  %v5553_v63 = vsel %vm451_vm5, %v502_v12, %v503_v39  ;;  %v6281_v46 = vrot.slane %v5051_v34, 4  ;;  %v510_v12 = vrot.slane %v5231_v27, 7  ;;  %v378_v34 = vld [vmem:[#allocation2 + $0x1a0] sm:$0xff] }
  0x98   : > { %v5577_v51 = vsel %vm451_vm5, %v507_v41, %v508_v2 }
  0x99   : > { %4124 = vmatmul.mubr.msk.f32.gmra.mrb[14].mxu1 %vm293_vm3, %v5508_v4  ;;  %4345 = vmatmul.mubr.msk.f32.gmra.mrb[28].mxu0 %vm293_vm3, %v5511_v32  ;;  %v5591_v39 = vsel %vm451_vm5, %v508_v2, %v510_v12 }
  0x9a   : > { %4126 = vmatprep.mubr.msk.f32.mxu1 %vm293_vm3, %v5515_v60  ;;  %4347 = vmatprep.mubr.msk.f32.mxu0 %vm293_vm3, %v5518_v57  ;;  %v513_v57 = vrot.slane %v5236_v31, 7  ;;  %v382_v31 = vld [vmem:[#allocation2 + $0x1c0] sm:$0xff] }
  0x9c   : > { %v5607_v2 = vsel %vm451_vm5, %v513_v57, %v515_v40 }
  0x9d   : > { %4127 = vmatmul.mubr.msk.f32.gmra.mrb[16].mxu1 %vm293_vm3, %v5530_v52  ;;  %4348 = vmatmul.mubr.msk.f32.gmra.mrb[30].mxu0 %vm293_vm3, %v5533_v33  ;;  %v512_v33 = vrot.slane %v374_v7, 7  ;;  %v517_v7 = vrot.slane %v378_v34, 7  ;;  %v522_v34 = vrot.slane %v382_v31, 7  ;;  %v525_v31 = vrot.slane %v5292_v21, 7 }
  0x9e   : > { %4129 = vmatprep.mubr.msk.f32.mxu1 %vm293_vm3, %v5537_v29  ;;  %4352 = vmatprep.mubr.msk.f32.mxu0 %vm293_vm3, %v5367_v14 }
  0x9f   : > { %v5595_v41 = vsel %vm451_vm5, %v512_v33, %v513_v57  ;;  %v520_v33 = vrot.slane %v5271_v59, 7 }
  0xa1   : > { %4130 = vmatmul.mubr.msk.f32.gmra.mrb[18].mxu1 %vm293_vm3, %v5549_v30  ;;  %4353 = vmatmul.mubr.msk.f32.vlgmr.msra.gmra.mrb[0].mxu0 %vm293_vm3, %v5380_v24 }
  0xa2   : > { %4401 = vmatpush3.msk.msra.mxu0 %vm598_vm2, %v6281_v46  ;;  %4132 = vmatprep.mubr.msk.f32.mxu1 %vm293_vm3, %v5553_v63  ;;  %v518_v46 = vrot.slane %v5256_v47, 7  ;;  %v523_v47 = vrot.slane %v5276_v3, 7  ;;  %v528_v3 = vrot.slane %v5297_v26, 7 }
  0xa3   : > { %4355 = vmatprep.mubr.msk.f32.mxu0 %vm293_vm3, %v5391_v16  ;;  %4450 = vmatprep.subr.msk.mxu0 %vm598_vm2, %v5559_v38 }
  0xa4   : > { %v5611_v12 = vsel %vm451_vm5, %v517_v7, %v518_v46  ;;  %v5623_v57 = vsel %vm451_vm5, %v518_v46, %v520_v33  ;;  %v5627_v40 = vsel %vm451_vm5, %v522_v34, %v523_v47  ;;  %v527_v7 = vrot.slane %v386_v43, 7  ;;  %v329_v34 = vld [vmem:[#allocation2 + $0x18] sm:$0x1] }
  0xa5   : > { %4133 = vmatmul.mubr.msk.f32.gmra.mrb[20].mxu1 %vm293_vm3, %v5571_v55  ;;  %4356 = vmatmul.mubr.msk.f32.gmra.mrb[2].mxu0 %vm293_vm3, %v5404_v15  ;;  %v5639_v46 = vsel %vm451_vm5, %v523_v47, %v525_v31  ;;  %v530_v33 = vrot.slane %v5313_v56, 7  ;;  %v1137_v31 = vrot.slane %v329_v34, 1 }
  0xa6   : > { %4135 = vmatprep.mubr.msk.f32.mxu1 %vm293_vm3, %v5577_v51  ;;  %4358 = vmatprep.mubr.msk.f32.mxu0 %vm293_vm3, %v5418_v42  ;;  %6282 = vst [vmem:[#allocation42_spill] sm:$0xff] %v5639_v46  ;;  %v5643_v43 = vsel %vm451_vm5, %v527_v7, %v528_v3  ;;  %v6285_v7 = vrot.slane %v4972_v5, 1  ;;  %v390_v5 = vld [vmem:[#allocation2 + $0x200] sm:$0xff] }
  0xa7   : > { %6283 = vst [vmem:[#allocation43_spill] sm:$0xff] %v5643_v43  ;;  %v5654_v47 = vsel %vm451_vm5, %v528_v3, %v530_v33  ;;  %v6288_v3 = vld [vmem:[#allocation21_spill] sm:$0xff]  ;;  %v1544_v33 = vrot.slane %v5473_v8, 7 }
  0xa8   : > { %6284 = vst [vmem:[#allocation44_spill] sm:$0xff] %v5654_v47 }
  0xa9   : > { %4136 = vmatmul.mubr.msk.f32.gmra.mrb[22].mxu1 %vm293_vm3, %v5591_v39  ;;  %4359 = vmatmul.mubr.msk.f32.gmra.mrb[4].mxu0 %vm293_vm3, %v5428_v35 }
  0xaa   : > { %4138 = vmatprep.mubr.msk.f32.mxu1 %vm293_vm3, %v5595_v41  ;;  %4361 = vmatprep.mubr.msk.f32.mxu0 %vm293_vm3, %v5439_v61 }
  0xad   : > { %4139 = vmatmul.mubr.msk.f32.gmra.mrb[24].mxu1 %vm293_vm3, %v5607_v2  ;;  %4362 = vmatmul.mubr.msk.f32.gmra.mrb[6].mxu0 %vm293_vm3, %v5452_v36 }
  0xae   : > { %4141 = vmatprep.mubr.msk.f32.mxu1 %vm293_vm3, %v5611_v12  ;;  %4364 = vmatprep.mubr.msk.f32.mxu0 %vm293_vm3, %v5466_v49 }
  0xb1   : > { %4142 = vmatmul.mubr.msk.f32.gmra.mrb[26].mxu1 %vm293_vm3, %v5623_v57  ;;  %4365 = vmatmul.mubr.msk.f32.gmra.mrb[8].mxu0 %vm293_vm3, %v5480_v11 }
  0xb2   : > { %4144 = vmatprep.mubr.msk.f32.mxu1 %vm293_vm3, %v5627_v40  ;;  %4367 = vmatprep.mubr.msk.f32.mxu0 %vm293_vm3, %v5490_v45 }
  0xb5   : > { %4145 = vmatmul.mubr.msk.f32.gmra.mrb[28].mxu1 %vm293_vm3, %v5639_v46  ;;  %4368 = vmatmul.mubr.msk.f32.gmra.mrb[10].mxu0 %vm293_vm3, %v5508_v4 }
  0xb6   : > { %4147 = vmatprep.mubr.msk.f32.mxu1 %vm293_vm3, %v5643_v43  ;;  %4370 = vmatprep.mubr.msk.f32.mxu0 %vm293_vm3, %v5515_v60  ;;  %v1138_v60 = vsel %vm1133_vm4, %v6285_v7, %v1137_v31 }
  0xb9   : > { %4148 = vmatmul.mubr.msk.f32.gmra.mrb[30].mxu1 %vm293_vm3, %v5654_v47  ;;  %4371 = vmatmul.mubr.msk.f32.gmra.mrb[12].mxu0 %vm293_vm3, %v5530_v52 }
  0xba   : > { %4152 = vmatprep.mubr.msk.f32.mxu1 %vm293_vm3, %v5008_v19  ;;  %4373 = vmatprep.mubr.msk.f32.mxu0 %vm293_vm3, %v5537_v29  ;;  %v6286_v19 = vrot.slane %v5114_v50, 4  ;;  %v1542_v50 = vrot.slane %v5471_v53, 7 }
  0xbd   : > { %4153 = vmatmul.mubr.msk.f32.vlgmr.msra.gmra.mrb[0].mxu1 %vm293_vm3, %v1138_v60  ;;  %4374 = vmatmul.mubr.msk.f32.gmra.mrb[14].mxu0 %vm293_vm3, %v5549_v30  ;;  %v394_v60 = vld [vmem:[#allocation2 + $0x220] sm:$0xff] }
  0xbe   : > { %4155 = vmatprep.mubr.msk.f32.mxu1 %vm293_vm3, %v5173_v1  ;;  %4376 = vmatprep.mubr.msk.f32.mxu0 %vm293_vm3, %v5553_v63  ;;  %v5712_v1 = vld [vmem:[#allocation2 + $0x228] sm:$0xff]  ;;  %v2347_v31 = vrot.slane %v394_v60, 7 }
  0xbf   : > { %4201 = vmatpush3.msk.msra.mxu1 %vm598_vm2, %v6286_v19  ;;  %v2348_v7 = vrot.slane %v5712_v1, 7  ;;  %v5727_v19 = vld [vmem:[#allocation2 + $0x230] sm:$0xff] }
  0xc0   : > { %4500 = vmatprep.subr.msk.mxu1 %vm598_vm2, %v4977_v6  ;;  %v1541_v6 = vrot.slane %v390_v5, 7  ;;  %v6290_v5 = vld [vmem:[#allocation22_spill] sm:$0xff]  ;;  %v2350_v60 = vrot.slane %v5727_v19, 7 }
  0xc1   : > { %4156 = vmatmul.mubr.msk.f32.gmra.mrb[2].mxu1 %vm293_vm3, %v5188_v10  ;;  %4377 = vmatmul.mubr.msk.f32.gmra.mrb[16].mxu0 %vm293_vm3, %v5571_v55  ;;  %v6287_v10 = vld [vmem:[#allocation19_spill] sm:$0xff] }
  0xc2   : > { %4158 = vmatprep.mubr.msk.f32.mxu1 %vm293_vm3, %v5196_v17  ;;  %4379 = vmatprep.mubr.msk.f32.mxu0 %vm293_vm3, %v5577_v51  ;;  %v5724_v34 = vsel %vm451_vm5, %v1541_v6, %v1542_v50  ;;  %v5738_v6 = vsel %vm451_vm5, %v1542_v50, %v1544_v33  ;;  %v6294_v50 = vld [vmem:[#allocation25_spill] sm:$0xff]  ;;  %v6295_v33 = vld [vmem:[#allocation3_spill] sm:$0xff] }
  0xc3   : > { %6289 = vst [vmem:[#allocation19_spill] sm:$0xff] %v5724_v34  ;;  %6292 = vst [vmem:[#allocation21_spill] sm:$0xff] %v5738_v6 }
  0xc5   : > { %4159 = vmatmul.mubr.msk.f32.gmra.mrb[4].mxu1 %vm293_vm3, %v5209_v20  ;;  %4380 = vmatmul.mubr.msk.f32.gmra.mrb[18].mxu0 %vm293_vm3, %v5591_v39 }
  0xc6   : > { %4161 = vmatprep.mubr.msk.f32.mxu1 %vm293_vm3, %v5216_v23  ;;  %4382 = vmatprep.mubr.msk.f32.mxu0 %vm293_vm3, %v5595_v41 }
  0xc9   : > { %4162 = vmatmul.mubr.msk.f32.gmra.mrb[6].mxu1 %vm293_vm3, %v5234_v28  ;;  %4383 = vmatmul.mubr.msk.f32.gmra.mrb[20].mxu0 %vm293_vm3, %v5607_v2 }
  0xca   : > { %4164 = vmatprep.mubr.msk.f32.mxu1 %vm293_vm3, %v5239_v37  ;;  %4385 = vmatprep.mubr.msk.f32.mxu0 %vm293_vm3, %v5611_v12 }
  0xcd   : > { %4165 = vmatmul.mubr.msk.f32.gmra.mrb[8].mxu1 %vm293_vm3, %v5254_v44  ;;  %4386 = vmatmul.mubr.msk.f32.gmra.mrb[22].mxu0 %vm293_vm3, %v5623_v57 }
  0xce   : > { %4167 = vmatprep.mubr.msk.f32.mxu1 %vm293_vm3, %v5259_v48  ;;  %4388 = vmatprep.mubr.msk.f32.mxu0 %vm293_vm3, %v5627_v40 }
  0xd1   : > { %4168 = vmatmul.mubr.msk.f32.gmra.mrb[10].mxu1 %vm293_vm3, %v6287_v10  ;;  %4389 = vmatmul.mubr.msk.f32.gmra.mrb[24].mxu0 %vm293_vm3, %v5639_v46  ;;  %v6291_v46 = vld [vmem:[#allocation23_spill] sm:$0xff] }
  0xd2   : > { %4170 = vmatprep.mubr.msk.f32.mxu1 %vm293_vm3, %v6288_v3  ;;  %4391 = vmatprep.mubr.msk.f32.mxu0 %vm293_vm3, %v5643_v43  ;;  %v2349_v43 = vsel %vm451_vm5, %v2347_v31, %v2348_v7  ;;  %v6296_v31 = vld [vmem:[#allocation28_spill] sm:$0xff] }
  0xd5   : > { %4171 = vmatmul.mubr.msk.f32.gmra.mrb[12].mxu1 %vm293_vm3, %v6290_v5  ;;  %4392 = vmatmul.mubr.msk.f32.gmra.mrb[26].mxu0 %vm293_vm3, %v5654_v47  ;;  %v6293_v47 = vld [vmem:[#allocation24_spill] sm:$0xff] }
  0xd6   : > { %4173 = vmatprep.mubr.msk.f32.mxu1 %vm293_vm3, %v6291_v46  ;;  %4394 = vmatprep.mubr.msk.f32.mxu0 %vm293_vm3, %v5724_v34  ;;  %v2351_v34 = vsel %vm451_vm5, %v2348_v7, %v2350_v60  ;;  %v6299_v7 = vld [vmem:[#allocation5_spill] sm:$0xff]  ;;  %v6301_v60 = vld [vmem:[#allocation6_spill] sm:$0xff] }
  0xd9   : > { %4174 = vmatmul.mubr.msk.f32.gmra.mrb[14].mxu1 %vm293_vm3, %v5316_v58  ;;  %4395 = vmatmul.mubr.msk.f32.gmra.mrb[28].mxu0 %vm293_vm3, %v5738_v6  ;;  %v6297_v6 = vld [vmem:[#allocation4_spill] sm:$0xff] }
  0xda   : > { %4176 = vmatprep.mubr.msk.f32.mxu1 %vm293_vm3, %v6293_v47  ;;  %4397 = vmatprep.mubr.msk.f32.mxu0 %vm293_vm3, %v2349_v43  ;;  %v6298_v43 = vld [vmem:[#allocation29_spill] sm:$0xff] }
  0xdd   : > { %4177 = vmatmul.mubr.msk.f32.gmra.mrb[16].mxu1 %vm293_vm3, %v5335_v25  ;;  %4398 = vmatmul.mubr.msk.f32.gmra.mrb[30].mxu0 %vm293_vm3, %v2351_v34  ;;  %v6300_v34 = vld [vmem:[#allocation30_spill] sm:$0xff] }
  0xde   : > { %4179 = vmatprep.mubr.msk.f32.mxu1 %vm293_vm3, %v6294_v50  ;;  %4402 = vmatprep.mubr.msk.f32.mxu0 %vm293_vm3, %v6295_v33  ;;  %v6302_v33 = vld [vmem:[#allocation31_spill] sm:$0xff] }
  0xe1   : > { %4180 = vmatmul.mubr.msk.f32.gmra.mrb[18].mxu1 %vm293_vm3, %v6296_v31  ;;  %4403 = vmatmul.mubr.msk.f32.vlgmr.msra.gmra.mrb[0].mxu0 %vm293_vm3, %v6297_v6  ;;  %v6303_v31 = vld [vmem:[#allocation7_spill] sm:$0xff]  ;;  %v6304_v6 = vld [vmem:[#allocation32_spill] sm:$0xff] }
  0xe2   : > { %4451 = vmatpush3.msk.msra.mxu0 %vm598_vm2, %v5559_v38  ;;  %4182 = vmatprep.mubr.msk.f32.mxu1 %vm293_vm3, %v6298_v43  ;;  %v6305_v38 = vld [vmem:[#allocation8_spill] sm:$0xff]  ;;  %v6306_v43 = vld [vmem:[#allocation33_spill] sm:$0xff] }
  0xe3   : > { %4405 = vmatprep.mubr.msk.f32.mxu0 %vm293_vm3, %v6299_v7  ;;  %v6307_v7 = vld [vmem:[#allocation9_spill] sm:$0xff] }
  0xe5   : > { %4183 = vmatmul.mubr.msk.f32.gmra.mrb[20].mxu1 %vm293_vm3, %v6300_v34  ;;  %4406 = vmatmul.mubr.msk.f32.gmra.mrb[2].mxu0 %vm293_vm3, %v6301_v60  ;;  %v6308_v34 = vld [vmem:[#allocation34_spill] sm:$0xff] }
  0xe6   : > { %4185 = vmatprep.mubr.msk.f32.mxu1 %vm293_vm3, %v6302_v33  ;;  %4408 = vmatprep.mubr.msk.f32.mxu0 %vm293_vm3, %v6303_v31  ;;  %v6309_v60 = vld [vmem:[#allocation10_spill] sm:$0xff]  ;;  %v6310_v33 = vld [vmem:[#allocation35_spill] sm:$0xff] }
  0xe7   : > { %v6311_v31 = vld [vmem:[#allocation11_spill] sm:$0xff] }
  0xe9   : > { %4186 = vmatmul.mubr.msk.f32.gmra.mrb[22].mxu1 %vm293_vm3, %v6304_v6  ;;  %4409 = vmatmul.mubr.msk.f32.gmra.mrb[4].mxu0 %vm293_vm3, %v6305_v38  ;;  %v6312_v6 = vld [vmem:[#allocation36_spill] sm:$0xff] }
  0xea   : > { %4188 = vmatprep.mubr.msk.f32.mxu1 %vm293_vm3, %v6306_v43  ;;  %4411 = vmatprep.mubr.msk.f32.mxu0 %vm293_vm3, %v6307_v7  ;;  %v6313_v38 = vld [vmem:[#allocation12_spill] sm:$0xff]  ;;  %v6314_v43 = vld [vmem:[#allocation37_spill] sm:$0xff] }
  0xeb   : > { %v6315_v7 = vld [vmem:[#allocation13_spill] sm:$0xff] }
  0xed   : > { %4189 = vmatmul.mubr.msk.f32.gmra.mrb[24].mxu1 %vm293_vm3, %v6308_v34  ;;  %4412 = vmatmul.mubr.msk.f32.gmra.mrb[6].mxu0 %vm293_vm3, %v6309_v60  ;;  %v6316_v34 = vld [vmem:[#allocation38_spill] sm:$0xff] }
  0xee   : > { %4191 = vmatprep.mubr.msk.f32.mxu1 %vm293_vm3, %v6310_v33  ;;  %4414 = vmatprep.mubr.msk.f32.mxu0 %vm293_vm3, %v6311_v31  ;;  %v6317_v60 = vld [vmem:[#allocation14_spill] sm:$0xff]  ;;  %v6318_v31 = vld [vmem:[#allocation15_spill] sm:$0xff] }
  0xf1   : > { %4192 = vmatmul.mubr.msk.f32.gmra.mrb[26].mxu1 %vm293_vm3, %v6312_v6  ;;  %4415 = vmatmul.mubr.msk.f32.gmra.mrb[8].mxu0 %vm293_vm3, %v6313_v38  ;;  %v6319_v38 = vld [vmem:[#allocation26_spill] sm:$0xff] }
  0xf2   : > { %4194 = vmatprep.mubr.msk.f32.mxu1 %vm293_vm3, %v6314_v43  ;;  %4417 = vmatprep.mubr.msk.f32.mxu0 %vm293_vm3, %v6315_v7  ;;  %v6320_v7 = vld [vmem:[#allocation27_spill] sm:$0xff] }
  0xf5   : > { %4195 = vmatmul.mubr.msk.f32.gmra.mrb[28].mxu1 %vm293_vm3, %v6316_v34  ;;  %4418 = vmatmul.mubr.msk.f32.gmra.mrb[10].mxu0 %vm293_vm3, %v6317_v60 }
  0xf6   : > { %4197 = vmatprep.mubr.msk.f32.mxu1 %vm293_vm3, %v5493_v54  ;;  %4420 = vmatprep.mubr.msk.f32.mxu0 %vm293_vm3, %v6318_v31 }
  0xf9   : > { %4198 = vmatmul.mubr.msk.f32.gmra.mrb[30].mxu1 %vm293_vm3, %v5511_v32  ;;  %4421 = vmatmul.mubr.msk.f32.gmra.mrb[12].mxu0 %vm293_vm3, %v5168_v62  ;;  %v4767_v62 = vld [vmem:[%s6171_s1 + $0x10] sm:$0xff] }
  0xfa   : > { %4202 = vmatprep.mubr.msk.f32.mxu1 %vm293_vm3, %v6319_v38  ;;  %4423 = vmatprep.mubr.msk.f32.mxu0 %vm293_vm3, %v5170_v0 }
  0xfd   : > { %4203 = vmatmul.mubr.msk.f32.vlgmr.msra.gmra.mrb[0].mxu1 %vm293_vm3, %v6320_v7  ;;  %4424 = vmatmul.mubr.msk.f32.gmra.mrb[14].mxu0 %vm293_vm3, %v5185_v9 }
  0xfe   : > { %4205 = vmatprep.mubr.msk.f32.mxu1 %vm293_vm3, %v5367_v14  ;;  %4426 = vmatprep.mubr.msk.f32.mxu0 %vm293_vm3, %v5191_v13  ;;  %v6321_v14 = vld [vmem:[#allocation16_spill] sm:$0xff] }
  0xff   : > { %4501 = vmatpush3.msk.msra.mxu1 %vm598_vm2, %v4767_v62 }
 0x101   : > { %4206 = vmatmul.mubr.msk.f32.gmra.mrb[2].mxu1 %vm293_vm3, %v5380_v24  ;;  %4427 = vmatmul.mubr.msk.f32.gmra.mrb[16].mxu0 %vm293_vm3, %v5206_v18  ;;  %v6322_v24 = vld [vmem:[#allocation17_spill] sm:$0xff] }
 0x102   : > { %4208 = vmatprep.mubr.msk.f32.mxu1 %vm293_vm3, %v5391_v16  ;;  %4429 = vmatprep.mubr.msk.f32.mxu0 %vm293_vm3, %v5213_v22  ;;  %v6323_v16 = vld [vmem:[#allocation18_spill] sm:$0xff] }
 0x105   : > { %4209 = vmatmul.mubr.msk.f32.gmra.mrb[4].mxu1 %vm293_vm3, %v5404_v15  ;;  %4430 = vmatmul.mubr.msk.f32.gmra.mrb[18].mxu0 %vm293_vm3, %v5231_v27  ;;  %v6324_v15 = vld [vmem:[#allocation20_spill] sm:$0xff] }
 0x106   : > { %4211 = vmatprep.mubr.msk.f32.mxu1 %vm293_vm3, %v5418_v42  ;;  %4432 = vmatprep.mubr.msk.f32.mxu0 %vm293_vm3, %v6321_v14  ;;  %v6325_v42 = vld [vmem:[#allocation39_spill] sm:$0xff] }
 0x109   : > { %4212 = vmatmul.mubr.msk.f32.gmra.mrb[6].mxu1 %vm293_vm3, %v5428_v35  ;;  %4433 = vmatmul.mubr.msk.f32.gmra.mrb[20].mxu0 %vm293_vm3, %v6322_v24 }
 0x10a   : > { %4214 = vmatprep.mubr.msk.f32.mxu1 %vm293_vm3, %v5439_v61  ;;  %4435 = vmatprep.mubr.msk.f32.mxu0 %vm293_vm3, %v6323_v16 }
 0x10d   : > { %4215 = vmatmul.mubr.msk.f32.gmra.mrb[8].mxu1 %vm293_vm3, %v5452_v36  ;;  %4436 = vmatmul.mubr.msk.f32.gmra.mrb[22].mxu0 %vm293_vm3, %v5271_v59 }
 0x10e   : > { %4217 = vmatprep.mubr.msk.f32.mxu1 %vm293_vm3, %v5466_v49  ;;  %4438 = vmatprep.mubr.msk.f32.mxu0 %vm293_vm3, %v6324_v15 }
 0x111   : > { %4218 = vmatmul.mubr.msk.f32.gmra.mrb[10].mxu1 %vm293_vm3, %v5480_v11  ;;  %4439 = vmatmul.mubr.msk.f32.gmra.mrb[24].mxu0 %vm293_vm3, %v5292_v21 }
 0x112   : > { %4220 = vmatprep.mubr.msk.f32.mxu1 %vm293_vm3, %v5490_v45  ;;  %4441 = vmatprep.mubr.msk.f32.mxu0 %vm293_vm3, %v5297_v26 }
 0x115   : > { %4221 = vmatmul.mubr.msk.f32.gmra.mrb[12].mxu1 %vm293_vm3, %v5508_v4  ;;  %4442 = vmatmul.mubr.msk.f32.gmra.mrb[26].mxu0 %vm293_vm3, %v5313_v56 }
 0x116   : > { %4223 = vmatprep.mubr.msk.f32.mxu1 %vm293_vm3, %v6325_v42  ;;  %4444 = vmatprep.mubr.msk.f32.mxu0 %vm293_vm3, %v5471_v53 }
 0x119   : > { %4224 = vmatmul.mubr.msk.f32.gmra.mrb[14].mxu1 %vm293_vm3, %v5530_v52  ;;  %4445 = vmatmul.mubr.msk.f32.gmra.mrb[28].mxu0 %vm293_vm3, %v5473_v8 }
 0x11a   : > { %4226 = vmatprep.mubr.msk.f32.mxu1 %vm293_vm3, %v5537_v29  ;;  %4447 = vmatprep.mubr.msk.f32.mxu0 %vm293_vm3, %v5712_v1 }
 0x11d   : > { %4227 = vmatmul.mubr.msk.f32.gmra.mrb[16].mxu1 %vm293_vm3, %v5549_v30  ;;  %4448 = vmatmul.mubr.msk.f32.gmra.mrb[30].mxu0 %vm293_vm3, %v5727_v19 }
 0x11e   : > { %4229 = vmatprep.mubr.msk.f32.mxu1 %vm293_vm3, %v5553_v63  ;;  %4452 = vmatprep.mubr.msk.f32.mxu0 %vm293_vm3, %v5196_v17  ;;  %v6326_v17 = vld [vmem:[#allocation42_spill] sm:$0xff] }
 0x121   : > { %4230 = vmatmul.mubr.msk.f32.gmra.mrb[18].mxu1 %vm293_vm3, %v5571_v55  ;;  %4453 = vmatmul.mubr.msk.f32.vlgmr.msra.gmra.mrb[0].mxu0 %vm293_vm3, %v5209_v20  ;;  %v6327_v20 = vld [vmem:[#allocation43_spill] sm:$0xff] }
 0x122   : > { %4232 = vmatprep.mubr.msk.f32.mxu1 %vm293_vm3, %v5577_v51  ;;  %4455 = vmatprep.mubr.msk.f32.mxu0 %vm293_vm3, %v5216_v23  ;;  %v6328_v23 = vld [vmem:[#allocation44_spill] sm:$0xff] }
 0x125   : > { %4233 = vmatmul.mubr.msk.f32.gmra.mrb[20].mxu1 %vm293_vm3, %v5591_v39  ;;  %4456 = vmatmul.mubr.msk.f32.gmra.mrb[2].mxu0 %vm293_vm3, %v5234_v28  ;;  %v6329_v28 = vld [vmem:[#allocation19_spill] sm:$0xff] }
 0x126   : > { %4235 = vmatprep.mubr.msk.f32.mxu1 %vm293_vm3, %v5595_v41  ;;  %4458 = vmatprep.mubr.msk.f32.mxu0 %vm293_vm3, %v5239_v37  ;;  %v6330_v37 = vld [vmem:[#allocation21_spill] sm:$0xff] }
 0x129   : > { %4236 = vmatmul.mubr.msk.f32.gmra.mrb[22].mxu1 %vm293_vm3, %v5607_v2  ;;  %4459 = vmatmul.mubr.msk.f32.gmra.mrb[4].mxu0 %vm293_vm3, %v5254_v44  ;;  %v6331_v44 = vld [vmem:[#allocation28_spill] sm:$0xff] }
 0x12a   : > { %4238 = vmatprep.mubr.msk.f32.mxu1 %vm293_vm3, %v5611_v12  ;;  %4461 = vmatprep.mubr.msk.f32.mxu0 %vm293_vm3, %v5259_v48  ;;  %v6332_v48 = vld [vmem:[#allocation29_spill] sm:$0xff] }
 0x12d   : > { %4239 = vmatmul.mubr.msk.f32.gmra.mrb[24].mxu1 %vm293_vm3, %v5623_v57  ;;  %4462 = vmatmul.mubr.msk.f32.gmra.mrb[6].mxu0 %vm293_vm3, %v6287_v10 }
 0x12e   : > { %4241 = vmatprep.mubr.msk.f32.mxu1 %vm293_vm3, %v5627_v40  ;;  %4464 = vmatprep.mubr.msk.f32.mxu0 %vm293_vm3, %v6288_v3 }
 0x131   : > { %4242 = vmatmul.mubr.msk.f32.gmra.mrb[26].mxu1 %vm293_vm3, %v6326_v17  ;;  %4465 = vmatmul.mubr.msk.f32.gmra.mrb[8].mxu0 %vm293_vm3, %v6290_v5 }
 0x132   : > { %4244 = vmatprep.mubr.msk.f32.mxu1 %vm293_vm3, %v6327_v20  ;;  %4467 = vmatprep.mubr.msk.f32.mxu0 %vm293_vm3, %v6291_v46 }
 0x135   : > { %4245 = vmatmul.mubr.msk.f32.gmra.mrb[28].mxu1 %vm293_vm3, %v6328_v23  ;;  %4468 = vmatmul.mubr.msk.f32.gmra.mrb[10].mxu0 %vm293_vm3, %v5316_v58  ;;  %v6333_v58 = vld [vmem:[#allocation30_spill] sm:$0xff] }
 0x136   : > { %4247 = vmatprep.mubr.msk.f32.mxu1 %vm293_vm3, %v6329_v28  ;;  %4470 = vmatprep.mubr.msk.f32.mxu0 %vm293_vm3, %v6293_v47 }
 0x139   : > { %4248 = vmatmul.mubr.msk.f32.gmra.mrb[30].mxu1 %vm293_vm3, %v6330_v37  ;;  %4471 = vmatmul.mubr.msk.f32.gmra.mrb[12].mxu0 %vm293_vm3, %v5335_v25  ;;  %v6339_v25 = vld [vmem:[#allocation41_spill] sm:$0xff] }
 0x13a   : > { %4276 = vmatprep.mubr.msk.f32.mxu1 %vm293_vm3, %v5170_v0  ;;  %4473 = vmatprep.mubr.msk.f32.mxu0 %vm293_vm3, %v6294_v50  ;;  %v6334_v0 = vld [vmem:[#allocation31_spill] sm:$0xff] }
 0x13d   : > { %4277 = vmatmul.mubr.msk.f32.vlgmr.msra.gmra.mrb[16].mxu1 %vm293_vm3, %v5185_v9  ;;  %4474 = vmatmul.mubr.msk.f32.gmra.mrb[14].mxu0 %vm293_vm3, %v6331_v44  ;;  %v6335_v9 = vld [vmem:[#allocation32_spill] sm:$0xff] }
 0x13e   : > { %4279 = vmatprep.mubr.msk.f32.mxu1 %vm293_vm3, %v5191_v13  ;;  %4476 = vmatprep.mubr.msk.f32.mxu0 %vm293_vm3, %v6332_v48  ;;  %v6336_v13 = vld [vmem:[#allocation33_spill] sm:$0xff] }
 0x141   : > { %4280 = vmatmul.mubr.msk.f32.gmra.mrb[18].mxu1 %vm293_vm3, %v5206_v18  ;;  %4477 = vmatmul.mubr.msk.f32.gmra.mrb[16].mxu0 %vm293_vm3, %v6333_v58  ;;  %v6337_v18 = vld [vmem:[#allocation34_spill] sm:$0xff] }
 0x142   : > { %4282 = vmatprep.mubr.msk.f32.mxu1 %vm293_vm3, %v5213_v22  ;;  %4479 = vmatprep.mubr.msk.f32.mxu0 %vm293_vm3, %v6334_v0  ;;  %v2881_v22 = vrot.slane %v5712_v1, 1 }
 0x145   : > { %4283 = vmatmul.mubr.msk.f32.gmra.mrb[20].mxu1 %vm293_vm3, %v5231_v27  ;;  %4480 = vmatmul.mubr.msk.f32.gmra.mrb[18].mxu0 %vm293_vm3, %v6335_v9  ;;  %v2882_v27 = vrot.slane %v5727_v19, 1 }
 0x146   : > { %4285 = vmatprep.mubr.msk.f32.mxu1 %vm293_vm3, %v6321_v14  ;;  %4482 = vmatprep.mubr.msk.f32.mxu0 %vm293_vm3, %v6336_v13 }
 0x149   : > { %4286 = vmatmul.mubr.msk.f32.gmra.mrb[22].mxu1 %vm293_vm3, %v6322_v24  ;;  %4483 = vmatmul.mubr.msk.f32.gmra.mrb[20].mxu0 %vm293_vm3, %v6337_v18 }
 0x14a   : > { %4288 = vmatprep.mubr.msk.f32.mxu1 %vm293_vm3, %v6323_v16  ;;  %4485 = vmatprep.mubr.msk.f32.mxu0 %vm293_vm3, %v6310_v33 }
 0x14d   : > { %4289 = vmatmul.mubr.msk.f32.gmra.mrb[24].mxu1 %vm293_vm3, %v5271_v59  ;;  %4486 = vmatmul.mubr.msk.f32.gmra.mrb[22].mxu0 %vm293_vm3, %v6312_v6  ;;  %v397_v59 = vld [vmem:[#allocation2 + $0x238] sm:$0x1] }
 0x14e   : > { %4291 = vmatprep.mubr.msk.f32.mxu1 %vm293_vm3, %v6324_v15  ;;  %4488 = vmatprep.mubr.msk.f32.mxu0 %vm293_vm3, %v6314_v43 }
 0x151   : > { %4292 = vmatmul.mubr.msk.f32.gmra.mrb[26].mxu1 %vm293_vm3, %v5292_v21  ;;  %4489 = vmatmul.mubr.msk.f32.gmra.mrb[24].mxu0 %vm293_vm3, %v6316_v34  ;;  %v6338_v21 = vld [vmem:[#allocation40_spill] sm:$0xff] }
 0x152   : > { %4294 = vmatprep.mubr.msk.f32.mxu1 %vm293_vm3, %v5297_v26  ;;  %4491 = vmatprep.mubr.msk.f32.mxu0 %vm293_vm3, %v5493_v54  ;;  %v2884_v26 = vrot.slane %v397_v59, 1  ;;  %v2883_v54 = vsel %vm1133_vm4, %v2881_v22, %v2882_v27 }
 0x155   : > { %4295 = vmatmul.mubr.msk.f32.gmra.mrb[28].mxu1 %vm293_vm3, %v5313_v56  ;;  %4492 = vmatmul.mubr.msk.f32.gmra.mrb[26].mxu0 %vm293_vm3, %v5511_v32  ;;  %v2885_v56 = vsel %vm1133_vm4, %v2882_v27, %v2884_v26 }
 0x156   : > { %4297 = vmatprep.mubr.msk.f32.mxu1 %vm293_vm3, %v5471_v53  ;;  %4494 = vmatprep.mubr.msk.f32.mxu0 %vm293_vm3, %v6338_v21 }
 0x159   : > { %4298 = vmatmul.mubr.msk.f32.gmra.mrb[30].mxu1 %vm293_vm3, %v5473_v8  ;;  %4495 = vmatmul.mubr.msk.f32.gmra.mrb[28].mxu0 %vm293_vm3, %v6339_v25 }
 0x15a   : > { %4497 = vmatprep.mubr.msk.f32.mxu0 %vm293_vm3, %v2883_v54 }
 0x15d   : > { %4498 = vmatmul.mubr.msk.f32.gmra.mrb[30].mxu0 %vm293_vm3, %v2885_v56 }
 0x1d0   : > { %v4204_v35 = vpop.f32.mrb[0].mxu1 }
 0x1d1   : > { %v1619_v53 = vpop.f32.mrb[1].mxu1 }
 0x1d4   : > { %v4207_v61 = vpop.f32.mrb[2].mxu1 }
 0x1d5   : > { %v1629_v36 = vpop.f32.mrb[3].mxu1 }
 0x1d8   : > { %v4210_v49 = vpop.f32.mrb[4].mxu1 }
 0x1d9   : > { %v1639_v11 = vpop.f32.mrb[5].mxu1 }
 0x1dc   : > { %v4213_v45 = vpop.f32.mrb[6].mxu1 }
 0x1dd   : > { %v1649_v4 = vpop.f32.mrb[7].mxu1 }
 0x1e0   : > { %v6013_v32 = vpop.f32.mrb[8].mxu1 }
 0x1e1   : > { %v6015_v8 = vpop.f32.mrb[9].mxu1 }
 0x1e4   : > { %v6017_v52 = vpop.f32.mrb[10].mxu1 }
 0x1e5   : > { %v6019_v29 = vpop.f32.mrb[11].mxu1 }
 0x1e8   : > { %v6021_v30 = vpop.f32.mrb[12].mxu1 }
 0x1e9   : > { %v6023_v63 = vpop.f32.mrb[13].mxu1 }
 0x1ec   : > { %v6025_v55 = vpop.f32.mrb[14].mxu1 }
 0x1ed   : > { %v6027_v51 = vpop.f32.mrb[15].mxu1 }
 0x1f4   : > { %v4454_v39 = vpop.f32.mrb[0].mxu0 }
 0x1f5   : > { %v4502_v41 = vadd.f32 %v4454_v39, %v4204_v35  ;;  %v2959_v2 = vpop.f32.mrb[1].mxu0 }
 0x1f6   : > { %v4503_v12 = vadd.f32 %v2959_v2, %v1619_v53 }
 0x1f7   : > { %v3151_v57 = vsel %vm293_vm3, %v4502_v41, 0.0  ;;  %v3220_v40 = vmul.f32 %v4502_v41, %v4502_v41  ;;  %3324 = vst.msk [vmem:[%s4813_s22 + $0x8] sm:$0xff] %vm293_vm3, %v4502_v41 }
 0x1f8   : > { %v3150_v46 = vsel %vm293_vm3, %v4503_v12, 0.0  ;;  %v3219_v47 = vmul.f32 %v4503_v12, %v4503_v12  ;;  %3323 = vst.msk [vmem:[%s4813_s22] sm:$0xff] %vm293_vm3, %v4503_v12  ;;  %v4457_v1 = vpop.f32.mrb[2].mxu0 }
 0x1f9   : > { %v3252_v10 = vsel %vm293_vm3, %v3220_v40, 0.0  ;;  %v3152_v3 = vadd.f32 %v3151_v57, %v3150_v46  ;;  %v4504_v19 = vadd.f32 %v4457_v1, %v4207_v61  ;;  %v2969_v5 = vpop.f32.mrb[3].mxu0 }
 0x1fa   : > { %v3251_v50 = vsel %vm293_vm3, %v3219_v47, 0.0  ;;  %v4505_v43 = vadd.f32 %v2969_v5, %v1629_v36 }
 0x1fb   : > { %v3253_v34 = vadd.f32 %v3252_v10, %v3251_v50  ;;  %3326 = vst.msk [vmem:[%s4813_s22 + $0x18] sm:$0xff] %vm293_vm3, %v4504_v19  ;;  %v3222_v33 = vmul.f32 %v4504_v19, %v4504_v19  ;;  %v3155_v14 = vsel %vm293_vm3, %v4504_v19, 0.0 }
 0x1fc   : > { %v3153_v6 = vsel %vm293_vm3, %v4505_v43, 0.0  ;;  %v3221_v60 = vmul.f32 %v4505_v43, %v4505_v43  ;;  %3325 = vst.msk [vmem:[%s4813_s22 + $0x10] sm:$0xff] %vm293_vm3, %v4505_v43  ;;  %v4460_v31 = vpop.f32.mrb[4].mxu0 }
 0x1fd   : > { %v3154_v38 = vadd.f32 %v3153_v6, %v3152_v3  ;;  %v4506_v7 = vadd.f32 %v4460_v31, %v4210_v49  ;;  %v2979_v62 = vpop.f32.mrb[5].mxu0  ;;  %v3256_v17 = vsel %vm293_vm3, %v3222_v33, 0.0 }
 0x1fe   : > { %v3254_v24 = vsel %vm293_vm3, %v3221_v60, 0.0  ;;  %v4507_v16 = vadd.f32 %v2979_v62, %v1639_v11 }
 0x1ff   : > { %v3255_v15 = vadd.f32 %v3254_v24, %v3253_v34  ;;  %3328 = vst.msk [vmem:[%s4813_s22 + $0x28] sm:$0xff] %vm293_vm3, %v4506_v7  ;;  %v3156_v42 = vadd.f32 %v3155_v14, %v3154_v38  ;;  %v3224_v20 = vmul.f32 %v4506_v7, %v4506_v7  ;;  %v3159_v9 = vsel %vm293_vm3, %v4506_v7, 0.0 }
 0x200   : > { %v3157_v23 = vsel %vm293_vm3, %v4507_v16, 0.0  ;;  %v3223_v28 = vmul.f32 %v4507_v16, %v4507_v16  ;;  %3327 = vst.msk [vmem:[%s4813_s22 + $0x20] sm:$0xff] %vm293_vm3, %v4507_v16  ;;  %v4463_v37 = vpop.f32.mrb[6].mxu0 }
 0x201   : > { %v3158_v44 = vadd.f32 %v3157_v23, %v3156_v42  ;;  %v3257_v48 = vadd.f32 %v3256_v17, %v3255_v15  ;;  %v4508_v58 = vadd.f32 %v4463_v37, %v4213_v45  ;;  %v2989_v0 = vpop.f32.mrb[7].mxu0  ;;  %v3260_v59 = vsel %vm293_vm3, %v3224_v20, 0.0 }
 0x202   : > { %v3258_v13 = vsel %vm293_vm3, %v3223_v28, 0.0  ;;  %v4509_v18 = vadd.f32 %v2989_v0, %v1649_v4 }
 0x203   : > { %v3259_v22 = vadd.f32 %v3258_v13, %v3257_v48  ;;  %3330 = vst.msk [vmem:[%s4813_s22 + $0x38] sm:$0xff] %vm293_vm3, %v4508_v58  ;;  %v3160_v27 = vadd.f32 %v3159_v9, %v3158_v44  ;;  %v3226_v21 = vmul.f32 %v4508_v58, %v4508_v58  ;;  %v3163_v36 = vsel %vm293_vm3, %v4508_v58, 0.0 }
 0x204   : > { %v3161_v26 = vsel %vm293_vm3, %v4509_v18, 0.0  ;;  %v3225_v54 = vmul.f32 %v4509_v18, %v4509_v18  ;;  %3329 = vst.msk [vmem:[%s4813_s22 + $0x30] sm:$0xff] %vm293_vm3, %v4509_v18  ;;  %v4466_v25 = vpop.f32.mrb[8].mxu0 }
 0x205   : > { %v3162_v56 = vadd.f32 %v3161_v26, %v3160_v27  ;;  %v3261_v35 = vadd.f32 %v3260_v59, %v3259_v22  ;;  %v4510_v53 = vadd.f32 %v4466_v25, %v6013_v32  ;;  %v2999_v61 = vpop.f32.mrb[9].mxu0  ;;  %v3264_v39 = vsel %vm293_vm3, %v3226_v21, 0.0 }
 0x206   : > { %v3262_v49 = vsel %vm293_vm3, %v3225_v54, 0.0  ;;  %v4511_v11 = vadd.f32 %v2999_v61, %v6015_v8 }
 0x207   : > { %v3263_v45 = vadd.f32 %v3262_v49, %v3261_v35  ;;  %3332 = vst.msk [vmem:[%s4813_s22 + $0x48] sm:$0xff] %vm293_vm3, %v4510_v53  ;;  %v3164_v4 = vadd.f32 %v3163_v36, %v3162_v56  ;;  %v3228_v41 = vmul.f32 %v4510_v53, %v4510_v53  ;;  %v3167_v47 = vsel %vm293_vm3, %v4510_v53, 0.0 }
 0x208   : > { %v3165_v2 = vsel %vm293_vm3, %v4511_v11, 0.0  ;;  %v3227_v12 = vmul.f32 %v4511_v11, %v4511_v11  ;;  %3331 = vst.msk [vmem:[%s4813_s22 + $0x40] sm:$0xff] %vm293_vm3, %v4511_v11  ;;  %v4469_v32 = vpop.f32.mrb[10].mxu0 }
 0x209   : > { %v3166_v57 = vadd.f32 %v3165_v2, %v3164_v4  ;;  %v3265_v40 = vadd.f32 %v3264_v39, %v3263_v45  ;;  %v4512_v46 = vadd.f32 %v4469_v32, %v6017_v52  ;;  %v3009_v8 = vpop.f32.mrb[11].mxu0  ;;  %v3268_v5 = vsel %vm293_vm3, %v3228_v41, 0.0 }
 0x20a   : > { %v3266_v1 = vsel %vm293_vm3, %v3227_v12, 0.0  ;;  %v4513_v10 = vadd.f32 %v3009_v8, %v6019_v29 }
 0x20b   : > { %v3267_v3 = vadd.f32 %v3266_v1, %v3265_v40  ;;  %3334 = vst.msk [vmem:[%s4813_s22 + $0x58] sm:$0xff] %vm293_vm3, %v4512_v46  ;;  %v3168_v19 = vadd.f32 %v3167_v47, %v3166_v57  ;;  %v3230_v50 = vmul.f32 %v4512_v46, %v4512_v46  ;;  %v3171_v31 = vsel %vm293_vm3, %v4512_v46, 0.0 }
 0x20c   : > { %v3169_v43 = vsel %vm293_vm3, %v4513_v10, 0.0  ;;  %v3229_v34 = vmul.f32 %v4513_v10, %v4513_v10  ;;  %3333 = vst.msk [vmem:[%s4813_s22 + $0x50] sm:$0xff] %vm293_vm3, %v4513_v10  ;;  %v4472_v52 = vpop.f32.mrb[12].mxu0 }
 0x20d   : > { %v3170_v33 = vadd.f32 %v3169_v43, %v3168_v19  ;;  %v3269_v6 = vadd.f32 %v3268_v5, %v3267_v3  ;;  %v4514_v60 = vadd.f32 %v4472_v52, %v6021_v30  ;;  %v3019_v29 = vpop.f32.mrb[13].mxu0  ;;  %v3272_v24 = vsel %vm293_vm3, %v3230_v50, 0.0 }
 0x20e   : > { %v3270_v38 = vsel %vm293_vm3, %v3229_v34, 0.0  ;;  %v4515_v7 = vadd.f32 %v3019_v29, %v6023_v63 }
 0x20f   : > { %v3271_v62 = vadd.f32 %v3270_v38, %v3269_v6  ;;  %3336 = vst.msk [vmem:[%s4813_s22 + $0x68] sm:$0xff] %vm293_vm3, %v4514_v60  ;;  %v3172_v14 = vadd.f32 %v3171_v31, %v3170_v33  ;;  %v3232_v16 = vmul.f32 %v4514_v60, %v4514_v60  ;;  %v3175_v44 = vsel %vm293_vm3, %v4514_v60, 0.0 }
 0x210   : > { %v3173_v15 = vsel %vm293_vm3, %v4515_v7, 0.0  ;;  %v3231_v42 = vmul.f32 %v4515_v7, %v4515_v7  ;;  %3335 = vst.msk [vmem:[%s4813_s22 + $0x60] sm:$0xff] %vm293_vm3, %v4515_v7  ;;  %v4278_v30 = vpop.f32.mrb[16].mxu1  ;;  %v4475_v17 = vpop.f32.mrb[14].mxu0 }
 0x211   : > { %v3174_v20 = vadd.f32 %v3173_v15, %v3172_v14  ;;  %v3273_v23 = vadd.f32 %v3272_v24, %v3271_v62  ;;  %v4516_v63 = vadd.f32 %v4475_v17, %v6025_v55  ;;  %v1963_v28 = vpop.f32.mrb[17].mxu1  ;;  %v3029_v37 = vpop.f32.mrb[15].mxu0  ;;  %v3276_v13 = vsel %vm293_vm3, %v3232_v16, 0.0 }
 0x212   : > { %v3274_v48 = vsel %vm293_vm3, %v3231_v42, 0.0  ;;  %v4517_v58 = vadd.f32 %v3029_v37, %v6027_v51 }
 0x213   : > { %v3275_v0 = vadd.f32 %v3274_v48, %v3273_v23  ;;  %3338 = vst.msk [vmem:[%s4813_s22 + $0x78] sm:$0xff] %vm293_vm3, %v4516_v63  ;;  %v3176_v9 = vadd.f32 %v3175_v44, %v3174_v20  ;;  %v3234_v18 = vmul.f32 %v4516_v63, %v4516_v63  ;;  %v3179_v56 = vsel %vm293_vm3, %v4516_v63, 0.0 }
 0x214   : > { %v3177_v22 = vsel %vm293_vm3, %v4517_v58, 0.0  ;;  %v3233_v27 = vmul.f32 %v4517_v58, %v4517_v58  ;;  %3337 = vst.msk [vmem:[%s4813_s22 + $0x70] sm:$0xff] %vm293_vm3, %v4517_v58  ;;  %v4281_v55 = vpop.f32.mrb[18].mxu1  ;;  %v4478_v59 = vpop.f32.mrb[16].mxu0 }
 0x215   : > { %v3178_v21 = vadd.f32 %v3177_v22, %v3176_v9  ;;  %v3277_v26 = vadd.f32 %v3276_v13, %v3275_v0  ;;  %v4518_v54 = vadd.f32 %v4478_v59, %v4278_v30  ;;  %v1973_v51 = vpop.f32.mrb[19].mxu1  ;;  %v3039_v25 = vpop.f32.mrb[17].mxu0  ;;  %v3280_v49 = vsel %vm293_vm3, %v3234_v18, 0.0 }
 0x216   : > { %v3278_v35 = vsel %vm293_vm3, %v3233_v27, 0.0  ;;  %v4519_v53 = vadd.f32 %v3039_v25, %v1963_v28 }
 0x217   : > { %v3279_v61 = vadd.f32 %v3278_v35, %v3277_v26  ;;  %3340 = vst.msk [vmem:[%s4813_s22 + $0x88] sm:$0xff] %vm293_vm3, %v4518_v54  ;;  %v3180_v36 = vadd.f32 %v3179_v56, %v3178_v21  ;;  %v3236_v11 = vmul.f32 %v4518_v54, %v4518_v54  ;;  %v3183_v46 = vsel %vm293_vm3, %v4518_v54, 0.0 }
 0x218   : > { %v3181_v45 = vsel %vm293_vm3, %v4519_v53, 0.0  ;;  %v3235_v4 = vmul.f32 %v4519_v53, %v4519_v53  ;;  %3339 = vst.msk [vmem:[%s4813_s22 + $0x80] sm:$0xff] %vm293_vm3, %v4519_v53  ;;  %v4284_v39 = vpop.f32.mrb[20].mxu1  ;;  %v4481_v41 = vpop.f32.mrb[18].mxu0 }
 0x219   : > { %v3182_v2 = vadd.f32 %v3181_v45, %v3180_v36  ;;  %v3281_v12 = vadd.f32 %v3280_v49, %v3279_v61  ;;  %v4520_v32 = vadd.f32 %v4481_v41, %v4281_v55  ;;  %v1983_v57 = vpop.f32.mrb[21].mxu1  ;;  %v3049_v40 = vpop.f32.mrb[19].mxu0  ;;  %v3284_v3 = vsel %vm293_vm3, %v3236_v11, 0.0 }
 0x21a   : > { %v3282_v8 = vsel %vm293_vm3, %v3235_v4, 0.0  ;;  %v4521_v47 = vadd.f32 %v3049_v40, %v1973_v51 }
 0x21b   : > { %v3283_v1 = vadd.f32 %v3282_v8, %v3281_v12  ;;  %3342 = vst.msk [vmem:[%s4813_s22 + $0x98] sm:$0xff] %vm293_vm3, %v4520_v32  ;;  %v3184_v10 = vadd.f32 %v3183_v46, %v3182_v2  ;;  %v3238_v19 = vmul.f32 %v4520_v32, %v4520_v32  ;;  %v3187_v31 = vsel %vm293_vm3, %v4520_v32, 0.0 }
 0x21c   : > { %v3185_v5 = vsel %vm293_vm3, %v4521_v47, 0.0  ;;  %v3237_v50 = vmul.f32 %v4521_v47, %v4521_v47  ;;  %3341 = vst.msk [vmem:[%s4813_s22 + $0x90] sm:$0xff] %vm293_vm3, %v4521_v47  ;;  %v4287_v43 = vpop.f32.mrb[22].mxu1  ;;  %v4484_v34 = vpop.f32.mrb[20].mxu0 }
 0x21d   : > { %v3186_v52 = vadd.f32 %v3185_v5, %v3184_v10  ;;  %v3285_v33 = vadd.f32 %v3284_v3, %v3283_v1  ;;  %v4522_v6 = vadd.f32 %v4484_v34, %v4284_v39  ;;  %v1993_v60 = vpop.f32.mrb[23].mxu1  ;;  %v3059_v29 = vpop.f32.mrb[21].mxu0  ;;  %v3288_v24 = vsel %vm293_vm3, %v3238_v19, 0.0 }
 0x21e   : > { %v3286_v38 = vsel %vm293_vm3, %v3237_v50, 0.0  ;;  %v4523_v7 = vadd.f32 %v3059_v29, %v1983_v57 }
 0x21f   : > { %v3287_v62 = vadd.f32 %v3286_v38, %v3285_v33  ;;  %3344 = vst.msk [vmem:[%s4813_s22 + $0xa8] sm:$0xff] %vm293_vm3, %v4522_v6  ;;  %v3188_v14 = vadd.f32 %v3187_v31, %v3186_v52  ;;  %v3240_v16 = vmul.f32 %v4522_v6, %v4522_v6  ;;  %v3191_v44 = vsel %vm293_vm3, %v4522_v6, 0.0 }
 0x220   : > { %v3189_v15 = vsel %vm293_vm3, %v4523_v7, 0.0  ;;  %v3239_v42 = vmul.f32 %v4523_v7, %v4523_v7  ;;  %3343 = vst.msk [vmem:[%s4813_s22 + $0xa0] sm:$0xff] %vm293_vm3, %v4523_v7  ;;  %v4290_v30 = vpop.f32.mrb[24].mxu1  ;;  %v4487_v17 = vpop.f32.mrb[22].mxu0 }
 0x221   : > { %v3190_v20 = vadd.f32 %v3189_v15, %v3188_v14  ;;  %v3289_v23 = vadd.f32 %v3288_v24, %v3287_v62  ;;  %v4524_v63 = vadd.f32 %v4487_v17, %v4287_v43  ;;  %v2003_v28 = vpop.f32.mrb[25].mxu1  ;;  %v3069_v37 = vpop.f32.mrb[23].mxu0  ;;  %v3292_v13 = vsel %vm293_vm3, %v3240_v16, 0.0 }
 0x222   : > { %v3290_v48 = vsel %vm293_vm3, %v3239_v42, 0.0  ;;  %v4525_v58 = vadd.f32 %v3069_v37, %v1993_v60 }
 0x223   : > { %v3291_v0 = vadd.f32 %v3290_v48, %v3289_v23  ;;  %3346 = vst.msk [vmem:[%s4813_s22 + $0xb8] sm:$0xff] %vm293_vm3, %v4524_v63  ;;  %v3192_v9 = vadd.f32 %v3191_v44, %v3190_v20  ;;  %v3242_v18 = vmul.f32 %v4524_v63, %v4524_v63  ;;  %v3195_v56 = vsel %vm293_vm3, %v4524_v63, 0.0 }
 0x224   : > { %v3193_v22 = vsel %vm293_vm3, %v4525_v58, 0.0  ;;  %v3241_v27 = vmul.f32 %v4525_v58, %v4525_v58  ;;  %3345 = vst.msk [vmem:[%s4813_s22 + $0xb0] sm:$0xff] %vm293_vm3, %v4525_v58  ;;  %v4293_v55 = vpop.f32.mrb[26].mxu1  ;;  %v4490_v59 = vpop.f32.mrb[24].mxu0 }
 0x225   : > { %v3194_v21 = vadd.f32 %v3193_v22, %v3192_v9  ;;  %v3293_v26 = vadd.f32 %v3292_v13, %v3291_v0  ;;  %v4526_v54 = vadd.f32 %v4490_v59, %v4290_v30  ;;  %v2013_v51 = vpop.f32.mrb[27].mxu1  ;;  %v3079_v25 = vpop.f32.mrb[25].mxu0  ;;  %v3296_v49 = vsel %vm293_vm3, %v3242_v18, 0.0 }
 0x226   : > { %v3294_v35 = vsel %vm293_vm3, %v3241_v27, 0.0  ;;  %v4527_v53 = vadd.f32 %v3079_v25, %v2003_v28 }
 0x227   : > { %v3295_v61 = vadd.f32 %v3294_v35, %v3293_v26  ;;  %3348 = vst.msk [vmem:[%s4813_s22 + $0xc8] sm:$0xff] %vm293_vm3, %v4526_v54  ;;  %v3196_v36 = vadd.f32 %v3195_v56, %v3194_v21  ;;  %v3244_v11 = vmul.f32 %v4526_v54, %v4526_v54  ;;  %v3199_v46 = vsel %vm293_vm3, %v4526_v54, 0.0 }
 0x228   : > { %v3197_v45 = vsel %vm293_vm3, %v4527_v53, 0.0  ;;  %v3243_v4 = vmul.f32 %v4527_v53, %v4527_v53  ;;  %3347 = vst.msk [vmem:[%s4813_s22 + $0xc0] sm:$0xff] %vm293_vm3, %v4527_v53  ;;  %v4296_v39 = vpop.f32.mrb[28].mxu1  ;;  %v4493_v41 = vpop.f32.mrb[26].mxu0 }
 0x229   : > { %v3198_v2 = vadd.f32 %v3197_v45, %v3196_v36  ;;  %v3297_v12 = vadd.f32 %v3296_v49, %v3295_v61  ;;  %v4528_v32 = vadd.f32 %v4493_v41, %v4293_v55  ;;  %v2023_v57 = vpop.f32.mrb[29].mxu1  ;;  %v3089_v40 = vpop.f32.mrb[27].mxu0  ;;  %v3300_v3 = vsel %vm293_vm3, %v3244_v11, 0.0 }
 0x22a   : > { %v3298_v8 = vsel %vm293_vm3, %v3243_v4, 0.0  ;;  %v4529_v47 = vadd.f32 %v3089_v40, %v2013_v51 }
 0x22b   : > { %v3299_v1 = vadd.f32 %v3298_v8, %v3297_v12  ;;  %3350 = vst.msk [vmem:[%s4813_s22 + $0xd8] sm:$0xff] %vm293_vm3, %v4528_v32  ;;  %v3200_v10 = vadd.f32 %v3199_v46, %v3198_v2  ;;  %v3246_v19 = vmul.f32 %v4528_v32, %v4528_v32  ;;  %v3203_v31 = vsel %vm293_vm3, %v4528_v32, 0.0 }
 0x22c   : > { %v3201_v5 = vsel %vm293_vm3, %v4529_v47, 0.0  ;;  %v3245_v50 = vmul.f32 %v4529_v47, %v4529_v47  ;;  %3349 = vst.msk [vmem:[%s4813_s22 + $0xd0] sm:$0xff] %vm293_vm3, %v4529_v47  ;;  %v4299_v43 = vpop.f32.mrb[30].mxu1  ;;  %v4496_v34 = vpop.f32.mrb[28].mxu0 }
 0x22d   : > { %v3202_v52 = vadd.f32 %v3201_v5, %v3200_v10  ;;  %v3301_v33 = vadd.f32 %v3300_v3, %v3299_v1  ;;  %v4530_v6 = vadd.f32 %v4496_v34, %v4296_v39  ;;  %v2033_v60 = vpop.f32.mrb[31].mxu1  ;;  %v3099_v29 = vpop.f32.mrb[29].mxu0  ;;  %v3304_v24 = vsel %vm293_vm3, %v3246_v19, 0.0 }
 0x22e   : > { %v3302_v38 = vsel %vm293_vm3, %v3245_v50, 0.0  ;;  %v4531_v7 = vadd.f32 %v3099_v29, %v2023_v57 }
 0x22f   : > { %v3303_v62 = vadd.f32 %v3302_v38, %v3301_v33  ;;  %3352 = vst.msk [vmem:[%s4813_s22 + $0xe8] sm:$0xff] %vm293_vm3, %v4530_v6  ;;  %v3204_v14 = vadd.f32 %v3203_v31, %v3202_v52  ;;  %v3248_v16 = vmul.f32 %v4530_v6, %v4530_v6  ;;  %v3207_v28 = vsel %vm293_vm3, %v4530_v6, 0.0 }
 0x230   : > { %v3205_v15 = vsel %vm293_vm3, %v4531_v7, 0.0  ;;  %v3247_v42 = vmul.f32 %v4531_v7, %v4531_v7  ;;  %3351 = vst.msk [vmem:[%s4813_s22 + $0xe0] sm:$0xff] %vm293_vm3, %v4531_v7  ;;  %v4499_v30 = vpop.f32.mrb[30].mxu0 }
 0x231   : > { %v3206_v17 = vadd.f32 %v3205_v15, %v3204_v14  ;;  %v3305_v20 = vadd.f32 %v3304_v24, %v3303_v62  ;;  %v4532_v23 = vadd.f32 %v4499_v30, %v4299_v43  ;;  %v3109_v63 = vpop.f32.mrb[31].mxu0  ;;  %v3308_v0 = vsel %vm293_vm3, %v3248_v16, 0.0 }
 0x232   : > { %v3306_v37 = vsel %vm293_vm3, %v3247_v42, 0.0  ;;  %v4533_v44 = vadd.f32 %v3109_v63, %v2033_v60 }
 0x233   : > { %v3307_v48 = vadd.f32 %v3306_v37, %v3305_v20  ;;  %3354 = vst.msk [vmem:[%s4813_s22 + $0xf8] sm:$0xff] %vm293_vm3, %v4532_v23  ;;  %v3208_v58 = vadd.f32 %v3207_v28, %v3206_v17  ;;  %v3250_v9 = vmul.f32 %v4532_v23, %v4532_v23  ;;  %v3211_v55 = vsel %vm293_vm3, %v4532_v23, 0.0 }
 0x234   : > { %v3209_v13 = vsel %vm293_vm3, %v4533_v44, 0.0  ;;  %v3249_v18 = vmul.f32 %v4533_v44, %v4533_v44  ;;  %3353 = vst.msk [vmem:[%s4813_s22 + $0xf0] sm:$0xff] %vm293_vm3, %v4533_v44 }
 0x235   : > { %v3210_v22 = vadd.f32 %v3209_v13, %v3208_v58  ;;  %v3309_v27 = vadd.f32 %v3308_v0, %v3307_v48  ;;  %v3312_v54 = vsel %vm293_vm3, %v3250_v9, 0.0 }
 0x236   : > { %v3310_v59 = vsel %vm293_vm3, %v3249_v18, 0.0 }
 0x237   : > { %v3212_v21 = vadd.f32 %v3211_v55, %v3210_v22  ;;  %v3311_v26 = vadd.f32 %v3310_v59, %v3309_v27 }
 0x239   : > { %v3213_v51 = vrot.slane %v3212_v21, 4  ;;  %v3313_v25 = vadd.f32 %v3312_v54, %v3311_v26 }
 0x23b   : > { %v3214_v56 = vadd.f32 %v3213_v51, %v3212_v21  ;;  %v3314_v35 = vrot.slane %v3313_v25, 4 }
 0x23d   : > { %v3215_v53 = vrot.slane %v3214_v56, 2  ;;  %v3315_v61 = vadd.f32 %v3314_v35, %v3313_v25 }
 0x23f   : > { %v3216_v36 = vadd.f32 %v3215_v53, %v3214_v56  ;;  %v3316_v49 = vrot.slane %v3315_v61, 2 }
 0x241   : > { %v3217_v11 = vrot.slane %v3216_v36, 1  ;;  %v3317_v45 = vadd.f32 %v3316_v49, %v3315_v61 }
 0x243   : > { %v3318_v4 = vrot.slane %v3317_v45, 1  ;;  %v3218_v39 = vadd.f32 %v3217_v11, %v3216_v36 }
 0x245   : > { %v3319_v41 = vadd.f32 %v3318_v4, %v3317_v45 }
 0x247   : > { %v3320_v2 = vsel %vm451_vm5, %v3218_v39, %v3319_v41 }
 0x248   : > { %3322 = vst.msk [vmem:[%s4818_s25] sm:$0x3] %vm3321_vm6, %v3320_v2 }
 0x249 PF: > { %s14_s12 = sadd.s32 1, %s4774_s12  }
 0x24a   : > { %p11_p5 = scmp.ge.s32.totalorder %s14_s12, 4  }
 0x24c   :  { %13 = sbr.rel (!%p11_p5) target bundleno = 1 (0x1), region = 75 }

// kernel: basic_block_forward.3
= control target key start
LH: loop header
LB: loop body
LE: loop exit
PB: predicated region body
PF: predicated region fallthrough
CT: control target
= control target key end

     0   :  { %s4973_s18 = smov 0   ;;  %s6434_s0 = inlined_call_operand.vmem [shape: f32[2,256,4], index: 0, kind: input, shape index: {}]   ;;  %s6435_s1 = inlined_call_operand.vmem [shape: f32[1,4], index: 1, kind: input, shape index: {}]   ;;  %s6436_s2 = inlined_call_operand.vmem [shape: f32[1,4], index: 2, kind: input, shape index: {}]   ;;  %s6437_s3 = inlined_call_operand.vmem [shape: f32[36,4], index: 3, kind: input, shape index: {}]   ;;  %s6438_s4 = inlined_call_operand.vmem [shape: f32[2,256,4], index: 4, kind: output, shape index: {0}]   ;;  %s6439_s5 = inlined_call_operand.vmem [shape: f32[2,2,4], index: 5, kind: output, shape index: {1}]  }
   0x1 LB: > { %s3605_s19 = sadd.s32 4294967295, %s4940_s18   ;;  %p3609_p0 = scmp.ge.s32.totalorder %s4940_s18, 1  ;;  %s4940_s18 = sphi %s4973_s18, %s16_s18  }
   0x2   : > { %p190_p1 = scmp.lt.s32.totalorder %s4940_s18, 3 }
   0x4   : > { %p191_p2 = pnand %p3609_p0, %p190_p1 }
   0x6   : > { %194 = sbr.rel (%p191_p2) target bundleno = 590 (0x24e), region = 36 }
   0xd   : > { %p222_p3 = scmp.lt.s32.totalorder %s3605_s19, 1  ;;  %p3615_p4 = scmp.ne.s32.totalorder %s3605_s19, 0 }
   0xe   : > { %vm240_vm0 = vcmask (!%p3615_p4), 31744   ;;  %vm244_vm1 = vcmask (!%p3615_p4), 24576   ;;  %v4942_v0 = vmov (!%p3615_p4), 0.0  }
   0xf   : > { %s223_s20 = scalar_select %p222_p3, %s3605_s19, 1 }
  0x10   : > { %239 = sbr.rel (%p3615_p4) target bundleno = 52 (0x34), region = 40  ;;  %241 = vst.msk [vmem:[#allocation2] sm:$0xff] (!%p3615_p4), %vm240_vm0, %v4942_v0  ;;  %242 = vst.msk [vmem:[#allocation2 + $0x8] sm:$0xff] (!%p3615_p4), %vm240_vm0, %v4942_v0 }
  0x11   : > { %s3917_s21 = sshll.u32 %s223_s20, 8  ;;  %s3614_s22 = sshll.u32 %s223_s20, 1  ;;  %243 = vst.msk [vmem:[#allocation2 + $0x10] sm:$0xff] (!%p3615_p4), %vm240_vm0, %v4942_v0  ;;  %246 = vst.msk [vmem:[#allocation2 + $0x20] sm:$0xff] (!%p3615_p4), %vm240_vm0, %v4942_v0 }
  0x12   : > { %s4984_s25 = scalar_lea.vmem %s6434_s0, %s3917_s21  ;;  %s4989_s28 = scalar_lea.vmem %s6438_s4, %s3917_s21  ;;  %247 = vst.msk [vmem:[#allocation2 + $0x28] sm:$0xff] (!%p3615_p4), %vm240_vm0, %v4942_v0  ;;  %248 = vst.msk [vmem:[#allocation2 + $0x30] sm:$0xff] (!%p3615_p4), %vm240_vm0, %v4942_v0 }
  0x13   : > { %s4994_s6 = scalar_lea.vmem %s6439_s5, %s3614_s22  ;;  %250 = vst.msk [vmem:[#allocation2 + $0x40] sm:$0xff] (!%p3615_p4), %vm240_vm0, %v4942_v0  ;;  %251 = vst.msk [vmem:[#allocation2 + $0x48] sm:$0xff] (!%p3615_p4), %vm240_vm0, %v4942_v0 }
  0x14   : > { %252 = vst.msk [vmem:[#allocation2 + $0x50] sm:$0xff] (!%p3615_p4), %vm240_vm0, %v4942_v0  ;;  %254 = vst.msk [vmem:[#allocation2 + $0x60] sm:$0xff] (!%p3615_p4), %vm240_vm0, %v4942_v0 }
  0x15   : > { %255 = vst.msk [vmem:[#allocation2 + $0x68] sm:$0xff] (!%p3615_p4), %vm240_vm0, %v4942_v0  ;;  %256 = vst.msk [vmem:[#allocation2 + $0x70] sm:$0xff] (!%p3615_p4), %vm240_vm0, %v4942_v0 }
  0x16   : > { %258 = vst.msk [vmem:[#allocation2 + $0x80] sm:$0xff] (!%p3615_p4), %vm240_vm0, %v4942_v0  ;;  %259 = vst.msk [vmem:[#allocation2 + $0x88] sm:$0xff] (!%p3615_p4), %vm240_vm0, %v4942_v0 }
  0x17   : > { %260 = vst.msk [vmem:[#allocation2 + $0x90] sm:$0xff] %vm240_vm0, %v4942_v0  ;;  %262 = vst.msk [vmem:[#allocation2 + $0xa0] sm:$0xff] %vm240_vm0, %v4942_v0 }
  0x18   : > { %263 = vst.msk [vmem:[#allocation2 + $0xa8] sm:$0xff] %vm240_vm0, %v4942_v0  ;;  %264 = vst.msk [vmem:[#allocation2 + $0xb0] sm:$0xff] %vm240_vm0, %v4942_v0 }
  0x19   : > { %266 = vst.msk [vmem:[#allocation2 + $0xc0] sm:$0xff] %vm240_vm0, %v4942_v0  ;;  %267 = vst.msk [vmem:[#allocation2 + $0xc8] sm:$0xff] %vm240_vm0, %v4942_v0 }
  0x1a   : > { %268 = vst.msk [vmem:[#allocation2 + $0xd0] sm:$0xff] %vm240_vm0, %v4942_v0  ;;  %270 = vst.msk [vmem:[#allocation2 + $0xe0] sm:$0xff] %vm240_vm0, %v4942_v0 }
  0x1b   : > { %271 = vst.msk [vmem:[#allocation2 + $0xe8] sm:$0xff] %vm240_vm0, %v4942_v0  ;;  %272 = vst.msk [vmem:[#allocation2 + $0xf0] sm:$0xff] %vm240_vm0, %v4942_v0 }
  0x1c   : > { %274 = vst.msk [vmem:[#allocation2 + $0x100] sm:$0xff] %vm240_vm0, %v4942_v0  ;;  %275 = vst.msk [vmem:[#allocation2 + $0x108] sm:$0xff] %vm240_vm0, %v4942_v0 }
  0x1d   : > { %276 = vst.msk [vmem:[#allocation2 + $0x110] sm:$0xff] %vm240_vm0, %v4942_v0  ;;  %278 = vst.msk [vmem:[#allocation2 + $0x120] sm:$0xff] %vm240_vm0, %v4942_v0 }
  0x1e   : > { %279 = vst.msk [vmem:[#allocation2 + $0x128] sm:$0xff] %vm240_vm0, %v4942_v0  ;;  %280 = vst.msk [vmem:[#allocation2 + $0x130] sm:$0xff] %vm240_vm0, %v4942_v0 }
  0x1f   : > { %282 = vst.msk [vmem:[#allocation2 + $0x140] sm:$0xff] %vm240_vm0, %v4942_v0  ;;  %283 = vst.msk [vmem:[#allocation2 + $0x148] sm:$0xff] %vm240_vm0, %v4942_v0 }
  0x20   : > { %284 = vst.msk [vmem:[#allocation2 + $0x150] sm:$0xff] %vm240_vm0, %v4942_v0  ;;  %286 = vst.msk [vmem:[#allocation2 + $0x160] sm:$0xff] %vm240_vm0, %v4942_v0 }
  0x21   : > { %287 = vst.msk [vmem:[#allocation2 + $0x168] sm:$0xff] %vm240_vm0, %v4942_v0  ;;  %288 = vst.msk [vmem:[#allocation2 + $0x170] sm:$0xff] %vm240_vm0, %v4942_v0 }
  0x22   : > { %290 = vst.msk [vmem:[#allocation2 + $0x180] sm:$0xff] %vm240_vm0, %v4942_v0  ;;  %291 = vst.msk [vmem:[#allocation2 + $0x188] sm:$0xff] %vm240_vm0, %v4942_v0 }
  0x23   : > { %292 = vst.msk [vmem:[#allocation2 + $0x190] sm:$0xff] %vm240_vm0, %v4942_v0  ;;  %294 = vst.msk [vmem:[#allocation2 + $0x1a0] sm:$0xff] %vm240_vm0, %v4942_v0 }
  0x24   : > { %295 = vst.msk [vmem:[#allocation2 + $0x1a8] sm:$0xff] %vm240_vm0, %v4942_v0  ;;  %296 = vst.msk [vmem:[#allocation2 + $0x1b0] sm:$0xff] %vm240_vm0, %v4942_v0 }
  0x25   : > { %298 = vst.msk [vmem:[#allocation2 + $0x1c0] sm:$0xff] %vm240_vm0, %v4942_v0  ;;  %299 = vst.msk [vmem:[#allocation2 + $0x1c8] sm:$0xff] %vm240_vm0, %v4942_v0 }
  0x26   : > { %300 = vst.msk [vmem:[#allocation2 + $0x1d0] sm:$0xff] %vm240_vm0, %v4942_v0  ;;  %302 = vst.msk [vmem:[#allocation2 + $0x1e0] sm:$0xff] %vm240_vm0, %v4942_v0 }
  0x27   : > { %303 = vst.msk [vmem:[#allocation2 + $0x1e8] sm:$0xff] %vm240_vm0, %v4942_v0  ;;  %304 = vst.msk [vmem:[#allocation2 + $0x1f0] sm:$0xff] %vm240_vm0, %v4942_v0 }
  0x28   : > { %306 = vst.msk [vmem:[#allocation2 + $0x200] sm:$0xff] %vm240_vm0, %v4942_v0  ;;  %307 = vst.msk [vmem:[#allocation2 + $0x208] sm:$0xff] %vm240_vm0, %v4942_v0 }
  0x29   : > { %308 = vst.msk [vmem:[#allocation2 + $0x210] sm:$0xff] %vm240_vm0, %v4942_v0  ;;  %310 = vst.msk [vmem:[#allocation2 + $0x220] sm:$0xff] %vm240_vm0, %v4942_v0 }
  0x2a   : > { %311 = vst.msk [vmem:[#allocation2 + $0x228] sm:$0xff] %vm240_vm0, %v4942_v0  ;;  %312 = vst.msk [vmem:[#allocation2 + $0x230] sm:$0xff] %vm240_vm0, %v4942_v0 }
  0x2b   : > { %245 = vst.msk [vmem:[#allocation2 + $0x18] sm:$0x1] %vm244_vm1, %v4942_v0  ;;  %249 = vst.msk [vmem:[#allocation2 + $0x38] sm:$0x1] %vm244_vm1, %v4942_v0 }
  0x2c   : > { %253 = vst.msk [vmem:[#allocation2 + $0x58] sm:$0x1] %vm244_vm1, %v4942_v0  ;;  %257 = vst.msk [vmem:[#allocation2 + $0x78] sm:$0x1] %vm244_vm1, %v4942_v0 }
  0x2d   : > { %261 = vst.msk [vmem:[#allocation2 + $0x98] sm:$0x1] %vm244_vm1, %v4942_v0  ;;  %265 = vst.msk [vmem:[#allocation2 + $0xb8] sm:$0x1] %vm244_vm1, %v4942_v0 }
  0x2e   : > { %269 = vst.msk [vmem:[#allocation2 + $0xd8] sm:$0x1] %vm244_vm1, %v4942_v0  ;;  %273 = vst.msk [vmem:[#allocation2 + $0xf8] sm:$0x1] %vm244_vm1, %v4942_v0 }
  0x2f   : > { %277 = vst.msk [vmem:[#allocation2 + $0x118] sm:$0x1] %vm244_vm1, %v4942_v0  ;;  %281 = vst.msk [vmem:[#allocation2 + $0x138] sm:$0x1] %vm244_vm1, %v4942_v0 }
  0x30   : > { %285 = vst.msk [vmem:[#allocation2 + $0x158] sm:$0x1] %vm244_vm1, %v4942_v0  ;;  %289 = vst.msk [vmem:[#allocation2 + $0x178] sm:$0x1] %vm244_vm1, %v4942_v0 }
  0x31   : > { %293 = vst.msk [vmem:[#allocation2 + $0x198] sm:$0x1] %vm244_vm1, %v4942_v0  ;;  %297 = vst.msk [vmem:[#allocation2 + $0x1b8] sm:$0x1] %vm244_vm1, %v4942_v0 }
  0x32   : > { %301 = vst.msk [vmem:[#allocation2 + $0x1d8] sm:$0x1] %vm244_vm1, %v4942_v0  ;;  %305 = vst.msk [vmem:[#allocation2 + $0x1f8] sm:$0x1] %vm244_vm1, %v4942_v0 }
  0x33   : > { %309 = vst.msk [vmem:[#allocation2 + $0x218] sm:$0x1] %vm244_vm1, %v4942_v0  ;;  %313 = vst.msk [vmem:[#allocation2 + $0x238] sm:$0x1] %vm244_vm1, %v4942_v0 }
  0x34 PF: > { %v562_v1 = vld [vmem:[%s6437_s3] sm:$0xff]  ;;  %vm762_vm2 = vcmask 1043456   ;;  %vm457_vm3 = vcmask 31744   ;;  %v5143_v2 = vld [vmem:[#allocation2 + $0x8] sm:$0xff]  ;;  %v5150_v4 = vld [vmem:[%s6437_s3 + $0x10] sm:$0xff]  ;;  %vm615_vm4 = vcmask 1040384  }
  0x35   : > { %v697_v3 = vrot.slane %v562_v1, 4  ;;  %4218 = vmatprep.mubr.msk.f32.mxu1 %vm457_vm3, %v5143_v2  ;;  %v314_v5 = vld [vmem:[%s4984_s25] sm:$0xff]  ;;  %v5153_v6 = vld [vmem:[#allocation2 + $0x10] sm:$0xff]  ;;  %4416 = vmatprep.subr.msk.mxu0 %vm762_vm2, %v5150_v4  ;;  %v2244_v9 = vrot.slane %v5150_v4, 4  ;;  %v315_v11 = vld [vmem:[%s4984_s25 + $0x8] sm:$0xff]  ;;  %vm1297_vm5 = vcmask 1046528  }
  0x36   : > { %v5160_v7 = vld [vmem:[%s6435_s1] ss:$0 sm:$0xff]  ;;  %4417 = vmatpush3.msk.msra.mxu0 %vm762_vm2, %v5150_v4  ;;  %v316_v12 = vld [vmem:[%s4984_s25 + $0x10] sm:$0xff]  ;;  %v317_v13 = vld [vmem:[%s4984_s25 + $0x18] sm:$0xff]  ;;  %vm3485_vm6 = vcmask 25600  }
  0x37   : > { %v5165_v8 = vld [vmem:[%s6436_s2] ss:$0 sm:$0xff]  ;;  %4216 = vmatprep.subr.msk.mxu1 %vm762_vm2, %v697_v3  ;;  %v353_v10 = vmul.f32 %v5160_v7, %v314_v5  ;;  %4466 = vmatprep.subr.msk.mxu0 %vm762_vm2, %v2244_v9  ;;  %v354_v14 = vmul.f32 %v5160_v7, %v315_v11  ;;  %v355_v15 = vmul.f32 %v5160_v7, %v316_v12  ;;  %v319_v18 = vld [vmem:[%s4984_s25 + $0x28] sm:$0xff]  ;;  %v320_v19 = vld [vmem:[%s4984_s25 + $0x30] sm:$0xff] }
  0x38   : > { %4217 = vmatpush3.msk.msra.mxu1 %vm762_vm2, %v697_v3  ;;  %v356_v16 = vmul.f32 %v5160_v7, %v317_v13  ;;  %v318_v17 = vld [vmem:[%s4984_s25 + $0x20] sm:$0xff]  ;;  %v358_v22 = vmul.f32 %v5160_v7, %v319_v18  ;;  %v321_v23 = vld [vmem:[%s4984_s25 + $0x38] sm:$0xff]  ;;  %v359_v27 = vmul.f32 %v5160_v7, %v320_v19  ;;  %v323_v33 = vld [vmem:[%s4984_s25 + $0x48] sm:$0xff] }
  0x39   : > { %4219 = vmatmul.mubr.msk.f32.vlgmr.msra.gmra.mrb[0].mxu1 %vm457_vm3, %v5153_v6  ;;  %v392_v20 = vadd.f32 %v5165_v8, %v353_v10  ;;  %4266 = vmatprep.subr.msk.mxu1 %vm762_vm2, %v562_v1  ;;  %v357_v21 = vmul.f32 %v5160_v7, %v318_v17  ;;  %v393_v24 = vadd.f32 %v5165_v8, %v354_v14  ;;  %v322_v28 = vld [vmem:[%s4984_s25 + $0x40] sm:$0xff]  ;;  %v324_v34 = vld [vmem:[%s4984_s25 + $0x50] sm:$0xff]  ;;  %v325_v35 = vld [vmem:[%s4984_s25 + $0x58] sm:$0xff] }
  0x3a   : > { %4267 = vmatpush3.msk.msra.mxu1 %vm762_vm2, %v562_v1  ;;  %v394_v25 = vadd.f32 %v5165_v8, %v355_v15  ;;  %v395_v26 = vadd.f32 %v5165_v8, %v356_v16  ;;  %v397_v31 = vadd.f32 %v5165_v8, %v358_v22  ;;  %v360_v32 = vmul.f32 %v5160_v7, %v321_v23  ;;  %v326_v40 = vld [vmem:[%s4984_s25 + $0x60] sm:$0xff]  ;;  %v327_v41 = vld [vmem:[%s4984_s25 + $0x68] sm:$0xff]  ;;  %v328_v46 = vld [vmem:[%s4984_s25 + $0x70] sm:$0xff] }
  0x3b   : > { %v424_v29 = vmax.f32 %v392_v20, 0.0  ;;  %v396_v30 = vadd.f32 %v5165_v8, %v357_v21  ;;  %v425_v36 = vmax.f32 %v393_v24, 0.0  ;;  %v398_v39 = vadd.f32 %v5165_v8, %v359_v27  ;;  %v329_v51 = vld [vmem:[%s4984_s25 + $0x78] sm:$0xff]  ;;  %v330_v60 = vld [vmem:[%s4984_s25 + $0x80] sm:$0xff]  ;;  %v331_v1 = vld [vmem:[%s4984_s25 + $0x88] sm:$0xff] }
  0x3c   : > { %v426_v37 = vmax.f32 %v394_v25, 0.0  ;;  %v427_v38 = vmax.f32 %v395_v26, 0.0  ;;  %v429_v43 = vmax.f32 %v397_v31, 0.0  ;;  %v399_v44 = vadd.f32 %v5165_v8, %v360_v32  ;;  %v332_v16 = vld [vmem:[%s4984_s25 + $0x90] sm:$0xff]  ;;  %v333_v20 = vld [vmem:[%s4984_s25 + $0x98] sm:$0xff]  ;;  %v335_v32 = vld [vmem:[%s4984_s25 + $0xa8] sm:$0xff] }
  0x3d   : > { %458 = vst.msk [vmem:[#allocation2 + $0x28] sm:$0xff] %vm457_vm3, %v424_v29  ;;  %v428_v42 = vmax.f32 %v396_v30, 0.0  ;;  %v361_v45 = vmul.f32 %v5160_v7, %v322_v28  ;;  %459 = vst.msk [vmem:[#allocation2 + $0x30] sm:$0xff] %vm457_vm3, %v425_v36  ;;  %v430_v47 = vmax.f32 %v398_v39, 0.0  ;;  %v362_v48 = vmul.f32 %v5160_v7, %v323_v33  ;;  %v5260_v25 = vld [vmem:[%s6437_s3 + $0x18] sm:$0xff]  ;;  %v334_v28 = vld [vmem:[%s4984_s25 + $0xa0] sm:$0xff] }
  0x3e   : > { %460 = vst.msk [vmem:[#allocation2 + $0x48] sm:$0xff] %vm457_vm3, %v426_v37  ;;  %461 = vst.msk [vmem:[#allocation2 + $0x50] sm:$0xff] %vm457_vm3, %v427_v38  ;;  %v363_v49 = vmul.f32 %v5160_v7, %v324_v34  ;;  %v364_v50 = vmul.f32 %v5160_v7, %v325_v35  ;;  %v431_v52 = vmax.f32 %v399_v44, 0.0  ;;  %v365_v54 = vmul.f32 %v5160_v7, %v326_v40  ;;  %v5283_v33 = vld [vmem:[%s6437_s3 + $0x8] sm:$0xff]  ;;  %v336_v37 = vld [vmem:[%s4984_s25 + $0xb0] sm:$0xff] }
  0x3f   : > { %462 = vst.msk [vmem:[#allocation2 + $0x68] sm:$0xff] %vm457_vm3, %v428_v42  ;;  %463 = vst.msk [vmem:[#allocation2 + $0x70] sm:$0xff] %vm457_vm3, %v429_v43  ;;  %v400_v53 = vadd.f32 %v5165_v8, %v361_v45  ;;  %v366_v55 = vmul.f32 %v5160_v7, %v327_v41  ;;  %v401_v56 = vadd.f32 %v5165_v8, %v362_v48  ;;  %4316 = vmatprep.subr.msk.mxu1 %vm762_vm2, %v5283_v33  ;;  %v337_v40 = vld [vmem:[%s4984_s25 + $0xb8] sm:$0xff]  ;;  %v338_v44 = vld [vmem:[%s4984_s25 + $0xc0] sm:$0xff] }
  0x40   : > { %464 = vst.msk [vmem:[#allocation2 + $0x88] sm:$0xff] %vm457_vm3, %v430_v47  ;;  %v402_v57 = vadd.f32 %v5165_v8, %v363_v49  ;;  %v403_v58 = vadd.f32 %v5165_v8, %v364_v50  ;;  %v367_v59 = vmul.f32 %v5160_v7, %v328_v46  ;;  %465 = vst.msk [vmem:[#allocation2 + $0x90] sm:$0xff] %vm457_vm3, %v431_v52  ;;  %v339_v50 = vld [vmem:[%s4984_s25 + $0xc8] sm:$0xff] }
  0x41   : > { %v432_v61 = vmax.f32 %v400_v53, 0.0  ;;  %v404_v62 = vadd.f32 %v5165_v8, %v365_v54  ;;  %v405_v63 = vadd.f32 %v5165_v8, %v366_v55  ;;  %v368_v0 = vmul.f32 %v5160_v7, %v329_v51  ;;  %v340_v54 = vld [vmem:[%s4984_s25 + $0xd0] sm:$0xff] }
  0x42   : > { %v433_v3 = vmax.f32 %v401_v56, 0.0  ;;  %v434_v5 = vmax.f32 %v402_v57, 0.0  ;;  %v435_v10 = vmax.f32 %v403_v58, 0.0  ;;  %v406_v11 = vadd.f32 %v5165_v8, %v367_v59 }
  0x43   : > { %466 = vst.msk [vmem:[#allocation2 + $0xa8] sm:$0xff] %vm457_vm3, %v432_v61  ;;  %v436_v12 = vmax.f32 %v404_v62, 0.0  ;;  %v437_v13 = vmax.f32 %v405_v63, 0.0  ;;  %v407_v14 = vadd.f32 %v5165_v8, %v368_v0  ;;  %v369_v15 = vmul.f32 %v5160_v7, %v330_v60  ;;  %v341_v61 = vld [vmem:[%s4984_s25 + $0xd8] sm:$0xff]  ;;  %v342_v0 = vld [vmem:[%s4984_s25 + $0xe0] sm:$0xff] }
  0x44   : > { %v5239_v17 = vld [vmem:[#allocation2 + $0x28] sm:$0xff]  ;;  %467 = vst.msk [vmem:[#allocation2 + $0xb0] sm:$0xff] %vm457_vm3, %v433_v3  ;;  %468 = vst.msk [vmem:[#allocation2 + $0xc8] sm:$0xff] %vm457_vm3, %v434_v5  ;;  %v438_v18 = vmax.f32 %v406_v11, 0.0  ;;  %v370_v19 = vmul.f32 %v5160_v7, %v331_v1  ;;  %v5250_v21 = vld [vmem:[#allocation2 + $0x30] sm:$0xff]  ;;  %v371_v27 = vmul.f32 %v5160_v7, %v332_v16  ;;  %v372_v31 = vmul.f32 %v5160_v7, %v333_v20 }
  0x45   : > { %469 = vst.msk [vmem:[#allocation2 + $0xd0] sm:$0xff] %vm457_vm3, %v435_v10  ;;  %4221 = vmatprep.mubr.msk.f32.mxu1 %vm457_vm3, %v5239_v17  ;;  %4418 = vmatprep.mubr.msk.f32.mxu0 %vm457_vm3, %v5239_v17  ;;  %v5252_v22 = vld [vmem:[#allocation2 + $0x48] sm:$0xff]  ;;  %470 = vst.msk [vmem:[#allocation2 + $0xe8] sm:$0xff] %vm457_vm3, %v436_v12  ;;  %v439_v23 = vmax.f32 %v407_v14, 0.0  ;;  %v408_v24 = vadd.f32 %v5165_v8, %v369_v15  ;;  %v5275_v29 = vld [vmem:[#allocation2 + $0x50] sm:$0xff]  ;;  %v373_v36 = vmul.f32 %v5160_v7, %v334_v28 }
  0x46   : > { %6506 = vst [vmem:[#allocation3_spill] sm:$0xff] %v5252_v22  ;;  %471 = vst.msk [vmem:[#allocation2 + $0xf0] sm:$0xff] %vm457_vm3, %v437_v13  ;;  %4222 = vmatmul.mubr.msk.f32.gmra.mrb[2].mxu1 %vm457_vm3, %v5250_v21  ;;  %4419 = vmatmul.mubr.msk.f32.vlgmr.msra.gmra.mrb[0].mxu0 %vm457_vm3, %v5250_v21  ;;  %v409_v26 = vadd.f32 %v5165_v8, %v370_v19  ;;  %v5287_v4 = vld [vmem:[#allocation2 + $0x68] sm:$0xff]  ;;  %v410_v34 = vadd.f32 %v5165_v8, %v371_v27  ;;  %v5309_v41 = vld [vmem:[#allocation2 + $0x70] sm:$0xff]  ;;  %v617_v16 = vrot.slane %v5143_v2, 7 }
  0x47   : > { %472 = vst.msk [vmem:[#allocation2 + $0x108] sm:$0xff] %vm457_vm3, %v438_v18  ;;  %4467 = vmatpush3.msk.msra.mxu0 %vm762_vm2, %v2244_v9  ;;  %4224 = vmatprep.mubr.msk.f32.mxu1 %vm457_vm3, %v5252_v22  ;;  %6507 = vst [vmem:[#allocation4_spill] sm:$0xff] %v5275_v29  ;;  %v440_v30 = vmax.f32 %v408_v24, 0.0  ;;  %v411_v35 = vadd.f32 %v5165_v8, %v372_v31  ;;  %v374_v39 = vmul.f32 %v5160_v7, %v335_v32  ;;  %v5313_v45 = vld [vmem:[#allocation2 + $0x88] sm:$0xff]  ;;  %v5332_v55 = vld [vmem:[#allocation2 + $0x90] sm:$0xff] }
  0x48   : > { %473 = vst.msk [vmem:[#allocation2 + $0x110] sm:$0xff] %vm457_vm3, %v439_v23  ;;  %4421 = vmatprep.mubr.msk.f32.mxu0 %vm457_vm3, %v5252_v22  ;;  %6508 = vst [vmem:[#allocation5_spill] sm:$0xff] %v5287_v4  ;;  %4516 = vmatprep.subr.msk.mxu0 %vm762_vm2, %v5260_v25  ;;  %v441_v9 = vmax.f32 %v409_v26, 0.0  ;;  %v442_v38 = vmax.f32 %v410_v34, 0.0  ;;  %v412_v43 = vadd.f32 %v5165_v8, %v373_v36  ;;  %v343_v12 = vld [vmem:[%s4984_s25 + $0xe8] sm:$0xff]  ;;  %v619_v18 = vrot.slane %v5153_v6, 7 }
  0x49   : > { %474 = vst.msk [vmem:[#allocation2 + $0x128] sm:$0xff] %vm457_vm3, %v440_v30  ;;  %6509 = vst [vmem:[#allocation6_spill] sm:$0xff] %v5309_v41  ;;  %v443_v42 = vmax.f32 %v411_v35, 0.0  ;;  %v413_v46 = vadd.f32 %v5165_v8, %v374_v39  ;;  %v375_v47 = vmul.f32 %v5160_v7, %v336_v37  ;;  %v376_v49 = vmul.f32 %v5160_v7, %v337_v40 }
  0x4a   : > { %4225 = vmatmul.mubr.msk.f32.gmra.mrb[4].mxu1 %vm457_vm3, %v5275_v29  ;;  %4422 = vmatmul.mubr.msk.f32.gmra.mrb[2].mxu0 %vm457_vm3, %v5275_v29  ;;  %475 = vst.msk [vmem:[#allocation2 + $0x130] sm:$0xff] %vm457_vm3, %v441_v9  ;;  %6510 = vst [vmem:[#allocation7_spill] sm:$0xff] %v5313_v45  ;;  %v444_v48 = vmax.f32 %v412_v43, 0.0  ;;  %v377_v53 = vmul.f32 %v5160_v7, %v338_v44  ;;  %v5336_v57 = vld [vmem:[#allocation2 + $0xa8] sm:$0xff]  ;;  %v378_v60 = vmul.f32 %v5160_v7, %v339_v50  ;;  %v501_v44 = vld [vmem:[#allocation2 + $0x58] sm:$0x1] }
  0x4b   : > { %4227 = vmatprep.mubr.msk.f32.mxu1 %vm457_vm3, %v5287_v4  ;;  %4424 = vmatprep.mubr.msk.f32.mxu0 %vm457_vm3, %v5287_v4  ;;  %476 = vst.msk [vmem:[#allocation2 + $0x148] sm:$0xff] %vm457_vm3, %v442_v38  ;;  %477 = vst.msk [vmem:[#allocation2 + $0x150] sm:$0xff] %vm457_vm3, %v443_v42  ;;  %v445_v51 = vmax.f32 %v413_v46, 0.0  ;;  %v414_v52 = vadd.f32 %v5165_v8, %v375_v47  ;;  %v415_v56 = vadd.f32 %v5165_v8, %v376_v49  ;;  %v5354_v5 = vld [vmem:[#allocation2 + $0xb0] sm:$0xff]  ;;  %v5360_v13 = vld [vmem:[#allocation2 + $0xc8] sm:$0xff] }
  0x4c   : > { %6511 = vst [vmem:[#allocation8_spill] sm:$0xff] %v5332_v55  ;;  %478 = vst.msk [vmem:[#allocation2 + $0x168] sm:$0xff] %vm457_vm3, %v444_v48  ;;  %v416_v59 = vadd.f32 %v5165_v8, %v377_v53  ;;  %v379_v63 = vmul.f32 %v5160_v7, %v340_v54  ;;  %v417_v3 = vadd.f32 %v5165_v8, %v378_v60  ;;  %v5378_v26 = vld [vmem:[#allocation2 + $0xd0] sm:$0xff]  ;;  %v5381_v28 = vld [vmem:[#allocation2 + $0xe8] sm:$0xff]  ;;  %v1303_v35 = vrot.slane %v5239_v17, 1 }
  0x4d   : > { %6512 = vst [vmem:[#allocation9_spill] sm:$0xff] %v5336_v57  ;;  %479 = vst.msk [vmem:[#allocation2 + $0x170] sm:$0xff] %vm457_vm3, %v445_v51  ;;  %v446_v58 = vmax.f32 %v414_v52, 0.0  ;;  %v447_v62 = vmax.f32 %v415_v56, 0.0  ;;  %v380_v11 = vmul.f32 %v5160_v7, %v341_v61  ;;  %v381_v15 = vmul.f32 %v5160_v7, %v342_v0  ;;  %v5399_v34 = vld [vmem:[#allocation2 + $0xf0] sm:$0xff] }
  0x4e   : > { %4228 = vmatmul.mubr.msk.f32.gmra.mrb[6].mxu1 %vm457_vm3, %v5309_v41  ;;  %4425 = vmatmul.mubr.msk.f32.gmra.mrb[4].mxu0 %vm457_vm3, %v5309_v41  ;;  %v448_v1 = vmax.f32 %v416_v59, 0.0  ;;  %6513 = vst [vmem:[#allocation10_spill] sm:$0xff] %v5354_v5  ;;  %v418_v10 = vadd.f32 %v5165_v8, %v379_v63  ;;  %6514 = vst [vmem:[#allocation11_spill] sm:$0xff] %v5360_v13  ;;  %v449_v14 = vmax.f32 %v417_v3, 0.0  ;;  %v1304_v36 = vrot.slane %v5250_v21, 1  ;;  %v5403_v37 = vld [vmem:[#allocation2 + $0x108] sm:$0xff] }
  0x4f   : > { %4230 = vmatprep.mubr.msk.f32.mxu1 %vm457_vm3, %v5313_v45  ;;  %4427 = vmatprep.mubr.msk.f32.mxu0 %vm457_vm3, %v5313_v45  ;;  %480 = vst.msk [vmem:[#allocation2 + $0x188] sm:$0xff] %vm457_vm3, %v446_v58  ;;  %481 = vst.msk [vmem:[#allocation2 + $0x190] sm:$0xff] %vm457_vm3, %v447_v62  ;;  %v419_v20 = vadd.f32 %v5165_v8, %v380_v11  ;;  %v420_v23 = vadd.f32 %v5165_v8, %v381_v15  ;;  %v497_v38 = vld [vmem:[#allocation2 + $0x38] sm:$0x1]  ;;  %v5414_v39 = vld [vmem:[#allocation2 + $0x110] sm:$0xff]  ;;  %v1308_v46 = vrot.slane %v5252_v22, 1 }
  0x50   : > { %482 = vst.msk [vmem:[#allocation2 + $0x1a8] sm:$0xff] %vm457_vm3, %v448_v1  ;;  %v450_v19 = vmax.f32 %v418_v10, 0.0  ;;  %483 = vst.msk [vmem:[#allocation2 + $0x1b0] sm:$0xff] %vm457_vm3, %v449_v14  ;;  %v382_v24 = vmul.f32 %v5160_v7, %v343_v12  ;;  %v5388_v32 = vsel %vm615_vm4, %v617_v16, %v619_v18  ;;  %v1306_v40 = vrot.slane %v497_v38, 1  ;;  %v5416_v42 = vld [vmem:[#allocation2 + $0x128] sm:$0xff]  ;;  %v344_v10 = vld [vmem:[%s4984_s25 + $0xf0] sm:$0xff] }
  0x51   : > { %6515 = vst [vmem:[#allocation12_spill] sm:$0xff] %v5378_v26  ;;  %v451_v27 = vmax.f32 %v419_v20, 0.0  ;;  %6516 = vst [vmem:[#allocation13_spill] sm:$0xff] %v5381_v28  ;;  %v452_v30 = vmax.f32 %v420_v23, 0.0  ;;  %v5419_v43 = vsel %vm1297_vm5, %v1303_v35, %v1304_v36  ;;  %v1309_v47 = vrot.slane %v5275_v29, 1  ;;  %v5431_v48 = vld [vmem:[#allocation2 + $0x130] sm:$0xff] }
  0x52   : > { %4231 = vmatmul.mubr.msk.f32.gmra.mrb[8].mxu1 %vm457_vm3, %v5332_v55  ;;  %4428 = vmatmul.mubr.msk.f32.gmra.mrb[6].mxu0 %vm457_vm3, %v5332_v55  ;;  %484 = vst.msk [vmem:[#allocation2 + $0x1c8] sm:$0xff] %vm457_vm3, %v450_v19  ;;  %v421_v31 = vadd.f32 %v5165_v8, %v382_v24  ;;  %6517 = vst [vmem:[#allocation14_spill] sm:$0xff] %v5399_v34  ;;  %v5434_v49 = vsel %vm1297_vm5, %v1304_v36, %v1306_v40  ;;  %v1311_v50 = vrot.slane %v501_v44, 1  ;;  %v5437_v52 = vld [vmem:[#allocation2 + $0x148] sm:$0xff]  ;;  %v505_v56 = vld [vmem:[#allocation2 + $0x78] sm:$0x1] }
  0x53   : > { %4233 = vmatprep.mubr.msk.f32.mxu1 %vm457_vm3, %v5336_v57  ;;  %4430 = vmatprep.mubr.msk.f32.mxu0 %vm457_vm3, %v5336_v57  ;;  %485 = vst.msk [vmem:[#allocation2 + $0x1d0] sm:$0xff] %vm457_vm3, %v451_v27  ;;  %486 = vst.msk [vmem:[#allocation2 + $0x1e8] sm:$0xff] %vm457_vm3, %v452_v30  ;;  %v6441_v51 = vrot.slane %v5260_v25, 4  ;;  %v1313_v53 = vrot.slane %v5287_v4, 1  ;;  %v1314_v54 = vrot.slane %v5309_v41, 1  ;;  %v5442_v58 = vsel %vm1297_vm5, %v1308_v46, %v1309_v47  ;;  %v5452_v59 = vld [vmem:[#allocation2 + $0x150] sm:$0xff] }
  0x54   : > { %v453_v9 = vmax.f32 %v421_v31, 0.0  ;;  %6518 = vst [vmem:[#allocation15_spill] sm:$0xff] %v5403_v37  ;;  %v5455_v60 = vsel %vm1297_vm5, %v1309_v47, %v1311_v50  ;;  %v1316_v61 = vrot.slane %v505_v56, 1  ;;  %v509_v62 = vld [vmem:[#allocation2 + $0x98] sm:$0x1]  ;;  %v5459_v63 = vld [vmem:[#allocation2 + $0x168] sm:$0xff]  ;;  %v383_v18 = vmul.f32 %v5160_v7, %v344_v10 }
  0x55   : > { %v5462_v0 = vsel %vm1297_vm5, %v1313_v53, %v1314_v54  ;;  %v1318_v1 = vrot.slane %v5313_v45, 1  ;;  %v1319_v3 = vrot.slane %v5332_v55, 1  ;;  %v345_v11 = vld [vmem:[%s4984_s25 + $0xf8] sm:$0xff]  ;;  %v5479_v12 = vld [vmem:[#allocation2 + $0x170] sm:$0xff]  ;;  %v1321_v15 = vrot.slane %v509_v62, 1 }
  0x56   : > { %4234 = vmatmul.mubr.msk.f32.gmra.mrb[10].mxu1 %vm457_vm3, %v5354_v5  ;;  %4431 = vmatmul.mubr.msk.f32.gmra.mrb[8].mxu0 %vm457_vm3, %v5354_v5  ;;  %487 = vst.msk [vmem:[#allocation2 + $0x1f0] sm:$0xff] %vm457_vm3, %v453_v9  ;;  %v5482_v14 = vsel %vm1297_vm5, %v1314_v54, %v1316_v61  ;;  %v384_v19 = vmul.f32 %v5160_v7, %v345_v11  ;;  %v5486_v20 = vld [vmem:[#allocation2 + $0x188] sm:$0xff]  ;;  %v1323_v24 = vrot.slane %v5336_v57, 1  ;;  %v1324_v27 = vrot.slane %v5354_v5, 1  ;;  %v513_v30 = vld [vmem:[#allocation2 + $0xb8] sm:$0x1] }
  0x57   : > { %4236 = vmatprep.mubr.msk.f32.mxu1 %vm457_vm3, %v5360_v13  ;;  %4433 = vmatprep.mubr.msk.f32.mxu0 %vm457_vm3, %v5360_v13  ;;  %6519 = vst [vmem:[#allocation16_spill] sm:$0xff] %v5486_v20  ;;  %v5489_v23 = vsel %vm1297_vm5, %v1318_v1, %v1319_v3  ;;  %v422_v31 = vadd.f32 %v5165_v8, %v383_v18  ;;  %v5503_v7 = vld [vmem:[#allocation2 + $0x190] sm:$0xff]  ;;  %v1326_v36 = vrot.slane %v513_v30, 1  ;;  %v5508_v40 = vld [vmem:[#allocation2 + $0x1a8] sm:$0xff]  ;;  %v1328_v46 = vrot.slane %v5360_v13, 1  ;;  %v490_v18 = vld [vmem:[#allocation2] sm:$0xff] }
  0x58   : > { %v423_v9 = vadd.f32 %v5165_v8, %v384_v19  ;;  %6520 = vst [vmem:[#allocation17_spill] sm:$0xff] %v5503_v7  ;;  %v5506_v35 = vsel %vm1297_vm5, %v1319_v3, %v1321_v15  ;;  %6521 = vst [vmem:[#allocation18_spill] sm:$0xff] %v5508_v40  ;;  %v5511_v44 = vsel %vm1297_vm5, %v1323_v24, %v1324_v27  ;;  %v1329_v47 = vrot.slane %v5378_v26, 1  ;;  %v517_v50 = vld [vmem:[#allocation2 + $0xd8] sm:$0x1]  ;;  %v5527_v56 = vld [vmem:[#allocation2 + $0x1b0] sm:$0xff] }
  0x59   : > { %v454_v38 = vmax.f32 %v422_v31, 0.0  ;;  %v1298_v53 = vrot.slane %v5143_v2, 1  ;;  %v6440_v54 = vrot.slane %v5153_v6, 1  ;;  %v5530_v61 = vsel %vm1297_vm5, %v1324_v27, %v1326_v36  ;;  %v521_v1 = vld [vmem:[#allocation2 + $0xf8] sm:$0x1]  ;;  %v5532_v3 = vld [vmem:[#allocation2 + $0x1c8] sm:$0xff] }
  0x5a   : > { %4237 = vmatmul.mubr.msk.f32.gmra.mrb[12].mxu1 %vm457_vm3, %v5378_v26  ;;  %4434 = vmatmul.mubr.msk.f32.gmra.mrb[10].mxu0 %vm457_vm3, %v5378_v26  ;;  %v455_v8 = vmax.f32 %v423_v9, 0.0  ;;  %v1331_v62 = vrot.slane %v517_v50, 1  ;;  %6522 = vst [vmem:[#allocation19_spill] sm:$0xff] %v5532_v3  ;;  %v5535_v10 = vsel %vm1297_vm5, %v1328_v46, %v1329_v47  ;;  %v1333_v11 = vrot.slane %v5381_v28, 1  ;;  %v5552_v27 = vld [vmem:[#allocation2 + $0x1d0] sm:$0xff]  ;;  %v5557_v9 = vld [vmem:[#allocation2 + $0x1e8] sm:$0xff] }
  0x5b   : > { %4239 = vmatprep.mubr.msk.f32.mxu1 %vm457_vm3, %v5381_v28  ;;  %4436 = vmatprep.mubr.msk.f32.mxu0 %vm457_vm3, %v5381_v28  ;;  %488 = vst.msk [vmem:[#allocation2 + $0x208] sm:$0xff] %vm457_vm3, %v454_v38  ;;  %6523 = vst [vmem:[#allocation20_spill] sm:$0xff] %v5535_v10  ;;  %v1334_v15 = vrot.slane %v5399_v34, 1  ;;  %v1336_v19 = vrot.slane %v521_v1, 1  ;;  %v5546_v24 = vsel %vm1297_vm5, %v1298_v53, %v6440_v54  ;;  %v525_v31 = vld [vmem:[#allocation2 + $0x118] sm:$0x1] }
  0x5c   : > { %489 = vst.msk [vmem:[#allocation2 + $0x210] sm:$0xff] %vm457_vm3, %v455_v8  ;;  %v5555_v30 = vsel %vm1297_vm5, %v1329_v47, %v1331_v62  ;;  %v616_v38 = vrot.slane %v490_v18, 7  ;;  %v1338_v8 = vrot.slane %v5403_v37, 1  ;;  %v1339_v46 = vrot.slane %v5414_v39, 1  ;;  %v494_v50 = vld [vmem:[#allocation2 + $0x20] sm:$0xff] }
  0x5d   : > { %6524 = vst [vmem:[#allocation21_spill] sm:$0xff] %v5555_v30  ;;  %v5560_v36 = vsel %vm1297_vm5, %v1333_v11, %v1334_v15  ;;  %v622_v53 = vrot.slane %v5239_v17, 7  ;;  %v5570_v47 = vsel %vm1297_vm5, %v1334_v15, %v1336_v19  ;;  %v5576_v62 = vld [vmem:[#allocation2 + $0x1f0] sm:$0xff]  ;;  %v1341_v1 = vrot.slane %v525_v31, 1  ;;  %v529_v19 = vld [vmem:[#allocation2 + $0x138] sm:$0x1] }
  0x5e   : > { %4240 = vmatmul.mubr.msk.f32.gmra.mrb[14].mxu1 %vm457_vm3, %v5399_v34  ;;  %4437 = vmatmul.mubr.msk.f32.gmra.mrb[12].mxu0 %vm457_vm3, %v5399_v34  ;;  %6525 = vst [vmem:[#allocation22_spill] sm:$0xff] %v5560_v36  ;;  %6526 = vst [vmem:[#allocation23_spill] sm:$0xff] %v5570_v47  ;;  %v621_v11 = vrot.slane %v494_v50, 7  ;;  %v1343_v17 = vrot.slane %v5416_v42, 1  ;;  %v1344_v18 = vrot.slane %v5431_v48, 1  ;;  %v618_v54 = vsel %vm615_vm4, %v616_v38, %v617_v16 }
  0x5f   : > { %4242 = vmatprep.mubr.msk.f32.mxu1 %vm457_vm3, %v5403_v37  ;;  %4439 = vmatprep.mubr.msk.f32.mxu0 %vm457_vm3, %v5403_v37  ;;  %v5584_v15 = vsel %vm1297_vm5, %v1338_v8, %v1339_v46  ;;  %v5595_v2 = vsel %vm1297_vm5, %v1339_v46, %v1341_v1  ;;  %v533_v38 = vld [vmem:[#allocation2 + $0x158] sm:$0x1]  ;;  %v627_v50 = vrot.slane %v5252_v22, 7  ;;  %v629_v46 = vrot.slane %v5275_v29, 7  ;;  %v510_v29 = vld [vmem:[#allocation2 + $0xa0] sm:$0xff] }
  0x60   : > { %6527 = vst [vmem:[#allocation24_spill] sm:$0xff] %v5584_v15  ;;  %v5598_v16 = vsel %vm615_vm4, %v621_v11, %v622_v53  ;;  %v5601_v31 = vsel %vm1297_vm5, %v1343_v17, %v1344_v18  ;;  %v1351_v1 = vrot.slane %v533_v38, 1  ;;  %v526_v22 = vld [vmem:[#allocation2 + $0x120] sm:$0xff] }
  0x61   : > { %6528 = vst [vmem:[#allocation25_spill] sm:$0xff] %v5598_v16  ;;  %6529 = vst [vmem:[#allocation26_spill] sm:$0xff] %v5601_v31 }
  0x62   : > { %4243 = vmatmul.mubr.msk.f32.gmra.mrb[16].mxu1 %vm457_vm3, %v5414_v39  ;;  %4440 = vmatmul.mubr.msk.f32.gmra.mrb[14].mxu0 %vm457_vm3, %v5414_v39 }
  0x63   : > { %4245 = vmatprep.mubr.msk.f32.mxu1 %vm457_vm3, %v5416_v42  ;;  %4468 = vmatprep.mubr.msk.f32.mxu0 %vm457_vm3, %v5419_v43 }
  0x66   : > { %4246 = vmatmul.mubr.msk.f32.gmra.mrb[18].mxu1 %vm457_vm3, %v5431_v48  ;;  %4469 = vmatmul.mubr.msk.f32.vlgmr.msra.gmra.mrb[0].mxu0 %vm457_vm3, %v5434_v49 }
  0x67   : > { %4517 = vmatpush3.msk.msra.mxu0 %vm762_vm2, %v5260_v25  ;;  %4248 = vmatprep.mubr.msk.f32.mxu1 %vm457_vm3, %v5437_v52 }
  0x68   : > { %4471 = vmatprep.mubr.msk.f32.mxu0 %vm457_vm3, %v5442_v58  ;;  %4566 = vmatprep.subr.msk.mxu0 %vm762_vm2, %v6441_v51  ;;  %v498_v51 = vld [vmem:[#allocation2 + $0x40] sm:$0xff] }
  0x69   : > { %v626_v8 = vrot.slane %v498_v51, 7 }
  0x6a   : > { %4249 = vmatmul.mubr.msk.f32.gmra.mrb[20].mxu1 %vm457_vm3, %v5452_v59  ;;  %4472 = vmatmul.mubr.msk.f32.gmra.mrb[2].mxu0 %vm457_vm3, %v5455_v60 }
  0x6b   : > { %4251 = vmatprep.mubr.msk.f32.mxu1 %vm457_vm3, %v5459_v63  ;;  %4474 = vmatprep.mubr.msk.f32.mxu0 %vm457_vm3, %v5462_v0 }
  0x6e   : > { %4252 = vmatmul.mubr.msk.f32.gmra.mrb[22].mxu1 %vm457_vm3, %v5479_v12  ;;  %4475 = vmatmul.mubr.msk.f32.gmra.mrb[4].mxu0 %vm457_vm3, %v5482_v14 }
  0x6f   : > { %4254 = vmatprep.mubr.msk.f32.mxu1 %vm457_vm3, %v5486_v20  ;;  %4477 = vmatprep.mubr.msk.f32.mxu0 %vm457_vm3, %v5489_v23 }
  0x72   : > { %4255 = vmatmul.mubr.msk.f32.gmra.mrb[24].mxu1 %vm457_vm3, %v5503_v7  ;;  %4478 = vmatmul.mubr.msk.f32.gmra.mrb[6].mxu0 %vm457_vm3, %v5506_v35 }
  0x73   : > { %4257 = vmatprep.mubr.msk.f32.mxu1 %vm457_vm3, %v5508_v40  ;;  %4480 = vmatprep.mubr.msk.f32.mxu0 %vm457_vm3, %v5511_v44 }
  0x76   : > { %4258 = vmatmul.mubr.msk.f32.gmra.mrb[26].mxu1 %vm457_vm3, %v5527_v56  ;;  %4481 = vmatmul.mubr.msk.f32.gmra.mrb[8].mxu0 %vm457_vm3, %v5530_v61 }
  0x77   : > { %4260 = vmatprep.mubr.msk.f32.mxu1 %vm457_vm3, %v5532_v3  ;;  %4483 = vmatprep.mubr.msk.f32.mxu0 %vm457_vm3, %v5535_v10 }
  0x7a   : > { %4261 = vmatmul.mubr.msk.f32.gmra.mrb[28].mxu1 %vm457_vm3, %v5552_v27  ;;  %4484 = vmatmul.mubr.msk.f32.gmra.mrb[10].mxu0 %vm457_vm3, %v5555_v30  ;;  %v624_v30 = vrot.slane %v5250_v21, 7  ;;  %v1346_v21 = vrot.slane %v529_v19, 1  ;;  %v5626_v19 = vsel %vm615_vm4, %v626_v8, %v627_v50  ;;  %v634_v8 = vrot.slane %v5309_v41, 7 }
  0x7b   : > { %4263 = vmatprep.mubr.msk.f32.mxu1 %vm457_vm3, %v5557_v9  ;;  %4486 = vmatprep.mubr.msk.f32.mxu0 %vm457_vm3, %v5560_v36  ;;  %v502_v36 = vld [vmem:[#allocation2 + $0x60] sm:$0xff]  ;;  %v642_v41 = vrot.slane %v5336_v57, 7 }
  0x7c   : > { %v5617_v51 = vsel %vm615_vm4, %v622_v53, %v624_v30  ;;  %v5620_v11 = vsel %vm1297_vm5, %v1344_v18, %v1346_v21  ;;  %v631_v17 = vrot.slane %v502_v36, 7  ;;  %v1354_v30 = vrot.slane %v5479_v12, 1  ;;  %v537_v53 = vld [vmem:[#allocation2 + $0x178] sm:$0x1]  ;;  %v518_v57 = vld [vmem:[#allocation2 + $0xe0] sm:$0xff] }
  0x7d   : > { %6530 = vst [vmem:[#allocation27_spill] sm:$0xff] %v5617_v51  ;;  %6531 = vst [vmem:[#allocation28_spill] sm:$0xff] %v5620_v11  ;;  %v6533_v18 = vrot.slane %v5283_v33, 4  ;;  %v5641_v36 = vsel %vm615_vm4, %v627_v50, %v629_v46  ;;  %v1358_v46 = vrot.slane %v5486_v20, 1 }
  0x7e   : > { %4264 = vmatmul.mubr.msk.f32.gmra.mrb[30].mxu1 %vm457_vm3, %v5576_v62  ;;  %4487 = vmatmul.mubr.msk.f32.gmra.mrb[12].mxu0 %vm457_vm3, %v5570_v47  ;;  %v1348_v47 = vrot.slane %v5437_v52, 1 }
  0x7f   : > { %4268 = vmatprep.mubr.msk.f32.mxu1 %vm457_vm3, %v618_v54  ;;  %4489 = vmatprep.mubr.msk.f32.mxu0 %vm457_vm3, %v5584_v15  ;;  %v1349_v54 = vrot.slane %v5452_v59, 1  ;;  %v1353_v15 = vrot.slane %v5459_v63, 1 }
  0x81   : > { %v5629_v38 = vsel %vm1297_vm5, %v1348_v47, %v1349_v54  ;;  %v5644_v47 = vsel %vm1297_vm5, %v1349_v54, %v1351_v1  ;;  %v5655_v50 = vsel %vm1297_vm5, %v1353_v15, %v1354_v30  ;;  %v637_v54 = vrot.slane %v5313_v45, 7 }
  0x82   : > { %4269 = vmatmul.mubr.msk.f32.vlgmr.msra.gmra.mrb[0].mxu1 %vm457_vm3, %v5388_v32  ;;  %4490 = vmatmul.mubr.msk.f32.gmra.mrb[14].mxu0 %vm457_vm3, %v5595_v2  ;;  %v632_v32 = vrot.slane %v5287_v4, 7  ;;  %6532 = vst [vmem:[#allocation29_spill] sm:$0xff] %v5629_v38  ;;  %6534 = vst [vmem:[#allocation30_spill] sm:$0xff] %v5644_v47  ;;  %v541_v4 = vld [vmem:[#allocation2 + $0x198] sm:$0x1]  ;;  %v1359_v1 = vrot.slane %v5503_v7, 1 }
  0x83   : > { %4271 = vmatprep.mubr.msk.f32.mxu1 %vm457_vm3, %v5598_v16  ;;  %4492 = vmatprep.mubr.msk.f32.mxu0 %vm457_vm3, %v5601_v31  ;;  %v506_v16 = vld [vmem:[#allocation2 + $0x80] sm:$0xff]  ;;  %6535 = vst [vmem:[#allocation31_spill] sm:$0xff] %v5655_v50  ;;  %v641_v45 = vrot.slane %v510_v29, 7 }
  0x84   : > { %4317 = vmatpush3.msk.msra.mxu1 %vm762_vm2, %v5283_v33  ;;  %v5651_v21 = vsel %vm615_vm4, %v631_v17, %v632_v32  ;;  %v639_v17 = vrot.slane %v5332_v55, 7  ;;  %v5670_v15 = vsel %vm615_vm4, %v632_v32, %v634_v8  ;;  %v1363_v55 = vrot.slane %v5508_v40, 1  ;;  %v530_v31 = vld [vmem:[#allocation2 + $0x140] sm:$0xff] }
  0x85   : > { %4366 = vmatprep.subr.msk.mxu1 %vm762_vm2, %v6533_v18  ;;  %v1356_v18 = vrot.slane %v537_v53, 1  ;;  %v5699_v32 = vsel %vm615_vm4, %v641_v45, %v642_v41  ;;  %v649_v45 = vrot.slane %v5378_v26, 7  ;;  %v1373_v26 = vrot.slane %v5557_v9, 1 }
  0x86   : > { %4272 = vmatmul.mubr.msk.f32.gmra.mrb[2].mxu1 %vm457_vm3, %v5617_v51  ;;  %4493 = vmatmul.mubr.msk.f32.gmra.mrb[16].mxu0 %vm457_vm3, %v5620_v11  ;;  %v636_v51 = vrot.slane %v506_v16, 7  ;;  %v1361_v16 = vrot.slane %v541_v4, 1  ;;  %v5680_v4 = vsel %vm1297_vm5, %v1358_v46, %v1359_v1  ;;  %v514_v11 = vld [vmem:[#allocation2 + $0xc0] sm:$0xff]  ;;  %v5689_v29 = vsel %vm615_vm4, %v637_v54, %v639_v17  ;;  %v549_v46 = vld [vmem:[#allocation2 + $0x1d8] sm:$0x1] }
  0x87   : > { %4274 = vmatprep.mubr.msk.f32.mxu1 %vm457_vm3, %v5626_v19  ;;  %4495 = vmatprep.mubr.msk.f32.mxu0 %vm457_vm3, %v5629_v38  ;;  %v5673_v53 = vsel %vm1297_vm5, %v1354_v30, %v1356_v18  ;;  %6537 = vst [vmem:[#allocation33_spill] sm:$0xff] %v5680_v4  ;;  %v1364_v38 = vrot.slane %v5527_v56, 1  ;;  %v644_v30 = vrot.slane %v5354_v5, 7  ;;  %v646_v18 = vrot.slane %v514_v11, 7 }
  0x88   : > { %6536 = vst [vmem:[#allocation32_spill] sm:$0xff] %v5673_v53  ;;  %v1368_v17 = vrot.slane %v5532_v3, 1  ;;  %v1371_v11 = vrot.slane %v549_v46, 1  ;;  %v652_v5 = vrot.slane %v5381_v28, 7 }
  0x8a   : > { %4275 = vmatmul.mubr.msk.f32.gmra.mrb[4].mxu1 %vm457_vm3, %v5641_v36  ;;  %4496 = vmatmul.mubr.msk.f32.gmra.mrb[18].mxu0 %vm457_vm3, %v5644_v47  ;;  %v5677_v47 = vsel %vm615_vm4, %v636_v51, %v637_v54  ;;  %v5692_v51 = vsel %vm1297_vm5, %v1359_v1, %v1361_v16  ;;  %v5703_v54 = vsel %vm1297_vm5, %v1363_v55, %v1364_v38  ;;  %v647_v1 = vrot.slane %v5360_v13, 7 }
  0x8b   : > { %4277 = vmatprep.mubr.msk.f32.mxu1 %vm457_vm3, %v5651_v21  ;;  %4498 = vmatprep.mubr.msk.f32.mxu0 %vm457_vm3, %v5655_v50  ;;  %v545_v50 = vld [vmem:[#allocation2 + $0x1b8] sm:$0x1]  ;;  %6538 = vst [vmem:[#allocation34_spill] sm:$0xff] %v5692_v51  ;;  %6539 = vst [vmem:[#allocation35_spill] sm:$0xff] %v5703_v54  ;;  %v1369_v16 = vrot.slane %v5552_v27, 1  ;;  %v5718_v55 = vsel %vm615_vm4, %v642_v41, %v644_v30  ;;  %v651_v13 = vrot.slane %v518_v57, 7 }
  0x8c   : > { %v1366_v8 = vrot.slane %v545_v50, 1  ;;  %v5732_v41 = vld [vmem:[#allocation2 + $0x208] sm:$0xff]  ;;  %v5734_v30 = vld [vmem:[#allocation2 + $0x210] sm:$0xff]  ;;  %v5741_v57 = vsel %vm615_vm4, %v647_v1, %v649_v45 }
  0x8d   : > { %v5728_v46 = vsel %vm1297_vm5, %v1368_v17, %v1369_v16  ;;  %v2240_v45 = vrot.slane %v5734_v30, 1 }
  0x8e   : > { %4278 = vmatmul.mubr.msk.f32.gmra.mrb[6].mxu1 %vm457_vm3, %v5670_v15  ;;  %4499 = vmatmul.mubr.msk.f32.gmra.mrb[20].mxu0 %vm457_vm3, %v5673_v53  ;;  %v5721_v50 = vsel %vm1297_vm5, %v1364_v38, %v1366_v8  ;;  %6541 = vst [vmem:[#allocation37_spill] sm:$0xff] %v5728_v46  ;;  %v522_v53 = vld [vmem:[#allocation2 + $0x100] sm:$0xff]  ;;  %v5744_v38 = vsel %vm1297_vm5, %v1369_v16, %v1371_v11  ;;  %v2239_v16 = vrot.slane %v5732_v41, 1  ;;  %v557_v11 = vld [vmem:[#allocation2 + $0x218] sm:$0x1] }
  0x8f   : > { %4280 = vmatprep.mubr.msk.f32.mxu1 %vm457_vm3, %v5677_v47  ;;  %4501 = vmatprep.mubr.msk.f32.mxu0 %vm457_vm3, %v5680_v4  ;;  %6540 = vst [vmem:[#allocation36_spill] sm:$0xff] %v5721_v50  ;;  %v1374_v4 = vrot.slane %v5576_v62, 1  ;;  %6542 = vst [vmem:[#allocation38_spill] sm:$0xff] %v5744_v38  ;;  %v5751_v8 = vsel %vm615_vm4, %v651_v13, %v652_v5  ;;  %v656_v28 = vrot.slane %v522_v53, 7  ;;  %v659_v53 = vrot.slane %v5414_v39, 7 }
  0x92   : > { %4281 = vmatmul.mubr.msk.f32.gmra.mrb[8].mxu1 %vm457_vm3, %v5689_v29  ;;  %4502 = vmatmul.mubr.msk.f32.gmra.mrb[22].mxu0 %vm457_vm3, %v5692_v51  ;;  %v5725_v51 = vsel %vm615_vm4, %v646_v18, %v647_v1  ;;  %v654_v18 = vrot.slane %v5399_v34, 7  ;;  %v657_v1 = vrot.slane %v5403_v37, 7  ;;  %v5779_v34 = vsel %vm1297_vm5, %v2239_v16, %v2240_v45  ;;  %v534_v16 = vld [vmem:[#allocation2 + $0x160] sm:$0xff] }
  0x93   : > { %4283 = vmatprep.mubr.msk.f32.mxu1 %vm457_vm3, %v5699_v32  ;;  %4504 = vmatprep.mubr.msk.f32.mxu0 %vm457_vm3, %v5703_v54  ;;  %v553_v54 = vld [vmem:[#allocation2 + $0x1f8] sm:$0x1]  ;;  %6544 = vst [vmem:[#allocation40_spill] sm:$0xff] %v5779_v34 }
  0x94   : > { %v1376_v17 = vrot.slane %v553_v54, 1  ;;  %v5769_v13 = vsel %vm615_vm4, %v652_v5, %v654_v18  ;;  %v2242_v54 = vrot.slane %v557_v11, 1  ;;  %v5776_v37 = vsel %vm615_vm4, %v656_v28, %v657_v1 }
  0x95   : > { %6543 = vst [vmem:[#allocation39_spill] sm:$0xff] %v5776_v37  ;;  %v5791_v5 = vsel %vm615_vm4, %v657_v1, %v659_v53  ;;  %v664_v28 = vrot.slane %v5431_v48, 7  ;;  %v666_v18 = vrot.slane %v530_v31, 7  ;;  %v669_v31 = vrot.slane %v5452_v59, 7  ;;  %v538_v53 = vld [vmem:[#allocation2 + $0x180] sm:$0xff] }
  0x96   : > { %4284 = vmatmul.mubr.msk.f32.gmra.mrb[10].mxu1 %vm457_vm3, %v5718_v55  ;;  %4505 = vmatmul.mubr.msk.f32.gmra.mrb[24].mxu0 %vm457_vm3, %v5721_v50  ;;  %v5755_v50 = vsel %vm1297_vm5, %v1373_v26, %v1374_v4  ;;  %v5772_v26 = vsel %vm1297_vm5, %v1374_v4, %v1376_v17  ;;  %v667_v17 = vrot.slane %v5437_v52, 7  ;;  %v672_v11 = vrot.slane %v5459_v63, 7 }
  0x97   : > { %4286 = vmatprep.mubr.msk.f32.mxu1 %vm457_vm3, %v5725_v51  ;;  %4507 = vmatprep.mubr.msk.f32.mxu0 %vm457_vm3, %v5728_v46  ;;  %v662_v46 = vrot.slane %v5416_v42, 7 }
  0x99   : > { %v5810_v1 = vsel %vm615_vm4, %v662_v46, %v664_v28  ;;  %v5832_v28 = vsel %vm615_vm4, %v667_v17, %v669_v31  ;;  %v679_v31 = vrot.slane %v5503_v7, 7  ;;  %v550_v7 = vld [vmem:[#allocation2 + $0x1e0] sm:$0xff] }
  0x9a   : > { %4287 = vmatmul.mubr.msk.f32.gmra.mrb[12].mxu1 %vm457_vm3, %v5741_v57  ;;  %4508 = vmatmul.mubr.msk.f32.gmra.mrb[26].mxu0 %vm457_vm3, %v5744_v38  ;;  %v661_v38 = vrot.slane %v526_v22, 7  ;;  %v5794_v22 = vsel %vm1297_vm5, %v2240_v45, %v2242_v54  ;;  %v671_v45 = vrot.slane %v534_v16, 7  ;;  %v5820_v54 = vld [vmem:[%s6437_s3 + $0x20] sm:$0xf] }
  0x9b   : > { %4289 = vmatprep.mubr.msk.f32.mxu1 %vm457_vm3, %v5751_v8  ;;  %4510 = vmatprep.mubr.msk.f32.mxu0 %vm457_vm3, %v5755_v50  ;;  %6545 = vst [vmem:[#allocation41_spill] sm:$0xff] %v5794_v22 }
  0x9c   : > { %v5798_v4 = vsel %vm615_vm4, %v661_v38, %v662_v46  ;;  %v5814_v38 = vsel %vm615_vm4, %v666_v18, %v667_v17  ;;  %v6546_v46 = vrot.slane %v5260_v25, 4  ;;  %v674_v18 = vrot.slane %v5479_v12, 7  ;;  %v542_v25 = vld [vmem:[#allocation2 + $0x1a0] sm:$0xff] }
  0x9d   : > { %v5838_v16 = vsel %vm615_vm4, %v671_v45, %v672_v11 }
  0x9e   : > { %4290 = vmatmul.mubr.msk.f32.gmra.mrb[14].mxu1 %vm457_vm3, %v5769_v13  ;;  %4511 = vmatmul.mubr.msk.f32.gmra.mrb[28].mxu0 %vm457_vm3, %v5772_v26  ;;  %v5852_v17 = vsel %vm615_vm4, %v672_v11, %v674_v18 }
  0x9f   : > { %4292 = vmatprep.mubr.msk.f32.mxu1 %vm457_vm3, %v5776_v37  ;;  %4513 = vmatprep.mubr.msk.f32.mxu0 %vm457_vm3, %v5779_v34  ;;  %v677_v34 = vrot.slane %v5486_v20, 7  ;;  %v546_v20 = vld [vmem:[#allocation2 + $0x1c0] sm:$0xff] }
  0xa1   : > { %v5868_v11 = vsel %vm615_vm4, %v677_v34, %v679_v31 }
  0xa2   : > { %4293 = vmatmul.mubr.msk.f32.gmra.mrb[16].mxu1 %vm457_vm3, %v5791_v5  ;;  %4514 = vmatmul.mubr.msk.f32.gmra.mrb[30].mxu0 %vm457_vm3, %v5794_v22  ;;  %v676_v22 = vrot.slane %v538_v53, 7  ;;  %v681_v53 = vrot.slane %v542_v25, 7  ;;  %v686_v25 = vrot.slane %v546_v20, 7  ;;  %v689_v20 = vrot.slane %v5552_v27, 7 }
  0xa3   : > { %4295 = vmatprep.mubr.msk.f32.mxu1 %vm457_vm3, %v5798_v4  ;;  %4518 = vmatprep.mubr.msk.f32.mxu0 %vm457_vm3, %v5626_v19 }
  0xa4   : > { %v5856_v45 = vsel %vm615_vm4, %v676_v22, %v677_v34  ;;  %v684_v22 = vrot.slane %v5527_v56, 7 }
  0xa6   : > { %4296 = vmatmul.mubr.msk.f32.gmra.mrb[18].mxu1 %vm457_vm3, %v5810_v1  ;;  %4519 = vmatmul.mubr.msk.f32.vlgmr.msra.gmra.mrb[0].mxu0 %vm457_vm3, %v5641_v36 }
  0xa7   : > { %4567 = vmatpush3.msk.msra.mxu0 %vm762_vm2, %v6546_v46  ;;  %4298 = vmatprep.mubr.msk.f32.mxu1 %vm457_vm3, %v5814_v38  ;;  %v682_v46 = vrot.slane %v5508_v40, 7  ;;  %v687_v40 = vrot.slane %v5532_v3, 7  ;;  %v692_v3 = vrot.slane %v5557_v9, 7 }
  0xa8   : > { %4521 = vmatprep.mubr.msk.f32.mxu0 %vm457_vm3, %v5651_v21  ;;  %4616 = vmatprep.subr.msk.mxu0 %vm762_vm2, %v5820_v54 }
  0xa9   : > { %v5872_v18 = vsel %vm615_vm4, %v681_v53, %v682_v46  ;;  %v5884_v34 = vsel %vm615_vm4, %v682_v46, %v684_v22  ;;  %v5888_v31 = vsel %vm615_vm4, %v686_v25, %v687_v40  ;;  %v691_v53 = vrot.slane %v550_v7, 7  ;;  %v493_v25 = vld [vmem:[#allocation2 + $0x18] sm:$0x1] }
  0xaa   : > { %4299 = vmatmul.mubr.msk.f32.gmra.mrb[20].mxu1 %vm457_vm3, %v5832_v28  ;;  %4522 = vmatmul.mubr.msk.f32.gmra.mrb[2].mxu0 %vm457_vm3, %v5670_v15  ;;  %v5900_v46 = vsel %vm615_vm4, %v687_v40, %v689_v20  ;;  %v694_v22 = vrot.slane %v5576_v62, 7  ;;  %v1301_v20 = vrot.slane %v493_v25, 1 }
  0xab   : > { %4301 = vmatprep.mubr.msk.f32.mxu1 %vm457_vm3, %v5838_v16  ;;  %4524 = vmatprep.mubr.msk.f32.mxu0 %vm457_vm3, %v5677_v47  ;;  %6547 = vst [vmem:[#allocation42_spill] sm:$0xff] %v5900_v46  ;;  %v5904_v7 = vsel %vm615_vm4, %v691_v53, %v692_v3  ;;  %v6550_v53 = vrot.slane %v5153_v6, 1  ;;  %v5941_v6 = vld [vmem:[%s6437_s3 + $0x10] sm:$0xff] }
  0xac   : > { %6548 = vst [vmem:[#allocation43_spill] sm:$0xff] %v5904_v7  ;;  %v5915_v40 = vsel %vm615_vm4, %v692_v3, %v694_v22  ;;  %v6551_v3 = vrot.slane %v5283_v33, 4  ;;  %v554_v33 = vld [vmem:[#allocation2 + $0x200] sm:$0xff]  ;;  %v1708_v22 = vrot.slane %v5734_v30, 7 }
  0xad   : > { %6549 = vst [vmem:[#allocation44_spill] sm:$0xff] %v5915_v40 }
  0xae   : > { %4302 = vmatmul.mubr.msk.f32.gmra.mrb[22].mxu1 %vm457_vm3, %v5852_v17  ;;  %4525 = vmatmul.mubr.msk.f32.gmra.mrb[4].mxu0 %vm457_vm3, %v5689_v29 }
  0xaf   : > { %4304 = vmatprep.mubr.msk.f32.mxu1 %vm457_vm3, %v5856_v45  ;;  %4527 = vmatprep.mubr.msk.f32.mxu0 %vm457_vm3, %v5699_v32 }
  0xb2   : > { %4305 = vmatmul.mubr.msk.f32.gmra.mrb[24].mxu1 %vm457_vm3, %v5868_v11  ;;  %4528 = vmatmul.mubr.msk.f32.gmra.mrb[6].mxu0 %vm457_vm3, %v5718_v55 }
  0xb3   : > { %4307 = vmatprep.mubr.msk.f32.mxu1 %vm457_vm3, %v5872_v18  ;;  %4530 = vmatprep.mubr.msk.f32.mxu0 %vm457_vm3, %v5725_v51 }
  0xb6   : > { %4308 = vmatmul.mubr.msk.f32.gmra.mrb[26].mxu1 %vm457_vm3, %v5884_v34  ;;  %4531 = vmatmul.mubr.msk.f32.gmra.mrb[8].mxu0 %vm457_vm3, %v5741_v57 }
  0xb7   : > { %4310 = vmatprep.mubr.msk.f32.mxu1 %vm457_vm3, %v5888_v31  ;;  %4533 = vmatprep.mubr.msk.f32.mxu0 %vm457_vm3, %v5751_v8 }
  0xba   : > { %4311 = vmatmul.mubr.msk.f32.gmra.mrb[28].mxu1 %vm457_vm3, %v5900_v46  ;;  %4534 = vmatmul.mubr.msk.f32.gmra.mrb[10].mxu0 %vm457_vm3, %v5769_v13 }
  0xbb   : > { %4313 = vmatprep.mubr.msk.f32.mxu1 %vm457_vm3, %v5904_v7  ;;  %4536 = vmatprep.mubr.msk.f32.mxu0 %vm457_vm3, %v5776_v37  ;;  %v1302_v37 = vsel %vm1297_vm5, %v6550_v53, %v1301_v20 }
  0xbe   : > { %4314 = vmatmul.mubr.msk.f32.gmra.mrb[30].mxu1 %vm457_vm3, %v5915_v40  ;;  %4537 = vmatmul.mubr.msk.f32.gmra.mrb[12].mxu0 %vm457_vm3, %v5791_v5 }
  0xbf   : > { %4318 = vmatprep.mubr.msk.f32.mxu1 %vm457_vm3, %v5546_v24  ;;  %4539 = vmatprep.mubr.msk.f32.mxu0 %vm457_vm3, %v5798_v4  ;;  %v5978_v24 = vld [vmem:[#allocation2 + $0x228] sm:$0xff] }
  0xc0   : > { %v2512_v53 = vrot.slane %v5978_v24, 7 }
  0xc2   : > { %4319 = vmatmul.mubr.msk.f32.vlgmr.msra.gmra.mrb[0].mxu1 %vm457_vm3, %v1302_v37  ;;  %4540 = vmatmul.mubr.msk.f32.gmra.mrb[14].mxu0 %vm457_vm3, %v5810_v1  ;;  %v1705_v37 = vrot.slane %v554_v33, 7  ;;  %v6553_v33 = vld [vmem:[#allocation21_spill] sm:$0xff] }
  0xc3   : > { %4321 = vmatprep.mubr.msk.f32.mxu1 %vm457_vm3, %v5419_v43  ;;  %4542 = vmatprep.mubr.msk.f32.mxu0 %vm457_vm3, %v5814_v38  ;;  %v1706_v43 = vrot.slane %v5732_v41, 7 }
  0xc4   : > { %4367 = vmatpush3.msk.msra.mxu1 %vm762_vm2, %v6551_v3  ;;  %v5993_v3 = vld [vmem:[#allocation2 + $0x230] sm:$0xff] }
  0xc5   : > { %4666 = vmatprep.subr.msk.mxu1 %vm762_vm2, %v5941_v6  ;;  %v5990_v25 = vsel %vm615_vm4, %v1705_v37, %v1706_v43  ;;  %v6004_v37 = vsel %vm615_vm4, %v1706_v43, %v1708_v22  ;;  %v6558_v43 = vld [vmem:[#allocation26_spill] sm:$0xff]  ;;  %v6559_v22 = vld [vmem:[#allocation3_spill] sm:$0xff] }
  0xc6   : > { %4322 = vmatmul.mubr.msk.f32.gmra.mrb[2].mxu1 %vm457_vm3, %v5434_v49  ;;  %4543 = vmatmul.mubr.msk.f32.gmra.mrb[16].mxu0 %vm457_vm3, %v5832_v28  ;;  %v558_v49 = vld [vmem:[#allocation2 + $0x220] sm:$0xff]  ;;  %6552 = vst [vmem:[#allocation45_spill] sm:$0xff] %v5990_v25  ;;  %6555 = vst [vmem:[#allocation21_spill] sm:$0xff] %v6004_v37 }
  0xc7   : > { %4324 = vmatprep.mubr.msk.f32.mxu1 %vm457_vm3, %v5442_v58  ;;  %4545 = vmatprep.mubr.msk.f32.mxu0 %vm457_vm3, %v5838_v16  ;;  %v2511_v20 = vrot.slane %v558_v49, 7  ;;  %v2514_v49 = vrot.slane %v5993_v3, 7 }
  0xca   : > { %4325 = vmatmul.mubr.msk.f32.gmra.mrb[4].mxu1 %vm457_vm3, %v5455_v60  ;;  %4546 = vmatmul.mubr.msk.f32.gmra.mrb[18].mxu0 %vm457_vm3, %v5852_v17 }
  0xcb   : > { %4327 = vmatprep.mubr.msk.f32.mxu1 %vm457_vm3, %v5462_v0  ;;  %4548 = vmatprep.mubr.msk.f32.mxu0 %vm457_vm3, %v5856_v45 }
  0xce   : > { %4328 = vmatmul.mubr.msk.f32.gmra.mrb[6].mxu1 %vm457_vm3, %v5482_v14  ;;  %4549 = vmatmul.mubr.msk.f32.gmra.mrb[20].mxu0 %vm457_vm3, %v5868_v11 }
  0xcf   : > { %4330 = vmatprep.mubr.msk.f32.mxu1 %vm457_vm3, %v5489_v23  ;;  %4551 = vmatprep.mubr.msk.f32.mxu0 %vm457_vm3, %v5872_v18 }
  0xd2   : > { %4331 = vmatmul.mubr.msk.f32.gmra.mrb[8].mxu1 %vm457_vm3, %v5506_v35  ;;  %4552 = vmatmul.mubr.msk.f32.gmra.mrb[22].mxu0 %vm457_vm3, %v5884_v34 }
  0xd3   : > { %4333 = vmatprep.mubr.msk.f32.mxu1 %vm457_vm3, %v5511_v44  ;;  %4554 = vmatprep.mubr.msk.f32.mxu0 %vm457_vm3, %v5888_v31 }
  0xd6   : > { %4334 = vmatmul.mubr.msk.f32.gmra.mrb[10].mxu1 %vm457_vm3, %v5530_v61  ;;  %4555 = vmatmul.mubr.msk.f32.gmra.mrb[24].mxu0 %vm457_vm3, %v5900_v46  ;;  %v6554_v46 = vld [vmem:[#allocation22_spill] sm:$0xff] }
  0xd7   : > { %4336 = vmatprep.mubr.msk.f32.mxu1 %vm457_vm3, %v5535_v10  ;;  %4557 = vmatprep.mubr.msk.f32.mxu0 %vm457_vm3, %v5904_v7  ;;  %v2513_v7 = vsel %vm615_vm4, %v2511_v20, %v2512_v53  ;;  %v6556_v10 = vld [vmem:[#allocation23_spill] sm:$0xff]  ;;  %v6560_v20 = vld [vmem:[#allocation28_spill] sm:$0xff] }
  0xda   : > { %4337 = vmatmul.mubr.msk.f32.gmra.mrb[12].mxu1 %vm457_vm3, %v6553_v33  ;;  %4558 = vmatmul.mubr.msk.f32.gmra.mrb[26].mxu0 %vm457_vm3, %v5915_v40  ;;  %v6557_v40 = vld [vmem:[#allocation24_spill] sm:$0xff] }
  0xdb   : > { %4339 = vmatprep.mubr.msk.f32.mxu1 %vm457_vm3, %v6554_v46  ;;  %4560 = vmatprep.mubr.msk.f32.mxu0 %vm457_vm3, %v5990_v25  ;;  %v2515_v25 = vsel %vm615_vm4, %v2512_v53, %v2514_v49  ;;  %v6563_v53 = vld [vmem:[#allocation5_spill] sm:$0xff]  ;;  %v6565_v49 = vld [vmem:[#allocation6_spill] sm:$0xff] }
  0xde   : > { %4340 = vmatmul.mubr.msk.f32.gmra.mrb[14].mxu1 %vm457_vm3, %v6556_v10  ;;  %4561 = vmatmul.mubr.msk.f32.gmra.mrb[28].mxu0 %vm457_vm3, %v6004_v37  ;;  %v6561_v37 = vld [vmem:[#allocation4_spill] sm:$0xff] }
  0xdf   : > { %4342 = vmatprep.mubr.msk.f32.mxu1 %vm457_vm3, %v6557_v40  ;;  %4563 = vmatprep.mubr.msk.f32.mxu0 %vm457_vm3, %v2513_v7  ;;  %v6562_v7 = vld [vmem:[#allocation29_spill] sm:$0xff] }
  0xe2   : > { %4343 = vmatmul.mubr.msk.f32.gmra.mrb[16].mxu1 %vm457_vm3, %v5595_v2  ;;  %4564 = vmatmul.mubr.msk.f32.gmra.mrb[30].mxu0 %vm457_vm3, %v2515_v25  ;;  %v6564_v25 = vld [vmem:[#allocation30_spill] sm:$0xff] }
  0xe3   : > { %4345 = vmatprep.mubr.msk.f32.mxu1 %vm457_vm3, %v6558_v43  ;;  %4568 = vmatprep.mubr.msk.f32.mxu0 %vm457_vm3, %v6559_v22  ;;  %v6566_v22 = vld [vmem:[#allocation31_spill] sm:$0xff] }
  0xe6   : > { %4346 = vmatmul.mubr.msk.f32.gmra.mrb[18].mxu1 %vm457_vm3, %v6560_v20  ;;  %4569 = vmatmul.mubr.msk.f32.vlgmr.msra.gmra.mrb[0].mxu0 %vm457_vm3, %v6561_v37  ;;  %v6567_v20 = vld [vmem:[#allocation7_spill] sm:$0xff]  ;;  %v6568_v37 = vld [vmem:[#allocation32_spill] sm:$0xff] }
  0xe7   : > { %4617 = vmatpush3.msk.msra.mxu0 %vm762_vm2, %v5820_v54  ;;  %4348 = vmatprep.mubr.msk.f32.mxu1 %vm457_vm3, %v6562_v7  ;;  %v6569_v54 = vld [vmem:[#allocation8_spill] sm:$0xff]  ;;  %v6570_v7 = vld [vmem:[#allocation33_spill] sm:$0xff] }
  0xe8   : > { %4571 = vmatprep.mubr.msk.f32.mxu0 %vm457_vm3, %v6563_v53  ;;  %v6571_v53 = vld [vmem:[#allocation9_spill] sm:$0xff] }
  0xea   : > { %4349 = vmatmul.mubr.msk.f32.gmra.mrb[20].mxu1 %vm457_vm3, %v6564_v25  ;;  %4572 = vmatmul.mubr.msk.f32.gmra.mrb[2].mxu0 %vm457_vm3, %v6565_v49  ;;  %v6572_v25 = vld [vmem:[#allocation34_spill] sm:$0xff] }
  0xeb   : > { %4351 = vmatprep.mubr.msk.f32.mxu1 %vm457_vm3, %v6566_v22  ;;  %4574 = vmatprep.mubr.msk.f32.mxu0 %vm457_vm3, %v6567_v20  ;;  %v6573_v49 = vld [vmem:[#allocation10_spill] sm:$0xff]  ;;  %v6574_v22 = vld [vmem:[#allocation35_spill] sm:$0xff] }
  0xec   : > { %v6575_v20 = vld [vmem:[#allocation11_spill] sm:$0xff] }
  0xee   : > { %4352 = vmatmul.mubr.msk.f32.gmra.mrb[22].mxu1 %vm457_vm3, %v6568_v37  ;;  %4575 = vmatmul.mubr.msk.f32.gmra.mrb[4].mxu0 %vm457_vm3, %v6569_v54  ;;  %v6576_v37 = vld [vmem:[#allocation36_spill] sm:$0xff] }
  0xef   : > { %4354 = vmatprep.mubr.msk.f32.mxu1 %vm457_vm3, %v6570_v7  ;;  %4577 = vmatprep.mubr.msk.f32.mxu0 %vm457_vm3, %v6571_v53  ;;  %v6577_v54 = vld [vmem:[#allocation12_spill] sm:$0xff]  ;;  %v6578_v7 = vld [vmem:[#allocation37_spill] sm:$0xff] }
  0xf0   : > { %v6579_v53 = vld [vmem:[#allocation13_spill] sm:$0xff] }
  0xf2   : > { %4355 = vmatmul.mubr.msk.f32.gmra.mrb[24].mxu1 %vm457_vm3, %v6572_v25  ;;  %4578 = vmatmul.mubr.msk.f32.gmra.mrb[6].mxu0 %vm457_vm3, %v6573_v49  ;;  %v6580_v25 = vld [vmem:[#allocation38_spill] sm:$0xff] }
  0xf3   : > { %4357 = vmatprep.mubr.msk.f32.mxu1 %vm457_vm3, %v6574_v22  ;;  %4580 = vmatprep.mubr.msk.f32.mxu0 %vm457_vm3, %v6575_v20  ;;  %v6581_v49 = vld [vmem:[#allocation14_spill] sm:$0xff]  ;;  %v6582_v20 = vld [vmem:[#allocation15_spill] sm:$0xff] }
  0xf6   : > { %4358 = vmatmul.mubr.msk.f32.gmra.mrb[26].mxu1 %vm457_vm3, %v6576_v37  ;;  %4581 = vmatmul.mubr.msk.f32.gmra.mrb[8].mxu0 %vm457_vm3, %v6577_v54  ;;  %v6583_v54 = vld [vmem:[#allocation25_spill] sm:$0xff] }
  0xf7   : > { %4360 = vmatprep.mubr.msk.f32.mxu1 %vm457_vm3, %v6578_v7  ;;  %4583 = vmatprep.mubr.msk.f32.mxu0 %vm457_vm3, %v6579_v53  ;;  %v6584_v53 = vld [vmem:[#allocation27_spill] sm:$0xff] }
  0xfa   : > { %4361 = vmatmul.mubr.msk.f32.gmra.mrb[28].mxu1 %vm457_vm3, %v6580_v25  ;;  %4584 = vmatmul.mubr.msk.f32.gmra.mrb[10].mxu0 %vm457_vm3, %v6581_v49 }
  0xfb   : > { %4363 = vmatprep.mubr.msk.f32.mxu1 %vm457_vm3, %v5755_v50  ;;  %4586 = vmatprep.mubr.msk.f32.mxu0 %vm457_vm3, %v6582_v20 }
  0xfe   : > { %4364 = vmatmul.mubr.msk.f32.gmra.mrb[30].mxu1 %vm457_vm3, %v5772_v26  ;;  %4587 = vmatmul.mubr.msk.f32.gmra.mrb[12].mxu0 %vm457_vm3, %v5414_v39  ;;  %v6585_v39 = vld [vmem:[#allocation16_spill] sm:$0xff] }
  0xff   : > { %4368 = vmatprep.mubr.msk.f32.mxu1 %vm457_vm3, %v6583_v54  ;;  %4589 = vmatprep.mubr.msk.f32.mxu0 %vm457_vm3, %v5416_v42 }
 0x102   : > { %4369 = vmatmul.mubr.msk.f32.vlgmr.msra.gmra.mrb[0].mxu1 %vm457_vm3, %v6584_v53  ;;  %4590 = vmatmul.mubr.msk.f32.gmra.mrb[14].mxu0 %vm457_vm3, %v5431_v48 }
 0x103   : > { %4371 = vmatprep.mubr.msk.f32.mxu1 %vm457_vm3, %v5626_v19  ;;  %4592 = vmatprep.mubr.msk.f32.mxu0 %vm457_vm3, %v5437_v52  ;;  %v6586_v19 = vld [vmem:[#allocation17_spill] sm:$0xff] }
 0x104   : > { %4667 = vmatpush3.msk.msra.mxu1 %vm762_vm2, %v5941_v6 }
 0x106   : > { %4372 = vmatmul.mubr.msk.f32.gmra.mrb[2].mxu1 %vm457_vm3, %v5641_v36  ;;  %4593 = vmatmul.mubr.msk.f32.gmra.mrb[16].mxu0 %vm457_vm3, %v5452_v59  ;;  %v6587_v36 = vld [vmem:[#allocation18_spill] sm:$0xff] }
 0x107   : > { %4374 = vmatprep.mubr.msk.f32.mxu1 %vm457_vm3, %v5651_v21  ;;  %4595 = vmatprep.mubr.msk.f32.mxu0 %vm457_vm3, %v5459_v63  ;;  %v6589_v21 = vld [vmem:[#allocation39_spill] sm:$0xff] }
 0x10a   : > { %4375 = vmatmul.mubr.msk.f32.gmra.mrb[4].mxu1 %vm457_vm3, %v5670_v15  ;;  %4596 = vmatmul.mubr.msk.f32.gmra.mrb[18].mxu0 %vm457_vm3, %v5479_v12  ;;  %v6604_v15 = vld [vmem:[#allocation41_spill] sm:$0xff] }
 0x10b   : > { %4377 = vmatprep.mubr.msk.f32.mxu1 %vm457_vm3, %v5677_v47  ;;  %4598 = vmatprep.mubr.msk.f32.mxu0 %vm457_vm3, %v6585_v39  ;;  %v6588_v47 = vld [vmem:[#allocation19_spill] sm:$0xff] }
 0x10e   : > { %4378 = vmatmul.mubr.msk.f32.gmra.mrb[6].mxu1 %vm457_vm3, %v5689_v29  ;;  %4599 = vmatmul.mubr.msk.f32.gmra.mrb[20].mxu0 %vm457_vm3, %v6586_v19 }
 0x10f   : > { %4380 = vmatprep.mubr.msk.f32.mxu1 %vm457_vm3, %v5699_v32  ;;  %4601 = vmatprep.mubr.msk.f32.mxu0 %vm457_vm3, %v6587_v36 }
 0x112   : > { %4381 = vmatmul.mubr.msk.f32.gmra.mrb[8].mxu1 %vm457_vm3, %v5718_v55  ;;  %4602 = vmatmul.mubr.msk.f32.gmra.mrb[22].mxu0 %vm457_vm3, %v5527_v56 }
 0x113   : > { %4383 = vmatprep.mubr.msk.f32.mxu1 %vm457_vm3, %v5725_v51  ;;  %4604 = vmatprep.mubr.msk.f32.mxu0 %vm457_vm3, %v6588_v47 }
 0x116   : > { %4384 = vmatmul.mubr.msk.f32.gmra.mrb[10].mxu1 %vm457_vm3, %v5741_v57  ;;  %4605 = vmatmul.mubr.msk.f32.gmra.mrb[24].mxu0 %vm457_vm3, %v5552_v27 }
 0x117   : > { %4386 = vmatprep.mubr.msk.f32.mxu1 %vm457_vm3, %v5751_v8  ;;  %4607 = vmatprep.mubr.msk.f32.mxu0 %vm457_vm3, %v5557_v9 }
 0x11a   : > { %4387 = vmatmul.mubr.msk.f32.gmra.mrb[12].mxu1 %vm457_vm3, %v5769_v13  ;;  %4608 = vmatmul.mubr.msk.f32.gmra.mrb[26].mxu0 %vm457_vm3, %v5576_v62 }
 0x11b   : > { %4389 = vmatprep.mubr.msk.f32.mxu1 %vm457_vm3, %v6589_v21  ;;  %4610 = vmatprep.mubr.msk.f32.mxu0 %vm457_vm3, %v5732_v41 }
 0x11e   : > { %4390 = vmatmul.mubr.msk.f32.gmra.mrb[14].mxu1 %vm457_vm3, %v5791_v5  ;;  %4611 = vmatmul.mubr.msk.f32.gmra.mrb[28].mxu0 %vm457_vm3, %v5734_v30 }
 0x11f   : > { %4392 = vmatprep.mubr.msk.f32.mxu1 %vm457_vm3, %v5798_v4  ;;  %4613 = vmatprep.mubr.msk.f32.mxu0 %vm457_vm3, %v5978_v24 }
 0x122   : > { %4393 = vmatmul.mubr.msk.f32.gmra.mrb[16].mxu1 %vm457_vm3, %v5810_v1  ;;  %4614 = vmatmul.mubr.msk.f32.gmra.mrb[30].mxu0 %vm457_vm3, %v5993_v3 }
 0x123   : > { %4395 = vmatprep.mubr.msk.f32.mxu1 %vm457_vm3, %v5814_v38  ;;  %4618 = vmatprep.mubr.msk.f32.mxu0 %vm457_vm3, %v5442_v58  ;;  %v6590_v58 = vld [vmem:[#allocation20_spill] sm:$0xff] }
 0x126   : > { %4396 = vmatmul.mubr.msk.f32.gmra.mrb[18].mxu1 %vm457_vm3, %v5832_v28  ;;  %4619 = vmatmul.mubr.msk.f32.vlgmr.msra.gmra.mrb[0].mxu0 %vm457_vm3, %v5455_v60  ;;  %v6591_v60 = vld [vmem:[#allocation42_spill] sm:$0xff] }
 0x127   : > { %4398 = vmatprep.mubr.msk.f32.mxu1 %vm457_vm3, %v5838_v16  ;;  %4621 = vmatprep.mubr.msk.f32.mxu0 %vm457_vm3, %v5462_v0  ;;  %v6592_v0 = vld [vmem:[#allocation43_spill] sm:$0xff] }
 0x12a   : > { %4399 = vmatmul.mubr.msk.f32.gmra.mrb[20].mxu1 %vm457_vm3, %v5852_v17  ;;  %4622 = vmatmul.mubr.msk.f32.gmra.mrb[2].mxu0 %vm457_vm3, %v5482_v14  ;;  %v6593_v14 = vld [vmem:[#allocation44_spill] sm:$0xff] }
 0x12b   : > { %4401 = vmatprep.mubr.msk.f32.mxu1 %vm457_vm3, %v5856_v45  ;;  %4624 = vmatprep.mubr.msk.f32.mxu0 %vm457_vm3, %v5489_v23  ;;  %v6594_v23 = vld [vmem:[#allocation45_spill] sm:$0xff] }
 0x12e   : > { %4402 = vmatmul.mubr.msk.f32.gmra.mrb[22].mxu1 %vm457_vm3, %v5868_v11  ;;  %4625 = vmatmul.mubr.msk.f32.gmra.mrb[4].mxu0 %vm457_vm3, %v5506_v35  ;;  %v6595_v35 = vld [vmem:[#allocation21_spill] sm:$0xff] }
 0x12f   : > { %4404 = vmatprep.mubr.msk.f32.mxu1 %vm457_vm3, %v5872_v18  ;;  %4627 = vmatprep.mubr.msk.f32.mxu0 %vm457_vm3, %v5511_v44  ;;  %v6596_v44 = vld [vmem:[#allocation28_spill] sm:$0xff] }
 0x132   : > { %4405 = vmatmul.mubr.msk.f32.gmra.mrb[24].mxu1 %vm457_vm3, %v5884_v34  ;;  %4628 = vmatmul.mubr.msk.f32.gmra.mrb[6].mxu0 %vm457_vm3, %v5530_v61  ;;  %v6597_v61 = vld [vmem:[#allocation29_spill] sm:$0xff] }
 0x133   : > { %4407 = vmatprep.mubr.msk.f32.mxu1 %vm457_vm3, %v5888_v31  ;;  %4630 = vmatprep.mubr.msk.f32.mxu0 %vm457_vm3, %v6590_v58 }
 0x136   : > { %4408 = vmatmul.mubr.msk.f32.gmra.mrb[26].mxu1 %vm457_vm3, %v6591_v60  ;;  %4631 = vmatmul.mubr.msk.f32.gmra.mrb[8].mxu0 %vm457_vm3, %v6553_v33 }
 0x137   : > { %4410 = vmatprep.mubr.msk.f32.mxu1 %vm457_vm3, %v6592_v0  ;;  %4633 = vmatprep.mubr.msk.f32.mxu0 %vm457_vm3, %v6554_v46 }
 0x13a   : > { %4411 = vmatmul.mubr.msk.f32.gmra.mrb[28].mxu1 %vm457_vm3, %v6593_v14  ;;  %4634 = vmatmul.mubr.msk.f32.gmra.mrb[10].mxu0 %vm457_vm3, %v6556_v10  ;;  %v6598_v10 = vld [vmem:[#allocation30_spill] sm:$0xff] }
 0x13b   : > { %4413 = vmatprep.mubr.msk.f32.mxu1 %vm457_vm3, %v6594_v23  ;;  %4636 = vmatprep.mubr.msk.f32.mxu0 %vm457_vm3, %v6557_v40 }
 0x13e   : > { %4414 = vmatmul.mubr.msk.f32.gmra.mrb[30].mxu1 %vm457_vm3, %v6595_v35  ;;  %4637 = vmatmul.mubr.msk.f32.gmra.mrb[12].mxu0 %vm457_vm3, %v5595_v2 }
 0x13f   : > { %4442 = vmatprep.mubr.msk.f32.mxu1 %vm457_vm3, %v5416_v42  ;;  %4639 = vmatprep.mubr.msk.f32.mxu0 %vm457_vm3, %v6558_v43  ;;  %v6599_v42 = vld [vmem:[#allocation31_spill] sm:$0xff] }
 0x142   : > { %4443 = vmatmul.mubr.msk.f32.vlgmr.msra.gmra.mrb[16].mxu1 %vm457_vm3, %v5431_v48  ;;  %4640 = vmatmul.mubr.msk.f32.gmra.mrb[14].mxu0 %vm457_vm3, %v6596_v44  ;;  %v6600_v48 = vld [vmem:[#allocation32_spill] sm:$0xff] }
 0x143   : > { %4445 = vmatprep.mubr.msk.f32.mxu1 %vm457_vm3, %v5437_v52  ;;  %4642 = vmatprep.mubr.msk.f32.mxu0 %vm457_vm3, %v6597_v61  ;;  %v6601_v52 = vld [vmem:[#allocation33_spill] sm:$0xff] }
 0x146   : > { %4446 = vmatmul.mubr.msk.f32.gmra.mrb[18].mxu1 %vm457_vm3, %v5452_v59  ;;  %4643 = vmatmul.mubr.msk.f32.gmra.mrb[16].mxu0 %vm457_vm3, %v6598_v10  ;;  %v6602_v59 = vld [vmem:[#allocation34_spill] sm:$0xff] }
 0x147   : > { %4448 = vmatprep.mubr.msk.f32.mxu1 %vm457_vm3, %v5459_v63  ;;  %4645 = vmatprep.mubr.msk.f32.mxu0 %vm457_vm3, %v6599_v42  ;;  %v3045_v63 = vrot.slane %v5978_v24, 1 }
 0x14a   : > { %4449 = vmatmul.mubr.msk.f32.gmra.mrb[20].mxu1 %vm457_vm3, %v5479_v12  ;;  %4646 = vmatmul.mubr.msk.f32.gmra.mrb[18].mxu0 %vm457_vm3, %v6600_v48  ;;  %v3046_v12 = vrot.slane %v5993_v3, 1 }
 0x14b   : > { %4451 = vmatprep.mubr.msk.f32.mxu1 %vm457_vm3, %v6585_v39  ;;  %4648 = vmatprep.mubr.msk.f32.mxu0 %vm457_vm3, %v6601_v52 }
 0x14c   : > { %v3047_v2 = vsel %vm1297_vm5, %v3045_v63, %v3046_v12 }
 0x14e   : > { %4452 = vmatmul.mubr.msk.f32.gmra.mrb[22].mxu1 %vm457_vm3, %v6586_v19  ;;  %4649 = vmatmul.mubr.msk.f32.gmra.mrb[20].mxu0 %vm457_vm3, %v6602_v59 }
 0x14f   : > { %4454 = vmatprep.mubr.msk.f32.mxu1 %vm457_vm3, %v6587_v36  ;;  %4651 = vmatprep.mubr.msk.f32.mxu0 %vm457_vm3, %v6574_v22 }
 0x152   : > { %4455 = vmatmul.mubr.msk.f32.gmra.mrb[24].mxu1 %vm457_vm3, %v5527_v56  ;;  %4652 = vmatmul.mubr.msk.f32.gmra.mrb[22].mxu0 %vm457_vm3, %v6576_v37  ;;  %v561_v56 = vld [vmem:[#allocation2 + $0x238] sm:$0x1] }
 0x153   : > { %4457 = vmatprep.mubr.msk.f32.mxu1 %vm457_vm3, %v6588_v47  ;;  %4654 = vmatprep.mubr.msk.f32.mxu0 %vm457_vm3, %v6578_v7 }
 0x156   : > { %4458 = vmatmul.mubr.msk.f32.gmra.mrb[26].mxu1 %vm457_vm3, %v5552_v27  ;;  %4655 = vmatmul.mubr.msk.f32.gmra.mrb[24].mxu0 %vm457_vm3, %v6580_v25  ;;  %v6603_v27 = vld [vmem:[#allocation40_spill] sm:$0xff] }
 0x157   : > { %4460 = vmatprep.mubr.msk.f32.mxu1 %vm457_vm3, %v5557_v9  ;;  %4657 = vmatprep.mubr.msk.f32.mxu0 %vm457_vm3, %v5755_v50  ;;  %v3048_v9 = vrot.slane %v561_v56, 1 }
 0x15a   : > { %4461 = vmatmul.mubr.msk.f32.gmra.mrb[28].mxu1 %vm457_vm3, %v5576_v62  ;;  %4658 = vmatmul.mubr.msk.f32.gmra.mrb[26].mxu0 %vm457_vm3, %v5772_v26  ;;  %v3049_v62 = vsel %vm1297_vm5, %v3046_v12, %v3048_v9 }
 0x15b   : > { %4463 = vmatprep.mubr.msk.f32.mxu1 %vm457_vm3, %v5732_v41  ;;  %4660 = vmatprep.mubr.msk.f32.mxu0 %vm457_vm3, %v6603_v27 }
 0x15e   : > { %4464 = vmatmul.mubr.msk.f32.gmra.mrb[30].mxu1 %vm457_vm3, %v5734_v30  ;;  %4661 = vmatmul.mubr.msk.f32.gmra.mrb[28].mxu0 %vm457_vm3, %v6604_v15 }
 0x15f   : > { %4663 = vmatprep.mubr.msk.f32.mxu0 %vm457_vm3, %v3047_v2 }
 0x162   : > { %4664 = vmatmul.mubr.msk.f32.gmra.mrb[30].mxu0 %vm457_vm3, %v3049_v62 }
 0x1d5   : > { %v4370_v29 = vpop.f32.mrb[0].mxu1 }
 0x1d6   : > { %v1783_v51 = vpop.f32.mrb[1].mxu1 }
 0x1d9   : > { %v4373_v32 = vpop.f32.mrb[2].mxu1 }
 0x1da   : > { %v1793_v55 = vpop.f32.mrb[3].mxu1 }
 0x1dd   : > { %v4376_v50 = vpop.f32.mrb[4].mxu1 }
 0x1de   : > { %v1803_v41 = vpop.f32.mrb[5].mxu1 }
 0x1e1   : > { %v4379_v57 = vpop.f32.mrb[6].mxu1 }
 0x1e2   : > { %v1813_v8 = vpop.f32.mrb[7].mxu1 }
 0x1e5   : > { %v6277_v13 = vpop.f32.mrb[8].mxu1 }
 0x1e6   : > { %v6279_v30 = vpop.f32.mrb[9].mxu1 }
 0x1e9   : > { %v6281_v26 = vpop.f32.mrb[10].mxu1 }
 0x1ea   : > { %v6283_v5 = vpop.f32.mrb[11].mxu1 }
 0x1ed   : > { %v6285_v4 = vpop.f32.mrb[12].mxu1 }
 0x1ee   : > { %v6287_v1 = vpop.f32.mrb[13].mxu1 }
 0x1f1   : > { %v6289_v38 = vpop.f32.mrb[14].mxu1 }
 0x1f2   : > { %v6291_v28 = vpop.f32.mrb[15].mxu1 }
 0x1f9   : > { %v4620_v16 = vpop.f32.mrb[0].mxu0 }
 0x1fa   : > { %v4668_v17 = vadd.f32 %v4620_v16, %v4370_v29  ;;  %v3123_v45 = vpop.f32.mrb[1].mxu0 }
 0x1fb   : > { %v4669_v11 = vadd.f32 %v3123_v45, %v1783_v51 }
 0x1fc   : > { %v3315_v18 = vsel %vm457_vm3, %v4668_v17, 0.0  ;;  %v3384_v34 = vmul.f32 %v4668_v17, %v4668_v17  ;;  %3488 = vst.msk [vmem:[%s4989_s28 + $0x8] sm:$0xff] %vm457_vm3, %v4668_v17 }
 0x1fd   : > { %v3314_v31 = vsel %vm457_vm3, %v4669_v11, 0.0  ;;  %v3383_v46 = vmul.f32 %v4669_v11, %v4669_v11  ;;  %3487 = vst.msk [vmem:[%s4989_s28] sm:$0xff] %vm457_vm3, %v4669_v11  ;;  %v4623_v40 = vpop.f32.mrb[2].mxu0 }
 0x1fe   : > { %v3416_v6 = vsel %vm457_vm3, %v3384_v34, 0.0  ;;  %v3316_v24 = vadd.f32 %v3315_v18, %v3314_v31  ;;  %v4670_v3 = vadd.f32 %v4623_v40, %v4373_v32  ;;  %v3133_v33 = vpop.f32.mrb[3].mxu0 }
 0x1ff   : > { %v3415_v43 = vsel %vm457_vm3, %v3383_v46, 0.0  ;;  %v4671_v7 = vadd.f32 %v3133_v33, %v1793_v55 }
 0x200   : > { %v3417_v25 = vadd.f32 %v3416_v6, %v3415_v43  ;;  %3490 = vst.msk [vmem:[%s4989_s28 + $0x18] sm:$0xff] %vm457_vm3, %v4670_v3  ;;  %v3386_v22 = vmul.f32 %v4670_v3, %v4670_v3  ;;  %v3319_v19 = vsel %vm457_vm3, %v4670_v3, 0.0 }
 0x201   : > { %v3317_v37 = vsel %vm457_vm3, %v4671_v7, 0.0  ;;  %v3385_v49 = vmul.f32 %v4671_v7, %v4671_v7  ;;  %3489 = vst.msk [vmem:[%s4989_s28 + $0x10] sm:$0xff] %vm457_vm3, %v4671_v7  ;;  %v4626_v20 = vpop.f32.mrb[4].mxu0 }
 0x202   : > { %v3318_v54 = vadd.f32 %v3317_v37, %v3316_v24  ;;  %v4672_v53 = vadd.f32 %v4626_v20, %v4376_v50  ;;  %v3143_v39 = vpop.f32.mrb[5].mxu0  ;;  %v3420_v60 = vsel %vm457_vm3, %v3386_v22, 0.0 }
 0x203   : > { %v3418_v36 = vsel %vm457_vm3, %v3385_v49, 0.0  ;;  %v4673_v47 = vadd.f32 %v3143_v39, %v1803_v41 }
 0x204   : > { %v3419_v21 = vadd.f32 %v3418_v36, %v3417_v25  ;;  %3492 = vst.msk [vmem:[%s4989_s28 + $0x28] sm:$0xff] %vm457_vm3, %v4672_v53  ;;  %v3320_v58 = vadd.f32 %v3319_v19, %v3318_v54  ;;  %v3388_v0 = vmul.f32 %v4672_v53, %v4672_v53  ;;  %v3323_v48 = vsel %vm457_vm3, %v4672_v53, 0.0 }
 0x205   : > { %v3321_v14 = vsel %vm457_vm3, %v4673_v47, 0.0  ;;  %v3387_v23 = vmul.f32 %v4673_v47, %v4673_v47  ;;  %3491 = vst.msk [vmem:[%s4989_s28 + $0x20] sm:$0xff] %vm457_vm3, %v4673_v47  ;;  %v4629_v35 = vpop.f32.mrb[6].mxu0 }
 0x206   : > { %v3322_v44 = vadd.f32 %v3321_v14, %v3320_v58  ;;  %v3421_v61 = vadd.f32 %v3420_v60, %v3419_v21  ;;  %v4674_v10 = vadd.f32 %v4629_v35, %v4379_v57  ;;  %v3153_v42 = vpop.f32.mrb[7].mxu0  ;;  %v3424_v56 = vsel %vm457_vm3, %v3388_v0, 0.0 }
 0x207   : > { %v3422_v52 = vsel %vm457_vm3, %v3387_v23, 0.0  ;;  %v4675_v59 = vadd.f32 %v3153_v42, %v1813_v8 }
 0x208   : > { %v3423_v63 = vadd.f32 %v3422_v52, %v3421_v61  ;;  %3494 = vst.msk [vmem:[%s4989_s28 + $0x38] sm:$0xff] %vm457_vm3, %v4674_v10  ;;  %v3324_v12 = vadd.f32 %v3323_v48, %v3322_v44  ;;  %v3390_v27 = vmul.f32 %v4674_v10, %v4674_v10  ;;  %v3327_v55 = vsel %vm457_vm3, %v4674_v10, 0.0 }
 0x209   : > { %v3325_v9 = vsel %vm457_vm3, %v4675_v59, 0.0  ;;  %v3389_v2 = vmul.f32 %v4675_v59, %v4675_v59  ;;  %3493 = vst.msk [vmem:[%s4989_s28 + $0x30] sm:$0xff] %vm457_vm3, %v4675_v59  ;;  %v4632_v15 = vpop.f32.mrb[8].mxu0 }
 0x20a   : > { %v3326_v62 = vadd.f32 %v3325_v9, %v3324_v12  ;;  %v3425_v29 = vadd.f32 %v3424_v56, %v3423_v63  ;;  %v4676_v51 = vadd.f32 %v4632_v15, %v6277_v13  ;;  %v3163_v32 = vpop.f32.mrb[9].mxu0  ;;  %v3428_v16 = vsel %vm457_vm3, %v3390_v27, 0.0 }
 0x20b   : > { %v3426_v50 = vsel %vm457_vm3, %v3389_v2, 0.0  ;;  %v4677_v41 = vadd.f32 %v3163_v32, %v6279_v30 }
 0x20c   : > { %v3427_v57 = vadd.f32 %v3426_v50, %v3425_v29  ;;  %3496 = vst.msk [vmem:[%s4989_s28 + $0x48] sm:$0xff] %vm457_vm3, %v4676_v51  ;;  %v3328_v8 = vadd.f32 %v3327_v55, %v3326_v62  ;;  %v3392_v17 = vmul.f32 %v4676_v51, %v4676_v51  ;;  %v3331_v46 = vsel %vm457_vm3, %v4676_v51, 0.0 }
 0x20d   : > { %v3329_v45 = vsel %vm457_vm3, %v4677_v41, 0.0  ;;  %v3391_v11 = vmul.f32 %v4677_v41, %v4677_v41  ;;  %3495 = vst.msk [vmem:[%s4989_s28 + $0x40] sm:$0xff] %vm457_vm3, %v4677_v41  ;;  %v4635_v13 = vpop.f32.mrb[10].mxu0 }
 0x20e   : > { %v3330_v18 = vadd.f32 %v3329_v45, %v3328_v8  ;;  %v3429_v34 = vadd.f32 %v3428_v16, %v3427_v57  ;;  %v4678_v31 = vadd.f32 %v4635_v13, %v6281_v26  ;;  %v3173_v30 = vpop.f32.mrb[11].mxu0  ;;  %v3432_v33 = vsel %vm457_vm3, %v3392_v17, 0.0 }
 0x20f   : > { %v3430_v40 = vsel %vm457_vm3, %v3391_v11, 0.0  ;;  %v4679_v6 = vadd.f32 %v3173_v30, %v6283_v5 }
 0x210   : > { %v3431_v24 = vadd.f32 %v3430_v40, %v3429_v34  ;;  %3498 = vst.msk [vmem:[%s4989_s28 + $0x58] sm:$0xff] %vm457_vm3, %v4678_v31  ;;  %v3332_v3 = vadd.f32 %v3331_v46, %v3330_v18  ;;  %v3394_v43 = vmul.f32 %v4678_v31, %v4678_v31  ;;  %v3335_v20 = vsel %vm457_vm3, %v4678_v31, 0.0 }
 0x211   : > { %v3333_v7 = vsel %vm457_vm3, %v4679_v6, 0.0  ;;  %v3393_v25 = vmul.f32 %v4679_v6, %v4679_v6  ;;  %3497 = vst.msk [vmem:[%s4989_s28 + $0x50] sm:$0xff] %vm457_vm3, %v4679_v6  ;;  %v4638_v26 = vpop.f32.mrb[12].mxu0 }
 0x212   : > { %v3334_v22 = vadd.f32 %v3333_v7, %v3332_v3  ;;  %v3433_v37 = vadd.f32 %v3432_v33, %v3431_v24  ;;  %v4680_v49 = vadd.f32 %v4638_v26, %v6285_v4  ;;  %v3183_v5 = vpop.f32.mrb[13].mxu0  ;;  %v3436_v36 = vsel %vm457_vm3, %v3394_v43, 0.0 }
 0x213   : > { %v3434_v54 = vsel %vm457_vm3, %v3393_v25, 0.0  ;;  %v4681_v53 = vadd.f32 %v3183_v5, %v6287_v1 }
 0x214   : > { %v3435_v39 = vadd.f32 %v3434_v54, %v3433_v37  ;;  %3500 = vst.msk [vmem:[%s4989_s28 + $0x68] sm:$0xff] %vm457_vm3, %v4680_v49  ;;  %v3336_v19 = vadd.f32 %v3335_v20, %v3334_v22  ;;  %v3396_v47 = vmul.f32 %v4680_v49, %v4680_v49  ;;  %v3339_v44 = vsel %vm457_vm3, %v4680_v49, 0.0 }
 0x215   : > { %v3337_v21 = vsel %vm457_vm3, %v4681_v53, 0.0  ;;  %v3395_v58 = vmul.f32 %v4681_v53, %v4681_v53  ;;  %3499 = vst.msk [vmem:[%s4989_s28 + $0x60] sm:$0xff] %vm457_vm3, %v4681_v53  ;;  %v4444_v4 = vpop.f32.mrb[16].mxu1  ;;  %v4641_v60 = vpop.f32.mrb[14].mxu0 }
 0x216   : > { %v3338_v0 = vadd.f32 %v3337_v21, %v3336_v19  ;;  %v3437_v14 = vadd.f32 %v3436_v36, %v3435_v39  ;;  %v4682_v1 = vadd.f32 %v4641_v60, %v6289_v38  ;;  %v2127_v23 = vpop.f32.mrb[17].mxu1  ;;  %v3193_v35 = vpop.f32.mrb[15].mxu0  ;;  %v3440_v52 = vsel %vm457_vm3, %v3396_v47, 0.0 }
 0x217   : > { %v3438_v61 = vsel %vm457_vm3, %v3395_v58, 0.0  ;;  %v4683_v10 = vadd.f32 %v3193_v35, %v6291_v28 }
 0x218   : > { %v3439_v42 = vadd.f32 %v3438_v61, %v3437_v14  ;;  %3502 = vst.msk [vmem:[%s4989_s28 + $0x78] sm:$0xff] %vm457_vm3, %v4682_v1  ;;  %v3340_v48 = vadd.f32 %v3339_v44, %v3338_v0  ;;  %v3398_v59 = vmul.f32 %v4682_v1, %v4682_v1  ;;  %v3343_v62 = vsel %vm457_vm3, %v4682_v1, 0.0 }
 0x219   : > { %v3341_v63 = vsel %vm457_vm3, %v4683_v10, 0.0  ;;  %v3397_v12 = vmul.f32 %v4683_v10, %v4683_v10  ;;  %3501 = vst.msk [vmem:[%s4989_s28 + $0x70] sm:$0xff] %vm457_vm3, %v4683_v10  ;;  %v4447_v38 = vpop.f32.mrb[18].mxu1  ;;  %v4644_v56 = vpop.f32.mrb[16].mxu0 }
 0x21a   : > { %v3342_v27 = vadd.f32 %v3341_v63, %v3340_v48  ;;  %v3441_v9 = vadd.f32 %v3440_v52, %v3439_v42  ;;  %v4684_v2 = vadd.f32 %v4644_v56, %v4444_v4  ;;  %v2137_v28 = vpop.f32.mrb[19].mxu1  ;;  %v3203_v15 = vpop.f32.mrb[17].mxu0  ;;  %v3444_v50 = vsel %vm457_vm3, %v3398_v59, 0.0 }
 0x21b   : > { %v3442_v29 = vsel %vm457_vm3, %v3397_v12, 0.0  ;;  %v4685_v51 = vadd.f32 %v3203_v15, %v2127_v23 }
 0x21c   : > { %v3443_v32 = vadd.f32 %v3442_v29, %v3441_v9  ;;  %3504 = vst.msk [vmem:[%s4989_s28 + $0x88] sm:$0xff] %vm457_vm3, %v4684_v2  ;;  %v3344_v55 = vadd.f32 %v3343_v62, %v3342_v27  ;;  %v3400_v41 = vmul.f32 %v4684_v2, %v4684_v2  ;;  %v3347_v31 = vsel %vm457_vm3, %v4684_v2, 0.0 }
 0x21d   : > { %v3345_v57 = vsel %vm457_vm3, %v4685_v51, 0.0  ;;  %v3399_v8 = vmul.f32 %v4685_v51, %v4685_v51  ;;  %3503 = vst.msk [vmem:[%s4989_s28 + $0x80] sm:$0xff] %vm457_vm3, %v4685_v51  ;;  %v4450_v16 = vpop.f32.mrb[20].mxu1  ;;  %v4647_v17 = vpop.f32.mrb[18].mxu0 }
 0x21e   : > { %v3346_v45 = vadd.f32 %v3345_v57, %v3344_v55  ;;  %v3445_v11 = vadd.f32 %v3444_v50, %v3443_v32  ;;  %v4686_v13 = vadd.f32 %v4647_v17, %v4447_v38  ;;  %v2147_v18 = vpop.f32.mrb[21].mxu1  ;;  %v3213_v34 = vpop.f32.mrb[19].mxu0  ;;  %v3448_v24 = vsel %vm457_vm3, %v3400_v41, 0.0 }
 0x21f   : > { %v3446_v30 = vsel %vm457_vm3, %v3399_v8, 0.0  ;;  %v4687_v46 = vadd.f32 %v3213_v34, %v2137_v28 }
 0x220   : > { %v3447_v40 = vadd.f32 %v3446_v30, %v3445_v11  ;;  %3506 = vst.msk [vmem:[%s4989_s28 + $0x98] sm:$0xff] %vm457_vm3, %v4686_v13  ;;  %v3348_v6 = vadd.f32 %v3347_v31, %v3346_v45  ;;  %v3402_v3 = vmul.f32 %v4686_v13, %v4686_v13  ;;  %v3351_v20 = vsel %vm457_vm3, %v4686_v13, 0.0 }
 0x221   : > { %v3349_v33 = vsel %vm457_vm3, %v4687_v46, 0.0  ;;  %v3401_v43 = vmul.f32 %v4687_v46, %v4687_v46  ;;  %3505 = vst.msk [vmem:[%s4989_s28 + $0x90] sm:$0xff] %vm457_vm3, %v4687_v46  ;;  %v4453_v7 = vpop.f32.mrb[22].mxu1  ;;  %v4650_v25 = vpop.f32.mrb[20].mxu0 }
 0x222   : > { %v3350_v26 = vadd.f32 %v3349_v33, %v3348_v6  ;;  %v3449_v22 = vadd.f32 %v3448_v24, %v3447_v40  ;;  %v4688_v37 = vadd.f32 %v4650_v25, %v4450_v16  ;;  %v2157_v49 = vpop.f32.mrb[23].mxu1  ;;  %v3223_v5 = vpop.f32.mrb[21].mxu0  ;;  %v3452_v36 = vsel %vm457_vm3, %v3402_v3, 0.0 }
 0x223   : > { %v3450_v54 = vsel %vm457_vm3, %v3401_v43, 0.0  ;;  %v4689_v53 = vadd.f32 %v3223_v5, %v2147_v18 }
 0x224   : > { %v3451_v39 = vadd.f32 %v3450_v54, %v3449_v22  ;;  %3508 = vst.msk [vmem:[%s4989_s28 + $0xa8] sm:$0xff] %vm457_vm3, %v4688_v37  ;;  %v3352_v19 = vadd.f32 %v3351_v20, %v3350_v26  ;;  %v3404_v47 = vmul.f32 %v4688_v37, %v4688_v37  ;;  %v3355_v44 = vsel %vm457_vm3, %v4688_v37, 0.0 }
 0x225   : > { %v3353_v21 = vsel %vm457_vm3, %v4689_v53, 0.0  ;;  %v3403_v58 = vmul.f32 %v4689_v53, %v4689_v53  ;;  %3507 = vst.msk [vmem:[%s4989_s28 + $0xa0] sm:$0xff] %vm457_vm3, %v4689_v53  ;;  %v4456_v4 = vpop.f32.mrb[24].mxu1  ;;  %v4653_v60 = vpop.f32.mrb[22].mxu0 }
 0x226   : > { %v3354_v0 = vadd.f32 %v3353_v21, %v3352_v19  ;;  %v3453_v14 = vadd.f32 %v3452_v36, %v3451_v39  ;;  %v4690_v1 = vadd.f32 %v4653_v60, %v4453_v7  ;;  %v2167_v23 = vpop.f32.mrb[25].mxu1  ;;  %v3233_v35 = vpop.f32.mrb[23].mxu0  ;;  %v3456_v52 = vsel %vm457_vm3, %v3404_v47, 0.0 }
 0x227   : > { %v3454_v61 = vsel %vm457_vm3, %v3403_v58, 0.0  ;;  %v4691_v10 = vadd.f32 %v3233_v35, %v2157_v49 }
 0x228   : > { %v3455_v42 = vadd.f32 %v3454_v61, %v3453_v14  ;;  %3510 = vst.msk [vmem:[%s4989_s28 + $0xb8] sm:$0xff] %vm457_vm3, %v4690_v1  ;;  %v3356_v48 = vadd.f32 %v3355_v44, %v3354_v0  ;;  %v3406_v59 = vmul.f32 %v4690_v1, %v4690_v1  ;;  %v3359_v62 = vsel %vm457_vm3, %v4690_v1, 0.0 }
 0x229   : > { %v3357_v63 = vsel %vm457_vm3, %v4691_v10, 0.0  ;;  %v3405_v12 = vmul.f32 %v4691_v10, %v4691_v10  ;;  %3509 = vst.msk [vmem:[%s4989_s28 + $0xb0] sm:$0xff] %vm457_vm3, %v4691_v10  ;;  %v4459_v38 = vpop.f32.mrb[26].mxu1  ;;  %v4656_v56 = vpop.f32.mrb[24].mxu0 }
 0x22a   : > { %v3358_v27 = vadd.f32 %v3357_v63, %v3356_v48  ;;  %v3457_v9 = vadd.f32 %v3456_v52, %v3455_v42  ;;  %v4692_v2 = vadd.f32 %v4656_v56, %v4456_v4  ;;  %v2177_v28 = vpop.f32.mrb[27].mxu1  ;;  %v3243_v15 = vpop.f32.mrb[25].mxu0  ;;  %v3460_v50 = vsel %vm457_vm3, %v3406_v59, 0.0 }
 0x22b   : > { %v3458_v29 = vsel %vm457_vm3, %v3405_v12, 0.0  ;;  %v4693_v51 = vadd.f32 %v3243_v15, %v2167_v23 }
 0x22c   : > { %v3459_v32 = vadd.f32 %v3458_v29, %v3457_v9  ;;  %3512 = vst.msk [vmem:[%s4989_s28 + $0xc8] sm:$0xff] %vm457_vm3, %v4692_v2  ;;  %v3360_v55 = vadd.f32 %v3359_v62, %v3358_v27  ;;  %v3408_v41 = vmul.f32 %v4692_v2, %v4692_v2  ;;  %v3363_v31 = vsel %vm457_vm3, %v4692_v2, 0.0 }
 0x22d   : > { %v3361_v57 = vsel %vm457_vm3, %v4693_v51, 0.0  ;;  %v3407_v8 = vmul.f32 %v4693_v51, %v4693_v51  ;;  %3511 = vst.msk [vmem:[%s4989_s28 + $0xc0] sm:$0xff] %vm457_vm3, %v4693_v51  ;;  %v4462_v16 = vpop.f32.mrb[28].mxu1  ;;  %v4659_v17 = vpop.f32.mrb[26].mxu0 }
 0x22e   : > { %v3362_v45 = vadd.f32 %v3361_v57, %v3360_v55  ;;  %v3461_v11 = vadd.f32 %v3460_v50, %v3459_v32  ;;  %v4694_v13 = vadd.f32 %v4659_v17, %v4459_v38  ;;  %v2187_v18 = vpop.f32.mrb[29].mxu1  ;;  %v3253_v34 = vpop.f32.mrb[27].mxu0  ;;  %v3464_v24 = vsel %vm457_vm3, %v3408_v41, 0.0 }
 0x22f   : > { %v3462_v30 = vsel %vm457_vm3, %v3407_v8, 0.0  ;;  %v4695_v46 = vadd.f32 %v3253_v34, %v2177_v28 }
 0x230   : > { %v3463_v40 = vadd.f32 %v3462_v30, %v3461_v11  ;;  %3514 = vst.msk [vmem:[%s4989_s28 + $0xd8] sm:$0xff] %vm457_vm3, %v4694_v13  ;;  %v3364_v6 = vadd.f32 %v3363_v31, %v3362_v45  ;;  %v3410_v3 = vmul.f32 %v4694_v13, %v4694_v13  ;;  %v3367_v20 = vsel %vm457_vm3, %v4694_v13, 0.0 }
 0x231   : > { %v3365_v33 = vsel %vm457_vm3, %v4695_v46, 0.0  ;;  %v3409_v43 = vmul.f32 %v4695_v46, %v4695_v46  ;;  %3513 = vst.msk [vmem:[%s4989_s28 + $0xd0] sm:$0xff] %vm457_vm3, %v4695_v46  ;;  %v4465_v7 = vpop.f32.mrb[30].mxu1  ;;  %v4662_v25 = vpop.f32.mrb[28].mxu0 }
 0x232   : > { %v3366_v26 = vadd.f32 %v3365_v33, %v3364_v6  ;;  %v3465_v22 = vadd.f32 %v3464_v24, %v3463_v40  ;;  %v4696_v37 = vadd.f32 %v4662_v25, %v4462_v16  ;;  %v2197_v49 = vpop.f32.mrb[31].mxu1  ;;  %v3263_v5 = vpop.f32.mrb[29].mxu0  ;;  %v3468_v36 = vsel %vm457_vm3, %v3410_v3, 0.0 }
 0x233   : > { %v3466_v54 = vsel %vm457_vm3, %v3409_v43, 0.0  ;;  %v4697_v53 = vadd.f32 %v3263_v5, %v2187_v18 }
 0x234   : > { %v3467_v39 = vadd.f32 %v3466_v54, %v3465_v22  ;;  %3516 = vst.msk [vmem:[%s4989_s28 + $0xe8] sm:$0xff] %vm457_vm3, %v4696_v37  ;;  %v3368_v19 = vadd.f32 %v3367_v20, %v3366_v26  ;;  %v3412_v47 = vmul.f32 %v4696_v37, %v4696_v37  ;;  %v3371_v23 = vsel %vm457_vm3, %v4696_v37, 0.0 }
 0x235   : > { %v3369_v21 = vsel %vm457_vm3, %v4697_v53, 0.0  ;;  %v3411_v58 = vmul.f32 %v4697_v53, %v4697_v53  ;;  %3515 = vst.msk [vmem:[%s4989_s28 + $0xe0] sm:$0xff] %vm457_vm3, %v4697_v53  ;;  %v4665_v4 = vpop.f32.mrb[30].mxu0 }
 0x236   : > { %v3370_v60 = vadd.f32 %v3369_v21, %v3368_v19  ;;  %v3469_v0 = vadd.f32 %v3468_v36, %v3467_v39  ;;  %v4698_v14 = vadd.f32 %v4665_v4, %v4465_v7  ;;  %v3273_v1 = vpop.f32.mrb[31].mxu0  ;;  %v3472_v42 = vsel %vm457_vm3, %v3412_v47, 0.0 }
 0x237   : > { %v3470_v35 = vsel %vm457_vm3, %v3411_v58, 0.0  ;;  %v4699_v44 = vadd.f32 %v3273_v1, %v2197_v49 }
 0x238   : > { %v3471_v61 = vadd.f32 %v3470_v35, %v3469_v0  ;;  %3518 = vst.msk [vmem:[%s4989_s28 + $0xf8] sm:$0xff] %vm457_vm3, %v4698_v14  ;;  %v3372_v10 = vadd.f32 %v3371_v23, %v3370_v60  ;;  %v3414_v48 = vmul.f32 %v4698_v14, %v4698_v14  ;;  %v3375_v38 = vsel %vm457_vm3, %v4698_v14, 0.0 }
 0x239   : > { %v3373_v52 = vsel %vm457_vm3, %v4699_v44, 0.0  ;;  %v3413_v59 = vmul.f32 %v4699_v44, %v4699_v44  ;;  %3517 = vst.msk [vmem:[%s4989_s28 + $0xf0] sm:$0xff] %vm457_vm3, %v4699_v44 }
 0x23a   : > { %v3374_v63 = vadd.f32 %v3373_v52, %v3372_v10  ;;  %v3473_v12 = vadd.f32 %v3472_v42, %v3471_v61  ;;  %v3476_v2 = vsel %vm457_vm3, %v3414_v48, 0.0 }
 0x23b   : > { %v3474_v56 = vsel %vm457_vm3, %v3413_v59, 0.0 }
 0x23c   : > { %v3376_v27 = vadd.f32 %v3375_v38, %v3374_v63  ;;  %v3475_v9 = vadd.f32 %v3474_v56, %v3473_v12 }
 0x23e   : > { %v3377_v28 = vrot.slane %v3376_v27, 4  ;;  %v3477_v15 = vadd.f32 %v3476_v2, %v3475_v9 }
 0x240   : > { %v3378_v62 = vadd.f32 %v3377_v28, %v3376_v27  ;;  %v3478_v29 = vrot.slane %v3477_v15, 4 }
 0x242   : > { %v3379_v51 = vrot.slane %v3378_v62, 2  ;;  %v3479_v32 = vadd.f32 %v3478_v29, %v3477_v15 }
 0x244   : > { %v3380_v55 = vadd.f32 %v3379_v51, %v3378_v62  ;;  %v3480_v50 = vrot.slane %v3479_v32, 2 }
 0x246   : > { %v3381_v41 = vrot.slane %v3380_v55, 1  ;;  %v3481_v57 = vadd.f32 %v3480_v50, %v3479_v32 }
 0x248   : > { %v3482_v8 = vrot.slane %v3481_v57, 1  ;;  %v3382_v16 = vadd.f32 %v3381_v41, %v3380_v55 }
 0x24a   : > { %v3483_v17 = vadd.f32 %v3482_v8, %v3481_v57 }
 0x24c   : > { %v3484_v45 = vsel %vm615_vm4, %v3382_v16, %v3483_v17 }
 0x24d   : > { %3486 = vst.msk [vmem:[%s4994_s6] sm:$0x3] %vm3485_vm6, %v3484_v45 }
 0x24e PF: > { %s16_s18 = sadd.s32 1, %s4940_s18  }
 0x24f   : > { %p13_p5 = scmp.ge.s32.totalorder %s16_s18, 4  }
 0x251   :  { %15 = sbr.rel (!%p13_p5) target bundleno = 1 (0x1), region = 83 }

</bundles_post_ra>
